<compile_context>
chip_gen: v7x
topology: tpu7x:2x2x1
jax: 0.10.0
libtpu: 0.0.40
codegen_flags: <defaults>
</compile_context>

<pallas_src>
import functools

import jax
import jax.numpy as jnp
from jax.experimental import pallas as pl
from jax.experimental.pallas import tpu as pltpu

K = 7   # kernel_size (7 -> padding 3, matching the PyTorch module)
P = 3   # padding


def _spatial_attention_kernel(H, W, w_ref, x_ref, o_ref,
                              sum_ref, max_ref, pad_ref):
    # w_ref   : SMEM f32[2*K*K]    prefetched conv weights (ch0 pre-scaled by 1/C)
    # x_ref   : VMEM (Bn, Ct, HW)  input block (batch block x channel chunk)
    # o_ref   : VMEM (Bn, HW)      attention map, lane-dense
    # sum_ref : VMEM (Bn, HW) f32  running channel sum
    # max_ref : VMEM (Bn, HW) f32  running channel max
    # pad_ref : VMEM (2, Bn, L) f32 zero-padded flat [sum; max] pooled maps
    k = pl.program_id(1)
    bn, hw = o_ref.shape
    ct = x_ref.shape[1]
    d0 = P * W + P                       # flat offset of the H*W map in pad_ref

    # Reset channel-reduction accumulators at the start of each batch block.
    @pl.when(k == 0)
    def _():
        sum_ref[...] = jnp.zeros_like(sum_ref)
        max_ref[...] = jnp.full_like(max_ref, -jnp.inf)

    # Fused single-pass channel reduction: each 8-sublane slab of x is read
    # once and updates both accumulators; temporaries stay at (Bn, 8, HW).
    def _update(xs):
        sum_ref[...] = sum_ref[...] + jnp.sum(xs, axis=1)
        max_ref[...] = jnp.maximum(max_ref[...], jnp.max(xs, axis=1))

    n_full, rem = ct // 8, ct % 8
    if 0 < n_full <= 8:                  # short: fully unrolled static slices
        for i in range(n_full):
            _update(x_ref[:, i * 8:(i + 1) * 8, :].astype(jnp.float32))
    elif n_full > 8:                     # long: rolled loop, aligned dyn offset
        def body(i, carry):
            off = pl.multiple_of(i * 8, 8)
            _update(x_ref[:, pl.ds(off, 8), :].astype(jnp.float32))
            return carry
        jax.lax.fori_loop(0, n_full, body, 0)
    if rem:
        _update(x_ref[:, n_full * 8:, :].astype(jnp.float32))

    # Finalize: 7x7 conv over the 2 pooled maps, sigmoid, lane-dense store.
    @pl.when(k == pl.num_programs(1) - 1)
    def _():
        # Re-zero the padded scratch for THIS batch block (cheap, and correct
        # when the parallel batch axis is sharded across TensorCores), then
        # write the pooled maps into its interior.
        pad_ref[...] = jnp.zeros_like(pad_ref)
        pad_ref[0, :, d0:d0 + hw] = sum_ref[...]   # ch 0: sum (weights hold 1/C)
        pad_ref[1, :, d0:d0 + hw] = max_ref[...]   # ch 1: max

        # Column-validity masks for the K dx taps, generated in-kernel: the
        # flat layout only zero-pads rows, so dx taps that would leak across a
        # row boundary are masked here.
        col = jax.lax.broadcasted_iota(jnp.int32, (1, hw), 1) % W
        masks = [((col + dx >= P) & (col + dx < W + P)).astype(jnp.float32)
                 for dx in range(K)]

        acc = jnp.zeros((bn, hw), jnp.float32)
        for c in range(2):
            for dy in range(K):
                # One VMEM slice per (channel, dy) row slab; the 7 dx taps are
                # in-register lane shifts of this slab.
                row = pad_ref[c, :, dy * W:dy * W + hw + K - 1]
                for dx in range(K):
                    wmask = w_ref[c * K * K + dy * K + dx] * masks[dx]
                    acc = acc + row[:, dx:dx + hw] * wmask
        o_ref[...] = jax.nn.sigmoid(acc).astype(o_ref.dtype)


def _vmem_capacity_bytes():
    """Per-core VMEM capacity; conservative 64 MiB fallback (v7x-sized)."""
    try:
        cap = int(pltpu.get_tpu_info().vmem_capacity_bytes)
        if cap > 0:
            return cap
    except Exception:
        pass
    try:
        kind = jax.devices()[0].device_kind.lower()
    except Exception:
        kind = ""
    if any(t in kind for t in ("v5 lite", "v5e", "v5litepod", "v6")):
        return 128 * 1024 * 1024
    return 64 * 1024 * 1024


def _choose_blocks(N, C, H, W, itemsize, budget_total):
    """Pick (Bn, Ct) so ALL VMEM consumers fit inside budget_total."""
    HW = H * W
    L = (H + 2 * P) * W + 2 * P
    sub = max(8, 32 // itemsize)         # sublane multiple: f32 8, bf16 16, int8 32

    ct_cands = [d for d in range(1, C + 1) if C % d == 0 and (d == C or d % sub == 0)]
    bn_cands = [d for d in range(1, N + 1) if N % d == 0 and (d == N or d % sub == 0)]

    def bytes_used(bn, ct):
        x_dbuf = 2 * bn * ct * HW * itemsize          # double-buffered input block
        o_dbuf = 2 * bn * HW * itemsize               # double-buffered output block
        scratch = 2 * bn * HW * 4 + 2 * bn * L * 4    # sum + max + padded maps
        temps = (min(8, ct) + 4) * bn * HW * 4        # reduction slab + conv temps
        return x_dbuf + o_dbuf + scratch + temps

    # Grow the channel chunk first (contiguous DMA; scratch size is Ct-free).
    fit_ct = [d for d in ct_cands if bytes_used(1, d) <= budget_total]
    ct = max(fit_ct) if fit_ct else min(ct_cands)
    # Then grow the batch block, preferring >=2 grid steps on the parallel
    # (batch) axis so both of v7x's TensorCores get work.
    fit_bn = [d for d in bn_cands if bytes_used(d, ct) <= budget_total]
    if not fit_bn:
        bn = min(bn_cands)
    else:
        multi = [d for d in fit_bn if N // d >= 2]
        bn = max(multi) if multi else max(fit_bn)
    return bn, ct, bytes_used(bn, ct)


def spatial_attention(x, conv_w):
    """x: (N, C, H, W); conv_w: (1, 2, K, K), no bias.  Returns (N, 1, H, W)."""
    N, C, H, W = x.shape
    HW = H * W
    L = (H + 2 * P) * W + 2 * P
    itemsize = jnp.dtype(x.dtype).itemsize

    cap = _vmem_capacity_bytes()
    budget = (cap * 3) // 4                       # ~96 MiB v5e/v6e, ~48 MiB v7x
    Bn, Ct, used = _choose_blocks(N, C, H, W, itemsize, budget)
    grid = (N // Bn, C // Ct)
    vmem_limit = int(min(cap, max(used + used // 4, 32 * 1024 * 1024)))

    x_flat = x.reshape(N, C, HW)                  # lane-dense minor dim
    # Fold the 1/C mean into the channel-0 weights (the kernel accumulates a sum).
    w_flat = jnp.concatenate(
        [conv_w[0, 0].reshape(-1) * (1.0 / C), conv_w[0, 1].reshape(-1)]
    ).astype(jnp.float32)

    grid_spec = pltpu.PrefetchScalarGridSpec(
        num_scalar_prefetch=1,
        grid=grid,
        in_specs=[pl.BlockSpec((Bn, Ct, HW), lambda n, k, w: (n, k, 0))],
        out_specs=pl.BlockSpec((Bn, HW), lambda n, k, w: (n, 0)),
        scratch_shapes=[
            pltpu.VMEM((Bn, HW), jnp.float32),        # running channel sum
            pltpu.VMEM((Bn, HW), jnp.float32),        # running channel max
            pltpu.VMEM((2, Bn, L), jnp.float32),      # padded [sum; max] maps
        ],
    )

    kernel = functools.partial(_spatial_attention_kernel, H, W)
    out_flat = pl.pallas_call(
        kernel,
        out_shape=jax.ShapeDtypeStruct((N, HW), x.dtype),
        grid_spec=grid_spec,
        compiler_params=pltpu.CompilerParams(
            dimension_semantics=("parallel", "arbitrary"),
            vmem_limit_bytes=vmem_limit),
    )(w_flat, x_flat)

    return out_flat.reshape(N, 1, H, W)


def spatial_attention_ref(x, conv_w):
    """Pure-JAX reference mirroring the PyTorch forward."""
    avg_out = jnp.mean(x, axis=1, keepdims=True)
    max_out = jnp.max(x, axis=1, keepdims=True)
    cat = jnp.concatenate([avg_out, max_out], axis=1)
    y = jax.lax.conv_general_dilated(
        cat, conv_w, window_strides=(1, 1), padding=((P, P), (P, P)),
        dimension_numbers=("NCHW", "OIHW", "NCHW"))
    return jax.nn.sigmoid(y)


if __name__ == "__main__":
    key = jax.random.PRNGKey(0)
    kx, kw = jax.random.split(key)

    # Small shapes consistent with the module: batch=2, channels=4, spatial=16.
    x = jax.random.normal(kx, (2, 4, 16, 16), dtype=jnp.float32)

    # Deterministic Conv2d(2, 1, 7, padding=3, bias=False) weight init
    # (PyTorch default kaiming_uniform(a=sqrt(5)) -> U(-1/sqrt(fan_in), 1/sqrt(fan_in))).
    fan_in = 2 * K * K
    bound = 1.0 / jnp.sqrt(jnp.float32(fan_in))
    conv_w = jax.random.uniform(kw, (1, 2, K, K), dtype=jnp.float32,
                                minval=-bound, maxval=bound)

    out = spatial_attention(x, conv_w)
    out = jax.block_until_ready(out)

    ref = spatial_attention_ref(x, conv_w)
    assert out.shape == (2, 1, 16, 16)
    assert jnp.allclose(out, ref, rtol=1e-5, atol=1e-5), "mismatch vs reference"

    print("KERNEL_OK")
</pallas_src>

<mosaic_0001>
module attributes {stable_mosaic.version = 11 : i64} {
  func.func @_spatial_attention_kernel(%arg0: i32, %arg1: i32, %arg2: memref<98xf32, #tpu.memory_space<smem>>, %arg3: memref<2x4x256xf32, #tpu.memory_space<vmem>>, %arg4: memref<2x256xf32, #tpu.memory_space<vmem>>, %arg5: memref<2x256xf32, #tpu.memory_space<vmem>>, %arg6: memref<2x256xf32, #tpu.memory_space<vmem>>, %arg7: memref<2x2x358xf32, #tpu.memory_space<vmem>>) attributes {dimension_semantics = [#tpu.dimension_semantics<parallel>, #tpu.dimension_semantics<arbitrary>], iteration_bounds = array<i64: 1, 1>, scalar_prefetch = 1 : i64, scratch_operands = 3 : i64, tpu.core_type = #tpu.core_type<tc>, window_params = [{transform_indices = @transform_0, window_bounds = array<i64: 2, 4, 256>}, {transform_indices = @transform_1, window_bounds = array<i64: 2, 256>}]} {
    %c0_i32 = arith.constant 0 : i32
    %0 = arith.cmpi eq, %arg1, %c0_i32 : i32
    %1 = arith.extui %0 : i1 to i32
    %c0_i32_0 = arith.constant 0 : i32
    %2 = arith.cmpi ne, %1, %c0_i32_0 : i32
    scf.if %2 {
      %cst_14 = arith.constant 0.000000e+00 : f32
      %15 = vector.broadcast %cst_14 : f32 to vector<2x256xf32>
      %c0_15 = arith.constant 0 : index
      %c0_16 = arith.constant 0 : index
      %16 = vector.load %arg5[%c0_15, %c0_16] : memref<2x256xf32, #tpu.memory_space<vmem>>, vector<2x256xf32>
      tpu.vector_store %arg5[%c0_15, %c0_16], %15 {strides = array<i32>} : memref<2x256xf32, #tpu.memory_space<vmem>>, vector<2x256xf32>,
      %cst_17 = arith.constant 0xFF800000 : f32
      %17 = vector.broadcast %cst_17 : f32 to vector<2x256xf32>
      %c0_18 = arith.constant 0 : index
      %c0_19 = arith.constant 0 : index
      %18 = vector.load %arg6[%c0_18, %c0_19] : memref<2x256xf32, #tpu.memory_space<vmem>>, vector<2x256xf32>
      tpu.vector_store %arg6[%c0_18, %c0_19], %17 {strides = array<i32>} : memref<2x256xf32, #tpu.memory_space<vmem>>, vector<2x256xf32>,
    } else {
    }
    %c0 = arith.constant 0 : index
    %c0_1 = arith.constant 0 : index
    %c0_2 = arith.constant 0 : index
    %3 = vector.load %arg3[%c0, %c0_1, %c0_2] : memref<2x4x256xf32, #tpu.memory_space<vmem>>, vector<2x4x256xf32>
    %c0_3 = arith.constant 0 : index
    %c0_4 = arith.constant 0 : index
    %4 = vector.load %arg5[%c0_3, %c0_4] : memref<2x256xf32, #tpu.memory_space<vmem>>, vector<2x256xf32>
    %cst = arith.constant dense<0.000000e+00> : vector<2x256xf32>
    %5 = vector.multi_reduction <add>, %3, %cst [1] : vector<2x4x256xf32> to vector<2x256xf32>
    %6 = arith.addf %4, %5 : vector<2x256xf32>
    %c0_5 = arith.constant 0 : index
    %c0_6 = arith.constant 0 : index
    %7 = vector.load %arg5[%c0_5, %c0_6] : memref<2x256xf32, #tpu.memory_space<vmem>>, vector<2x256xf32>
    tpu.vector_store %arg5[%c0_5, %c0_6], %6 {strides = array<i32>} : memref<2x256xf32, #tpu.memory_space<vmem>>, vector<2x256xf32>,
    %c0_7 = arith.constant 0 : index
    %c0_8 = arith.constant 0 : index
    %8 = vector.load %arg6[%c0_7, %c0_8] : memref<2x256xf32, #tpu.memory_space<vmem>>, vector<2x256xf32>
    %cst_9 = arith.constant dense<0xFF800000> : vector<2x256xf32>
    %9 = vector.multi_reduction <maximumf>, %3, %cst_9 [1] : vector<2x4x256xf32> to vector<2x256xf32>
    %10 = arith.maximumf %8, %9 : vector<2x256xf32>
    %c0_10 = arith.constant 0 : index
    %c0_11 = arith.constant 0 : index
    %11 = vector.load %arg6[%c0_10, %c0_11] : memref<2x256xf32, #tpu.memory_space<vmem>>, vector<2x256xf32>
    tpu.vector_store %arg6[%c0_10, %c0_11], %10 {strides = array<i32>} : memref<2x256xf32, #tpu.memory_space<vmem>>, vector<2x256xf32>,
    %c0_i32_12 = arith.constant 0 : i32
    %12 = arith.cmpi eq, %arg1, %c0_i32_12 : i32
    %13 = arith.extui %12 : i1 to i32
    %c0_i32_13 = arith.constant 0 : i32
    %14 = arith.cmpi ne, %13, %c0_i32_13 : i32
    scf.if %14 {
      %cst_14 = arith.constant 0.000000e+00 : f32
      %15 = vector.broadcast %cst_14 : f32 to vector<2x2x358xf32>
      %c0_15 = arith.constant 0 : index
      %c0_16 = arith.constant 0 : index
      %c0_17 = arith.constant 0 : index
      %16 = vector.load %arg7[%c0_15, %c0_16, %c0_17] : memref<2x2x358xf32, #tpu.memory_space<vmem>>, vector<2x2x358xf32>
      tpu.vector_store %arg7[%c0_15, %c0_16, %c0_17], %15 {strides = array<i32>} : memref<2x2x358xf32, #tpu.memory_space<vmem>>, vector<2x2x358xf32>,
      %c0_18 = arith.constant 0 : index
      %c0_19 = arith.constant 0 : index
      %17 = vector.load %arg5[%c0_18, %c0_19] : memref<2x256xf32, #tpu.memory_space<vmem>>, vector<2x256xf32>
      %c0_20 = arith.constant 0 : index
      %c0_21 = arith.constant 0 : index
      %c51 = arith.constant 51 : index
      %18 = vector.load %arg7[%c0_20, %c0_21, %c51] : memref<2x2x358xf32, #tpu.memory_space<vmem>>, vector<1x2x256xf32>
      %19 = vector.shape_cast %18 : vector<1x2x256xf32> to vector<2x256xf32>
      %20 = vector.shape_cast %17 : vector<2x256xf32> to vector<1x2x256xf32>
      tpu.vector_store %arg7[%c0_20, %c0_21, %c51], %20 {strides = array<i32>} : memref<2x2x358xf32, #tpu.memory_space<vmem>>, vector<1x2x256xf32>,
      %c0_22 = arith.constant 0 : index
      %c0_23 = arith.constant 0 : index
      %21 = vector.load %arg6[%c0_22, %c0_23] : memref<2x256xf32, #tpu.memory_space<vmem>>, vector<2x256xf32>
      %c1 = arith.constant 1 : index
      %c0_24 = arith.constant 0 : index
      %c51_25 = arith.constant 51 : index
      %22 = vector.load %arg7[%c1, %c0_24, %c51_25] : memref<2x2x358xf32, #tpu.memory_space<vmem>>, vector<1x2x256xf32>
      %23 = vector.shape_cast %22 : vector<1x2x256xf32> to vector<2x256xf32>
      %24 = vector.shape_cast %21 : vector<2x256xf32> to vector<1x2x256xf32>
      tpu.vector_store %arg7[%c1, %c0_24, %c51_25], %24 {strides = array<i32>} : memref<2x2x358xf32, #tpu.memory_space<vmem>>, vector<1x2x256xf32>,
      %25 = tpu.iota {dimensions = array<i32: 1>} : vector<1x256xi32>
      %c16_i32 = arith.constant 16 : i32
      %c0_i32_26 = arith.constant 0 : i32
      %26 = arith.cmpi eq, %c16_i32, %c0_i32_26 : i32
      %c1_i32 = arith.constant 1 : i32
      %27 = arith.select %26, %c1_i32, %c16_i32 : i32
      %28 = vector.broadcast %27 : i32 to vector<1x256xi32>
      %29 = arith.remsi %25, %28 : vector<1x256xi32>
      %c0_i32_27 = arith.constant 0 : i32
      %30 = vector.broadcast %c0_i32_27 : i32 to vector<1x256xi32>
      %31 = arith.cmpi ne, %29, %30 : vector<1x256xi32>
      %c0_i32_28 = arith.constant 0 : i32
      %32 = vector.broadcast %c0_i32_28 : i32 to vector<1x256xi32>
      %33 = arith.cmpi slt, %29, %32 : vector<1x256xi32>
      %c0_i32_29 = arith.constant 0 : i32
      %34 = arith.cmpi slt, %27, %c0_i32_29 : i32
      %35 = vector.broadcast %34 : i1 to vector<1x256xi1>
      %36 = vector.broadcast %35 : vector<1x256xi1> to vector<1x256xi1>
      %37 = arith.xori %33, %36 : vector<1x256xi1>
      %38 = arith.andi %37, %31 : vector<1x256xi1>
      %39 = vector.broadcast %27 : i32 to vector<1x256xi32>
      %40 = arith.addi %29, %39 : vector<1x256xi32>
      %41 = arith.select %38, %40, %29 : vector<1x256xi1>, vector<1x256xi32>
      %c0_i32_30 = arith.constant 0 : i32
      %42 = vector.broadcast %c0_i32_30 : i32 to vector<1x256xi32>
      %43 = arith.addi %41, %42 : vector<1x256xi32>
      %c3_i32 = arith.constant 3 : i32
      %44 = vector.broadcast %c3_i32 : i32 to vector<1x256xi32>
      %45 = arith.cmpi sge, %43, %44 : vector<1x256xi32>
      %c0_i32_31 = arith.constant 0 : i32
      %46 = vector.broadcast %c0_i32_31 : i32 to vector<1x256xi32>
      %47 = arith.addi %41, %46 : vector<1x256xi32>
      %c19_i32 = arith.constant 19 : i32
      %48 = vector.broadcast %c19_i32 : i32 to vector<1x256xi32>
      %49 = arith.cmpi slt, %47, %48 : vector<1x256xi32>
      %50 = arith.andi %45, %49 : vector<1x256xi1>
      %51 = arith.extui %50 : vector<1x256xi1> to vector<1x256xi32>
      %52 = arith.sitofp %51 : vector<1x256xi32> to vector<1x256xf32>
      %c1_i32_32 = arith.constant 1 : i32
      %53 = vector.broadcast %c1_i32_32 : i32 to vector<1x256xi32>
      %54 = arith.addi %41, %53 : vector<1x256xi32>
      %c3_i32_33 = arith.constant 3 : i32
      %55 = vector.broadcast %c3_i32_33 : i32 to vector<1x256xi32>
      %56 = arith.cmpi sge, %54, %55 : vector<1x256xi32>
      %c1_i32_34 = arith.constant 1 : i32
      %57 = vector.broadcast %c1_i32_34 : i32 to vector<1x256xi32>
      %58 = arith.addi %41, %57 : vector<1x256xi32>
      %c19_i32_35 = arith.constant 19 : i32
      %59 = vector.broadcast %c19_i32_35 : i32 to vector<1x256xi32>
      %60 = arith.cmpi slt, %58, %59 : vector<1x256xi32>
      %61 = arith.andi %56, %60 : vector<1x256xi1>
      %62 = arith.extui %61 : vector<1x256xi1> to vector<1x256xi32>
      %63 = arith.sitofp %62 : vector<1x256xi32> to vector<1x256xf32>
      %c2_i32 = arith.constant 2 : i32
      %64 = vector.broadcast %c2_i32 : i32 to vector<1x256xi32>
      %65 = arith.addi %41, %64 : vector<1x256xi32>
      %c3_i32_36 = arith.constant 3 : i32
      %66 = vector.broadcast %c3_i32_36 : i32 to vector<1x256xi32>
      %67 = arith.cmpi sge, %65, %66 : vector<1x256xi32>
      %c2_i32_37 = arith.constant 2 : i32
      %68 = vector.broadcast %c2_i32_37 : i32 to vector<1x256xi32>
      %69 = arith.addi %41, %68 : vector<1x256xi32>
      %c19_i32_38 = arith.constant 19 : i32
      %70 = vector.broadcast %c19_i32_38 : i32 to vector<1x256xi32>
      %71 = arith.cmpi slt, %69, %70 : vector<1x256xi32>
      %72 = arith.andi %67, %71 : vector<1x256xi1>
      %73 = arith.extui %72 : vector<1x256xi1> to vector<1x256xi32>
      %74 = arith.sitofp %73 : vector<1x256xi32> to vector<1x256xf32>
      %c3_i32_39 = arith.constant 3 : i32
      %75 = vector.broadcast %c3_i32_39 : i32 to vector<1x256xi32>
      %76 = arith.addi %41, %75 : vector<1x256xi32>
      %c3_i32_40 = arith.constant 3 : i32
      %77 = vector.broadcast %c3_i32_40 : i32 to vector<1x256xi32>
      %78 = arith.cmpi sge, %76, %77 : vector<1x256xi32>
      %c3_i32_41 = arith.constant 3 : i32
      %79 = vector.broadcast %c3_i32_41 : i32 to vector<1x256xi32>
      %80 = arith.addi %41, %79 : vector<1x256xi32>
      %c19_i32_42 = arith.constant 19 : i32
      %81 = vector.broadcast %c19_i32_42 : i32 to vector<1x256xi32>
      %82 = arith.cmpi slt, %80, %81 : vector<1x256xi32>
      %83 = arith.andi %78, %82 : vector<1x256xi1>
      %84 = arith.extui %83 : vector<1x256xi1> to vector<1x256xi32>
      %85 = arith.sitofp %84 : vector<1x256xi32> to vector<1x256xf32>
      %c4_i32 = arith.constant 4 : i32
      %86 = vector.broadcast %c4_i32 : i32 to vector<1x256xi32>
      %87 = arith.addi %41, %86 : vector<1x256xi32>
      %c3_i32_43 = arith.constant 3 : i32
      %88 = vector.broadcast %c3_i32_43 : i32 to vector<1x256xi32>
      %89 = arith.cmpi sge, %87, %88 : vector<1x256xi32>
      %c4_i32_44 = arith.constant 4 : i32
      %90 = vector.broadcast %c4_i32_44 : i32 to vector<1x256xi32>
      %91 = arith.addi %41, %90 : vector<1x256xi32>
      %c19_i32_45 = arith.constant 19 : i32
      %92 = vector.broadcast %c19_i32_45 : i32 to vector<1x256xi32>
      %93 = arith.cmpi slt, %91, %92 : vector<1x256xi32>
      %94 = arith.andi %89, %93 : vector<1x256xi1>
      %95 = arith.extui %94 : vector<1x256xi1> to vector<1x256xi32>
      %96 = arith.sitofp %95 : vector<1x256xi32> to vector<1x256xf32>
      %c5_i32 = arith.constant 5 : i32
      %97 = vector.broadcast %c5_i32 : i32 to vector<1x256xi32>
      %98 = arith.addi %41, %97 : vector<1x256xi32>
      %c3_i32_46 = arith.constant 3 : i32
      %99 = vector.broadcast %c3_i32_46 : i32 to vector<1x256xi32>
      %100 = arith.cmpi sge, %98, %99 : vector<1x256xi32>
      %c5_i32_47 = arith.constant 5 : i32
      %101 = vector.broadcast %c5_i32_47 : i32 to vector<1x256xi32>
      %102 = arith.addi %41, %101 : vector<1x256xi32>
      %c19_i32_48 = arith.constant 19 : i32
      %103 = vector.broadcast %c19_i32_48 : i32 to vector<1x256xi32>
      %104 = arith.cmpi slt, %102, %103 : vector<1x256xi32>
      %105 = arith.andi %100, %104 : vector<1x256xi1>
      %106 = arith.extui %105 : vector<1x256xi1> to vector<1x256xi32>
      %107 = arith.sitofp %106 : vector<1x256xi32> to vector<1x256xf32>
      %c6_i32 = arith.constant 6 : i32
      %108 = vector.broadcast %c6_i32 : i32 to vector<1x256xi32>
      %109 = arith.addi %41, %108 : vector<1x256xi32>
      %c3_i32_49 = arith.constant 3 : i32
      %110 = vector.broadcast %c3_i32_49 : i32 to vector<1x256xi32>
      %111 = arith.cmpi sge, %109, %110 : vector<1x256xi32>
      %c6_i32_50 = arith.constant 6 : i32
      %112 = vector.broadcast %c6_i32_50 : i32 to vector<1x256xi32>
      %113 = arith.addi %41, %112 : vector<1x256xi32>
      %c19_i32_51 = arith.constant 19 : i32
      %114 = vector.broadcast %c19_i32_51 : i32 to vector<1x256xi32>
      %115 = arith.cmpi slt, %113, %114 : vector<1x256xi32>
      %116 = arith.andi %111, %115 : vector<1x256xi1>
      %117 = arith.extui %116 : vector<1x256xi1> to vector<1x256xi32>
      %118 = arith.sitofp %117 : vector<1x256xi32> to vector<1x256xf32>
      %cst_52 = arith.constant 0.000000e+00 : f32
      %119 = vector.broadcast %cst_52 : f32 to vector<2x256xf32>
      %c0_53 = arith.constant 0 : index
      %c0_54 = arith.constant 0 : index
      %c0_55 = arith.constant 0 : index
      %120 = vector.load %arg7[%c0_53, %c0_54, %c0_55] : memref<2x2x358xf32, #tpu.memory_space<vmem>>, vector<1x2x262xf32>
      %121 = vector.shape_cast %120 : vector<1x2x262xf32> to vector<2x262xf32>
      %c0_56 = arith.constant 0 : index
      %122 = memref.load %arg2[%c0_56] : memref<98xf32, #tpu.memory_space<smem>>
      %123 = vector.broadcast %122 : f32 to vector<1x256xf32>
      %124 = arith.mulf %123, %52 : vector<1x256xf32>
      %125 = vector.extract_strided_slice %121 {offsets = [0, 0], sizes = [2, 256], strides = [1, 1]} : vector<2x262xf32> to vector<2x256xf32>
      %126 = vector.broadcast %124 : vector<1x256xf32> to vector<2x256xf32>
      %127 = arith.mulf %125, %126 : vector<2x256xf32>
      %128 = arith.addf %119, %127 : vector<2x256xf32>
      %c1_57 = arith.constant 1 : index
      %129 = memref.load %arg2[%c1_57] : memref<98xf32, #tpu.memory_space<smem>>
      %130 = vector.broadcast %129 : f32 to vector<1x256xf32>
      %131 = arith.mulf %130, %63 : vector<1x256xf32>
      %132 = vector.extract_strided_slice %121 {offsets = [0, 1], sizes = [2, 256], strides = [1, 1]} : vector<2x262xf32> to vector<2x256xf32>
      %133 = vector.broadcast %131 : vector<1x256xf32> to vector<2x256xf32>
      %134 = arith.mulf %132, %133 : vector<2x256xf32>
      %135 = arith.addf %128, %134 : vector<2x256xf32>
      %c2 = arith.constant 2 : index
      %136 = memref.load %arg2[%c2] : memref<98xf32, #tpu.memory_space<smem>>
      %137 = vector.broadcast %136 : f32 to vector<1x256xf32>
      %138 = arith.mulf %137, %74 : vector<1x256xf32>
      %139 = vector.extract_strided_slice %121 {offsets = [0, 2], sizes = [2, 256], strides = [1, 1]} : vector<2x262xf32> to vector<2x256xf32>
      %140 = vector.broadcast %138 : vector<1x256xf32> to vector<2x256xf32>
      %141 = arith.mulf %139, %140 : vector<2x256xf32>
      %142 = arith.addf %135, %141 : vector<2x256xf32>
      %c3 = arith.constant 3 : index
      %143 = memref.load %arg2[%c3] : memref<98xf32, #tpu.memory_space<smem>>
      %144 = vector.broadcast %143 : f32 to vector<1x256xf32>
      %145 = arith.mulf %144, %85 : vector<1x256xf32>
      %146 = vector.extract_strided_slice %121 {offsets = [0, 3], sizes = [2, 256], strides = [1, 1]} : vector<2x262xf32> to vector<2x256xf32>
      %147 = vector.broadcast %145 : vector<1x256xf32> to vector<2x256xf32>
      %148 = arith.mulf %146, %147 : vector<2x256xf32>
      %149 = arith.addf %142, %148 : vector<2x256xf32>
      %c4 = arith.constant 4 : index
      %150 = memref.load %arg2[%c4] : memref<98xf32, #tpu.memory_space<smem>>
      %151 = vector.broadcast %150 : f32 to vector<1x256xf32>
      %152 = arith.mulf %151, %96 : vector<1x256xf32>
      %153 = vector.extract_strided_slice %121 {offsets = [0, 4], sizes = [2, 256], strides = [1, 1]} : vector<2x262xf32> to vector<2x256xf32>
      %154 = vector.broadcast %152 : vector<1x256xf32> to vector<2x256xf32>
      %155 = arith.mulf %153, %154 : vector<2x256xf32>
      %156 = arith.addf %149, %155 : vector<2x256xf32>
      %c5 = arith.constant 5 : index
      %157 = memref.load %arg2[%c5] : memref<98xf32, #tpu.memory_space<smem>>
      %158 = vector.broadcast %157 : f32 to vector<1x256xf32>
      %159 = arith.mulf %158, %107 : vector<1x256xf32>
      %160 = vector.extract_strided_slice %121 {offsets = [0, 5], sizes = [2, 256], strides = [1, 1]} : vector<2x262xf32> to vector<2x256xf32>
      %161 = vector.broadcast %159 : vector<1x256xf32> to vector<2x256xf32>
      %162 = arith.mulf %160, %161 : vector<2x256xf32>
      %163 = arith.addf %156, %162 : vector<2x256xf32>
      %c6 = arith.constant 6 : index
      %164 = memref.load %arg2[%c6] : memref<98xf32, #tpu.memory_space<smem>>
      %165 = vector.broadcast %164 : f32 to vector<1x256xf32>
      %166 = arith.mulf %165, %118 : vector<1x256xf32>
      %167 = vector.extract_strided_slice %121 {offsets = [0, 6], sizes = [2, 256], strides = [1, 1]} : vector<2x262xf32> to vector<2x256xf32>
      %168 = vector.broadcast %166 : vector<1x256xf32> to vector<2x256xf32>
      %169 = arith.mulf %167, %168 : vector<2x256xf32>
      %170 = arith.addf %163, %169 : vector<2x256xf32>
      %c0_58 = arith.constant 0 : index
      %c0_59 = arith.constant 0 : index
      %c16 = arith.constant 16 : index
      %171 = vector.load %arg7[%c0_58, %c0_59, %c16] : memref<2x2x358xf32, #tpu.memory_space<vmem>>, vector<1x2x262xf32>
      %172 = vector.shape_cast %171 : vector<1x2x262xf32> to vector<2x262xf32>
      %c7 = arith.constant 7 : index
      %173 = memref.load %arg2[%c7] : memref<98xf32, #tpu.memory_space<smem>>
      %174 = vector.broadcast %173 : f32 to vector<1x256xf32>
      %175 = arith.mulf %174, %52 : vector<1x256xf32>
      %176 = vector.extract_strided_slice %172 {offsets = [0, 0], sizes = [2, 256], strides = [1, 1]} : vector<2x262xf32> to vector<2x256xf32>
      %177 = vector.broadcast %175 : vector<1x256xf32> to vector<2x256xf32>
      %178 = arith.mulf %176, %177 : vector<2x256xf32>
      %179 = arith.addf %170, %178 : vector<2x256xf32>
      %c8 = arith.constant 8 : index
      %180 = memref.load %arg2[%c8] : memref<98xf32, #tpu.memory_space<smem>>
      %181 = vector.broadcast %180 : f32 to vector<1x256xf32>
      %182 = arith.mulf %181, %63 : vector<1x256xf32>
      %183 = vector.extract_strided_slice %172 {offsets = [0, 1], sizes = [2, 256], strides = [1, 1]} : vector<2x262xf32> to vector<2x256xf32>
      %184 = vector.broadcast %182 : vector<1x256xf32> to vector<2x256xf32>
      %185 = arith.mulf %183, %184 : vector<2x256xf32>
      %186 = arith.addf %179, %185 : vector<2x256xf32>
      %c9 = arith.constant 9 : index
      %187 = memref.load %arg2[%c9] : memref<98xf32, #tpu.memory_space<smem>>
      %188 = vector.broadcast %187 : f32 to vector<1x256xf32>
      %189 = arith.mulf %188, %74 : vector<1x256xf32>
      %190 = vector.extract_strided_slice %172 {offsets = [0, 2], sizes = [2, 256], strides = [1, 1]} : vector<2x262xf32> to vector<2x256xf32>
      %191 = vector.broadcast %189 : vector<1x256xf32> to vector<2x256xf32>
      %192 = arith.mulf %190, %191 : vector<2x256xf32>
      %193 = arith.addf %186, %192 : vector<2x256xf32>
      %c10 = arith.constant 10 : index
      %194 = memref.load %arg2[%c10] : memref<98xf32, #tpu.memory_space<smem>>
      %195 = vector.broadcast %194 : f32 to vector<1x256xf32>
      %196 = arith.mulf %195, %85 : vector<1x256xf32>
      %197 = vector.extract_strided_slice %172 {offsets = [0, 3], sizes = [2, 256], strides = [1, 1]} : vector<2x262xf32> to vector<2x256xf32>
      %198 = vector.broadcast %196 : vector<1x256xf32> to vector<2x256xf32>
      %199 = arith.mulf %197, %198 : vector<2x256xf32>
      %200 = arith.addf %193, %199 : vector<2x256xf32>
      %c11 = arith.constant 11 : index
      %201 = memref.load %arg2[%c11] : memref<98xf32, #tpu.memory_space<smem>>
      %202 = vector.broadcast %201 : f32 to vector<1x256xf32>
      %203 = arith.mulf %202, %96 : vector<1x256xf32>
      %204 = vector.extract_strided_slice %172 {offsets = [0, 4], sizes = [2, 256], strides = [1, 1]} : vector<2x262xf32> to vector<2x256xf32>
      %205 = vector.broadcast %203 : vector<1x256xf32> to vector<2x256xf32>
      %206 = arith.mulf %204, %205 : vector<2x256xf32>
      %207 = arith.addf %200, %206 : vector<2x256xf32>
      %c12 = arith.constant 12 : index
      %208 = memref.load %arg2[%c12] : memref<98xf32, #tpu.memory_space<smem>>
      %209 = vector.broadcast %208 : f32 to vector<1x256xf32>
      %210 = arith.mulf %209, %107 : vector<1x256xf32>
      %211 = vector.extract_strided_slice %172 {offsets = [0, 5], sizes = [2, 256], strides = [1, 1]} : vector<2x262xf32> to vector<2x256xf32>
      %212 = vector.broadcast %210 : vector<1x256xf32> to vector<2x256xf32>
      %213 = arith.mulf %211, %212 : vector<2x256xf32>
      %214 = arith.addf %207, %213 : vector<2x256xf32>
      %c13 = arith.constant 13 : index
      %215 = memref.load %arg2[%c13] : memref<98xf32, #tpu.memory_space<smem>>
      %216 = vector.broadcast %215 : f32 to vector<1x256xf32>
      %217 = arith.mulf %216, %118 : vector<1x256xf32>
      %218 = vector.extract_strided_slice %172 {offsets = [0, 6], sizes = [2, 256], strides = [1, 1]} : vector<2x262xf32> to vector<2x256xf32>
      %219 = vector.broadcast %217 : vector<1x256xf32> to vector<2x256xf32>
      %220 = arith.mulf %218, %219 : vector<2x256xf32>
      %221 = arith.addf %214, %220 : vector<2x256xf32>
      %c0_60 = arith.constant 0 : index
      %c0_61 = arith.constant 0 : index
      %c32 = arith.constant 32 : index
      %222 = vector.load %arg7[%c0_60, %c0_61, %c32] : memref<2x2x358xf32, #tpu.memory_space<vmem>>, vector<1x2x262xf32>
      %223 = vector.shape_cast %222 : vector<1x2x262xf32> to vector<2x262xf32>
      %c14 = arith.constant 14 : index
      %224 = memref.load %arg2[%c14] : memref<98xf32, #tpu.memory_space<smem>>
      %225 = vector.broadcast %224 : f32 to vector<1x256xf32>
      %226 = arith.mulf %225, %52 : vector<1x256xf32>
      %227 = vector.extract_strided_slice %223 {offsets = [0, 0], sizes = [2, 256], strides = [1, 1]} : vector<2x262xf32> to vector<2x256xf32>
      %228 = vector.broadcast %226 : vector<1x256xf32> to vector<2x256xf32>
      %229 = arith.mulf %227, %228 : vector<2x256xf32>
      %230 = arith.addf %221, %229 : vector<2x256xf32>
      %c15 = arith.constant 15 : index
      %231 = memref.load %arg2[%c15] : memref<98xf32, #tpu.memory_space<smem>>
      %232 = vector.broadcast %231 : f32 to vector<1x256xf32>
      %233 = arith.mulf %232, %63 : vector<1x256xf32>
      %234 = vector.extract_strided_slice %223 {offsets = [0, 1], sizes = [2, 256], strides = [1, 1]} : vector<2x262xf32> to vector<2x256xf32>
      %235 = vector.broadcast %233 : vector<1x256xf32> to vector<2x256xf32>
      %236 = arith.mulf %234, %235 : vector<2x256xf32>
      %237 = arith.addf %230, %236 : vector<2x256xf32>
      %c16_62 = arith.constant 16 : index
      %238 = memref.load %arg2[%c16_62] : memref<98xf32, #tpu.memory_space<smem>>
      %239 = vector.broadcast %238 : f32 to vector<1x256xf32>
      %240 = arith.mulf %239, %74 : vector<1x256xf32>
      %241 = vector.extract_strided_slice %223 {offsets = [0, 2], sizes = [2, 256], strides = [1, 1]} : vector<2x262xf32> to vector<2x256xf32>
      %242 = vector.broadcast %240 : vector<1x256xf32> to vector<2x256xf32>
      %243 = arith.mulf %241, %242 : vector<2x256xf32>
      %244 = arith.addf %237, %243 : vector<2x256xf32>
      %c17 = arith.constant 17 : index
      %245 = memref.load %arg2[%c17] : memref<98xf32, #tpu.memory_space<smem>>
      %246 = vector.broadcast %245 : f32 to vector<1x256xf32>
      %247 = arith.mulf %246, %85 : vector<1x256xf32>
      %248 = vector.extract_strided_slice %223 {offsets = [0, 3], sizes = [2, 256], strides = [1, 1]} : vector<2x262xf32> to vector<2x256xf32>
      %249 = vector.broadcast %247 : vector<1x256xf32> to vector<2x256xf32>
      %250 = arith.mulf %248, %249 : vector<2x256xf32>
      %251 = arith.addf %244, %250 : vector<2x256xf32>
      %c18 = arith.constant 18 : index
      %252 = memref.load %arg2[%c18] : memref<98xf32, #tpu.memory_space<smem>>
      %253 = vector.broadcast %252 : f32 to vector<1x256xf32>
      %254 = arith.mulf %253, %96 : vector<1x256xf32>
      %255 = vector.extract_strided_slice %223 {offsets = [0, 4], sizes = [2, 256], strides = [1, 1]} : vector<2x262xf32> to vector<2x256xf32>
      %256 = vector.broadcast %254 : vector<1x256xf32> to vector<2x256xf32>
      %257 = arith.mulf %255, %256 : vector<2x256xf32>
      %258 = arith.addf %251, %257 : vector<2x256xf32>
      %c19 = arith.constant 19 : index
      %259 = memref.load %arg2[%c19] : memref<98xf32, #tpu.memory_space<smem>>
      %260 = vector.broadcast %259 : f32 to vector<1x256xf32>
      %261 = arith.mulf %260, %107 : vector<1x256xf32>
      %262 = vector.extract_strided_slice %223 {offsets = [0, 5], sizes = [2, 256], strides = [1, 1]} : vector<2x262xf32> to vector<2x256xf32>
      %263 = vector.broadcast %261 : vector<1x256xf32> to vector<2x256xf32>
      %264 = arith.mulf %262, %263 : vector<2x256xf32>
      %265 = arith.addf %258, %264 : vector<2x256xf32>
      %c20 = arith.constant 20 : index
      %266 = memref.load %arg2[%c20] : memref<98xf32, #tpu.memory_space<smem>>
      %267 = vector.broadcast %266 : f32 to vector<1x256xf32>
      %268 = arith.mulf %267, %118 : vector<1x256xf32>
      %269 = vector.extract_strided_slice %223 {offsets = [0, 6], sizes = [2, 256], strides = [1, 1]} : vector<2x262xf32> to vector<2x256xf32>
      %270 = vector.broadcast %268 : vector<1x256xf32> to vector<2x256xf32>
      %271 = arith.mulf %269, %270 : vector<2x256xf32>
      %272 = arith.addf %265, %271 : vector<2x256xf32>
      %c0_63 = arith.constant 0 : index
      %c0_64 = arith.constant 0 : index
      %c48 = arith.constant 48 : index
      %273 = vector.load %arg7[%c0_63, %c0_64, %c48] : memref<2x2x358xf32, #tpu.memory_space<vmem>>, vector<1x2x262xf32>
      %274 = vector.shape_cast %273 : vector<1x2x262xf32> to vector<2x262xf32>
      %c21 = arith.constant 21 : index
      %275 = memref.load %arg2[%c21] : memref<98xf32, #tpu.memory_space<smem>>
      %276 = vector.broadcast %275 : f32 to vector<1x256xf32>
      %277 = arith.mulf %276, %52 : vector<1x256xf32>
      %278 = vector.extract_strided_slice %274 {offsets = [0, 0], sizes = [2, 256], strides = [1, 1]} : vector<2x262xf32> to vector<2x256xf32>
      %279 = vector.broadcast %277 : vector<1x256xf32> to vector<2x256xf32>
      %280 = arith.mulf %278, %279 : vector<2x256xf32>
      %281 = arith.addf %272, %280 : vector<2x256xf32>
      %c22 = arith.constant 22 : index
      %282 = memref.load %arg2[%c22] : memref<98xf32, #tpu.memory_space<smem>>
      %283 = vector.broadcast %282 : f32 to vector<1x256xf32>
      %284 = arith.mulf %283, %63 : vector<1x256xf32>
      %285 = vector.extract_strided_slice %274 {offsets = [0, 1], sizes = [2, 256], strides = [1, 1]} : vector<2x262xf32> to vector<2x256xf32>
      %286 = vector.broadcast %284 : vector<1x256xf32> to vector<2x256xf32>
      %287 = arith.mulf %285, %286 : vector<2x256xf32>
      %288 = arith.addf %281, %287 : vector<2x256xf32>
      %c23 = arith.constant 23 : index
      %289 = memref.load %arg2[%c23] : memref<98xf32, #tpu.memory_space<smem>>
      %290 = vector.broadcast %289 : f32 to vector<1x256xf32>
      %291 = arith.mulf %290, %74 : vector<1x256xf32>
      %292 = vector.extract_strided_slice %274 {offsets = [0, 2], sizes = [2, 256], strides = [1, 1]} : vector<2x262xf32> to vector<2x256xf32>
      %293 = vector.broadcast %291 : vector<1x256xf32> to vector<2x256xf32>
      %294 = arith.mulf %292, %293 : vector<2x256xf32>
      %295 = arith.addf %288, %294 : vector<2x256xf32>
      %c24 = arith.constant 24 : index
      %296 = memref.load %arg2[%c24] : memref<98xf32, #tpu.memory_space<smem>>
      %297 = vector.broadcast %296 : f32 to vector<1x256xf32>
      %298 = arith.mulf %297, %85 : vector<1x256xf32>
      %299 = vector.extract_strided_slice %274 {offsets = [0, 3], sizes = [2, 256], strides = [1, 1]} : vector<2x262xf32> to vector<2x256xf32>
      %300 = vector.broadcast %298 : vector<1x256xf32> to vector<2x256xf32>
      %301 = arith.mulf %299, %300 : vector<2x256xf32>
      %302 = arith.addf %295, %301 : vector<2x256xf32>
      %c25 = arith.constant 25 : index
      %303 = memref.load %arg2[%c25] : memref<98xf32, #tpu.memory_space<smem>>
      %304 = vector.broadcast %303 : f32 to vector<1x256xf32>
      %305 = arith.mulf %304, %96 : vector<1x256xf32>
      %306 = vector.extract_strided_slice %274 {offsets = [0, 4], sizes = [2, 256], strides = [1, 1]} : vector<2x262xf32> to vector<2x256xf32>
      %307 = vector.broadcast %305 : vector<1x256xf32> to vector<2x256xf32>
      %308 = arith.mulf %306, %307 : vector<2x256xf32>
      %309 = arith.addf %302, %308 : vector<2x256xf32>
      %c26 = arith.constant 26 : index
      %310 = memref.load %arg2[%c26] : memref<98xf32, #tpu.memory_space<smem>>
      %311 = vector.broadcast %310 : f32 to vector<1x256xf32>
      %312 = arith.mulf %311, %107 : vector<1x256xf32>
      %313 = vector.extract_strided_slice %274 {offsets = [0, 5], sizes = [2, 256], strides = [1, 1]} : vector<2x262xf32> to vector<2x256xf32>
      %314 = vector.broadcast %312 : vector<1x256xf32> to vector<2x256xf32>
      %315 = arith.mulf %313, %314 : vector<2x256xf32>
      %316 = arith.addf %309, %315 : vector<2x256xf32>
      %c27 = arith.constant 27 : index
      %317 = memref.load %arg2[%c27] : memref<98xf32, #tpu.memory_space<smem>>
      %318 = vector.broadcast %317 : f32 to vector<1x256xf32>
      %319 = arith.mulf %318, %118 : vector<1x256xf32>
      %320 = vector.extract_strided_slice %274 {offsets = [0, 6], sizes = [2, 256], strides = [1, 1]} : vector<2x262xf32> to vector<2x256xf32>
      %321 = vector.broadcast %319 : vector<1x256xf32> to vector<2x256xf32>
      %322 = arith.mulf %320, %321 : vector<2x256xf32>
      %323 = arith.addf %316, %322 : vector<2x256xf32>
      %c0_65 = arith.constant 0 : index
      %c0_66 = arith.constant 0 : index
      %c64 = arith.constant 64 : index
      %324 = vector.load %arg7[%c0_65, %c0_66, %c64] : memref<2x2x358xf32, #tpu.memory_space<vmem>>, vector<1x2x262xf32>
      %325 = vector.shape_cast %324 : vector<1x2x262xf32> to vector<2x262xf32>
      %c28 = arith.constant 28 : index
      %326 = memref.load %arg2[%c28] : memref<98xf32, #tpu.memory_space<smem>>
      %327 = vector.broadcast %326 : f32 to vector<1x256xf32>
      %328 = arith.mulf %327, %52 : vector<1x256xf32>
      %329 = vector.extract_strided_slice %325 {offsets = [0, 0], sizes = [2, 256], strides = [1, 1]} : vector<2x262xf32> to vector<2x256xf32>
      %330 = vector.broadcast %328 : vector<1x256xf32> to vector<2x256xf32>
      %331 = arith.mulf %329, %330 : vector<2x256xf32>
      %332 = arith.addf %323, %331 : vector<2x256xf32>
      %c29 = arith.constant 29 : index
      %333 = memref.load %arg2[%c29] : memref<98xf32, #tpu.memory_space<smem>>
      %334 = vector.broadcast %333 : f32 to vector<1x256xf32>
      %335 = arith.mulf %334, %63 : vector<1x256xf32>
      %336 = vector.extract_strided_slice %325 {offsets = [0, 1], sizes = [2, 256], strides = [1, 1]} : vector<2x262xf32> to vector<2x256xf32>
      %337 = vector.broadcast %335 : vector<1x256xf32> to vector<2x256xf32>
      %338 = arith.mulf %336, %337 : vector<2x256xf32>
      %339 = arith.addf %332, %338 : vector<2x256xf32>
      %c30 = arith.constant 30 : index
      %340 = memref.load %arg2[%c30] : memref<98xf32, #tpu.memory_space<smem>>
      %341 = vector.broadcast %340 : f32 to vector<1x256xf32>
      %342 = arith.mulf %341, %74 : vector<1x256xf32>
      %343 = vector.extract_strided_slice %325 {offsets = [0, 2], sizes = [2, 256], strides = [1, 1]} : vector<2x262xf32> to vector<2x256xf32>
      %344 = vector.broadcast %342 : vector<1x256xf32> to vector<2x256xf32>
      %345 = arith.mulf %343, %344 : vector<2x256xf32>
      %346 = arith.addf %339, %345 : vector<2x256xf32>
      %c31 = arith.constant 31 : index
      %347 = memref.load %arg2[%c31] : memref<98xf32, #tpu.memory_space<smem>>
      %348 = vector.broadcast %347 : f32 to vector<1x256xf32>
      %349 = arith.mulf %348, %85 : vector<1x256xf32>
      %350 = vector.extract_strided_slice %325 {offsets = [0, 3], sizes = [2, 256], strides = [1, 1]} : vector<2x262xf32> to vector<2x256xf32>
      %351 = vector.broadcast %349 : vector<1x256xf32> to vector<2x256xf32>
      %352 = arith.mulf %350, %351 : vector<2x256xf32>
      %353 = arith.addf %346, %352 : vector<2x256xf32>
      %c32_67 = arith.constant 32 : index
      %354 = memref.load %arg2[%c32_67] : memref<98xf32, #tpu.memory_space<smem>>
      %355 = vector.broadcast %354 : f32 to vector<1x256xf32>
      %356 = arith.mulf %355, %96 : vector<1x256xf32>
      %357 = vector.extract_strided_slice %325 {offsets = [0, 4], sizes = [2, 256], strides = [1, 1]} : vector<2x262xf32> to vector<2x256xf32>
      %358 = vector.broadcast %356 : vector<1x256xf32> to vector<2x256xf32>
      %359 = arith.mulf %357, %358 : vector<2x256xf32>
      %360 = arith.addf %353, %359 : vector<2x256xf32>
      %c33 = arith.constant 33 : index
      %361 = memref.load %arg2[%c33] : memref<98xf32, #tpu.memory_space<smem>>
      %362 = vector.broadcast %361 : f32 to vector<1x256xf32>
      %363 = arith.mulf %362, %107 : vector<1x256xf32>
      %364 = vector.extract_strided_slice %325 {offsets = [0, 5], sizes = [2, 256], strides = [1, 1]} : vector<2x262xf32> to vector<2x256xf32>
      %365 = vector.broadcast %363 : vector<1x256xf32> to vector<2x256xf32>
      %366 = arith.mulf %364, %365 : vector<2x256xf32>
      %367 = arith.addf %360, %366 : vector<2x256xf32>
      %c34 = arith.constant 34 : index
      %368 = memref.load %arg2[%c34] : memref<98xf32, #tpu.memory_space<smem>>
      %369 = vector.broadcast %368 : f32 to vector<1x256xf32>
      %370 = arith.mulf %369, %118 : vector<1x256xf32>
      %371 = vector.extract_strided_slice %325 {offsets = [0, 6], sizes = [2, 256], strides = [1, 1]} : vector<2x262xf32> to vector<2x256xf32>
      %372 = vector.broadcast %370 : vector<1x256xf32> to vector<2x256xf32>
      %373 = arith.mulf %371, %372 : vector<2x256xf32>
      %374 = arith.addf %367, %373 : vector<2x256xf32>
      %c0_68 = arith.constant 0 : index
      %c0_69 = arith.constant 0 : index
      %c80 = arith.constant 80 : index
      %375 = vector.load %arg7[%c0_68, %c0_69, %c80] : memref<2x2x358xf32, #tpu.memory_space<vmem>>, vector<1x2x262xf32>
      %376 = vector.shape_cast %375 : vector<1x2x262xf32> to vector<2x262xf32>
      %c35 = arith.constant 35 : index
      %377 = memref.load %arg2[%c35] : memref<98xf32, #tpu.memory_space<smem>>
      %378 = vector.broadcast %377 : f32 to vector<1x256xf32>
      %379 = arith.mulf %378, %52 : vector<1x256xf32>
      %380 = vector.extract_strided_slice %376 {offsets = [0, 0], sizes = [2, 256], strides = [1, 1]} : vector<2x262xf32> to vector<2x256xf32>
      %381 = vector.broadcast %379 : vector<1x256xf32> to vector<2x256xf32>
      %382 = arith.mulf %380, %381 : vector<2x256xf32>
      %383 = arith.addf %374, %382 : vector<2x256xf32>
      %c36 = arith.constant 36 : index
      %384 = memref.load %arg2[%c36] : memref<98xf32, #tpu.memory_space<smem>>
      %385 = vector.broadcast %384 : f32 to vector<1x256xf32>
      %386 = arith.mulf %385, %63 : vector<1x256xf32>
      %387 = vector.extract_strided_slice %376 {offsets = [0, 1], sizes = [2, 256], strides = [1, 1]} : vector<2x262xf32> to vector<2x256xf32>
      %388 = vector.broadcast %386 : vector<1x256xf32> to vector<2x256xf32>
      %389 = arith.mulf %387, %388 : vector<2x256xf32>
      %390 = arith.addf %383, %389 : vector<2x256xf32>
      %c37 = arith.constant 37 : index
      %391 = memref.load %arg2[%c37] : memref<98xf32, #tpu.memory_space<smem>>
      %392 = vector.broadcast %391 : f32 to vector<1x256xf32>
      %393 = arith.mulf %392, %74 : vector<1x256xf32>
      %394 = vector.extract_strided_slice %376 {offsets = [0, 2], sizes = [2, 256], strides = [1, 1]} : vector<2x262xf32> to vector<2x256xf32>
      %395 = vector.broadcast %393 : vector<1x256xf32> to vector<2x256xf32>
      %396 = arith.mulf %394, %395 : vector<2x256xf32>
      %397 = arith.addf %390, %396 : vector<2x256xf32>
      %c38 = arith.constant 38 : index
      %398 = memref.load %arg2[%c38] : memref<98xf32, #tpu.memory_space<smem>>
      %399 = vector.broadcast %398 : f32 to vector<1x256xf32>
      %400 = arith.mulf %399, %85 : vector<1x256xf32>
      %401 = vector.extract_strided_slice %376 {offsets = [0, 3], sizes = [2, 256], strides = [1, 1]} : vector<2x262xf32> to vector<2x256xf32>
      %402 = vector.broadcast %400 : vector<1x256xf32> to vector<2x256xf32>
      %403 = arith.mulf %401, %402 : vector<2x256xf32>
      %404 = arith.addf %397, %403 : vector<2x256xf32>
      %c39 = arith.constant 39 : index
      %405 = memref.load %arg2[%c39] : memref<98xf32, #tpu.memory_space<smem>>
      %406 = vector.broadcast %405 : f32 to vector<1x256xf32>
      %407 = arith.mulf %406, %96 : vector<1x256xf32>
      %408 = vector.extract_strided_slice %376 {offsets = [0, 4], sizes = [2, 256], strides = [1, 1]} : vector<2x262xf32> to vector<2x256xf32>
      %409 = vector.broadcast %407 : vector<1x256xf32> to vector<2x256xf32>
      %410 = arith.mulf %408, %409 : vector<2x256xf32>
      %411 = arith.addf %404, %410 : vector<2x256xf32>
      %c40 = arith.constant 40 : index
      %412 = memref.load %arg2[%c40] : memref<98xf32, #tpu.memory_space<smem>>
      %413 = vector.broadcast %412 : f32 to vector<1x256xf32>
      %414 = arith.mulf %413, %107 : vector<1x256xf32>
      %415 = vector.extract_strided_slice %376 {offsets = [0, 5], sizes = [2, 256], strides = [1, 1]} : vector<2x262xf32> to vector<2x256xf32>
      %416 = vector.broadcast %414 : vector<1x256xf32> to vector<2x256xf32>
      %417 = arith.mulf %415, %416 : vector<2x256xf32>
      %418 = arith.addf %411, %417 : vector<2x256xf32>
      %c41 = arith.constant 41 : index
      %419 = memref.load %arg2[%c41] : memref<98xf32, #tpu.memory_space<smem>>
      %420 = vector.broadcast %419 : f32 to vector<1x256xf32>
      %421 = arith.mulf %420, %118 : vector<1x256xf32>
      %422 = vector.extract_strided_slice %376 {offsets = [0, 6], sizes = [2, 256], strides = [1, 1]} : vector<2x262xf32> to vector<2x256xf32>
      %423 = vector.broadcast %421 : vector<1x256xf32> to vector<2x256xf32>
      %424 = arith.mulf %422, %423 : vector<2x256xf32>
      %425 = arith.addf %418, %424 : vector<2x256xf32>
      %c0_70 = arith.constant 0 : index
      %c0_71 = arith.constant 0 : index
      %c96 = arith.constant 96 : index
      %426 = vector.load %arg7[%c0_70, %c0_71, %c96] : memref<2x2x358xf32, #tpu.memory_space<vmem>>, vector<1x2x262xf32>
      %427 = vector.shape_cast %426 : vector<1x2x262xf32> to vector<2x262xf32>
      %c42 = arith.constant 42 : index
      %428 = memref.load %arg2[%c42] : memref<98xf32, #tpu.memory_space<smem>>
      %429 = vector.broadcast %428 : f32 to vector<1x256xf32>
      %430 = arith.mulf %429, %52 : vector<1x256xf32>
      %431 = vector.extract_strided_slice %427 {offsets = [0, 0], sizes = [2, 256], strides = [1, 1]} : vector<2x262xf32> to vector<2x256xf32>
      %432 = vector.broadcast %430 : vector<1x256xf32> to vector<2x256xf32>
      %433 = arith.mulf %431, %432 : vector<2x256xf32>
      %434 = arith.addf %425, %433 : vector<2x256xf32>
      %c43 = arith.constant 43 : index
      %435 = memref.load %arg2[%c43] : memref<98xf32, #tpu.memory_space<smem>>
      %436 = vector.broadcast %435 : f32 to vector<1x256xf32>
      %437 = arith.mulf %436, %63 : vector<1x256xf32>
      %438 = vector.extract_strided_slice %427 {offsets = [0, 1], sizes = [2, 256], strides = [1, 1]} : vector<2x262xf32> to vector<2x256xf32>
      %439 = vector.broadcast %437 : vector<1x256xf32> to vector<2x256xf32>
      %440 = arith.mulf %438, %439 : vector<2x256xf32>
      %441 = arith.addf %434, %440 : vector<2x256xf32>
      %c44 = arith.constant 44 : index
      %442 = memref.load %arg2[%c44] : memref<98xf32, #tpu.memory_space<smem>>
      %443 = vector.broadcast %442 : f32 to vector<1x256xf32>
      %444 = arith.mulf %443, %74 : vector<1x256xf32>
      %445 = vector.extract_strided_slice %427 {offsets = [0, 2], sizes = [2, 256], strides = [1, 1]} : vector<2x262xf32> to vector<2x256xf32>
      %446 = vector.broadcast %444 : vector<1x256xf32> to vector<2x256xf32>
      %447 = arith.mulf %445, %446 : vector<2x256xf32>
      %448 = arith.addf %441, %447 : vector<2x256xf32>
      %c45 = arith.constant 45 : index
      %449 = memref.load %arg2[%c45] : memref<98xf32, #tpu.memory_space<smem>>
      %450 = vector.broadcast %449 : f32 to vector<1x256xf32>
      %451 = arith.mulf %450, %85 : vector<1x256xf32>
      %452 = vector.extract_strided_slice %427 {offsets = [0, 3], sizes = [2, 256], strides = [1, 1]} : vector<2x262xf32> to vector<2x256xf32>
      %453 = vector.broadcast %451 : vector<1x256xf32> to vector<2x256xf32>
      %454 = arith.mulf %452, %453 : vector<2x256xf32>
      %455 = arith.addf %448, %454 : vector<2x256xf32>
      %c46 = arith.constant 46 : index
      %456 = memref.load %arg2[%c46] : memref<98xf32, #tpu.memory_space<smem>>
      %457 = vector.broadcast %456 : f32 to vector<1x256xf32>
      %458 = arith.mulf %457, %96 : vector<1x256xf32>
      %459 = vector.extract_strided_slice %427 {offsets = [0, 4], sizes = [2, 256], strides = [1, 1]} : vector<2x262xf32> to vector<2x256xf32>
      %460 = vector.broadcast %458 : vector<1x256xf32> to vector<2x256xf32>
      %461 = arith.mulf %459, %460 : vector<2x256xf32>
      %462 = arith.addf %455, %461 : vector<2x256xf32>
      %c47 = arith.constant 47 : index
      %463 = memref.load %arg2[%c47] : memref<98xf32, #tpu.memory_space<smem>>
      %464 = vector.broadcast %463 : f32 to vector<1x256xf32>
      %465 = arith.mulf %464, %107 : vector<1x256xf32>
      %466 = vector.extract_strided_slice %427 {offsets = [0, 5], sizes = [2, 256], strides = [1, 1]} : vector<2x262xf32> to vector<2x256xf32>
      %467 = vector.broadcast %465 : vector<1x256xf32> to vector<2x256xf32>
      %468 = arith.mulf %466, %467 : vector<2x256xf32>
      %469 = arith.addf %462, %468 : vector<2x256xf32>
      %c48_72 = arith.constant 48 : index
      %470 = memref.load %arg2[%c48_72] : memref<98xf32, #tpu.memory_space<smem>>
      %471 = vector.broadcast %470 : f32 to vector<1x256xf32>
      %472 = arith.mulf %471, %118 : vector<1x256xf32>
      %473 = vector.extract_strided_slice %427 {offsets = [0, 6], sizes = [2, 256], strides = [1, 1]} : vector<2x262xf32> to vector<2x256xf32>
      %474 = vector.broadcast %472 : vector<1x256xf32> to vector<2x256xf32>
      %475 = arith.mulf %473, %474 : vector<2x256xf32>
      %476 = arith.addf %469, %475 : vector<2x256xf32>
      %c1_73 = arith.constant 1 : index
      %c0_74 = arith.constant 0 : index
      %c0_75 = arith.constant 0 : index
      %477 = vector.load %arg7[%c1_73, %c0_74, %c0_75] : memref<2x2x358xf32, #tpu.memory_space<vmem>>, vector<1x2x262xf32>
      %478 = vector.shape_cast %477 : vector<1x2x262xf32> to vector<2x262xf32>
      %c49 = arith.constant 49 : index
      %479 = memref.load %arg2[%c49] : memref<98xf32, #tpu.memory_space<smem>>
      %480 = vector.broadcast %479 : f32 to vector<1x256xf32>
      %481 = arith.mulf %480, %52 : vector<1x256xf32>
      %482 = vector.extract_strided_slice %478 {offsets = [0, 0], sizes = [2, 256], strides = [1, 1]} : vector<2x262xf32> to vector<2x256xf32>
      %483 = vector.broadcast %481 : vector<1x256xf32> to vector<2x256xf32>
      %484 = arith.mulf %482, %483 : vector<2x256xf32>
      %485 = arith.addf %476, %484 : vector<2x256xf32>
      %c50 = arith.constant 50 : index
      %486 = memref.load %arg2[%c50] : memref<98xf32, #tpu.memory_space<smem>>
      %487 = vector.broadcast %486 : f32 to vector<1x256xf32>
      %488 = arith.mulf %487, %63 : vector<1x256xf32>
      %489 = vector.extract_strided_slice %478 {offsets = [0, 1], sizes = [2, 256], strides = [1, 1]} : vector<2x262xf32> to vector<2x256xf32>
      %490 = vector.broadcast %488 : vector<1x256xf32> to vector<2x256xf32>
      %491 = arith.mulf %489, %490 : vector<2x256xf32>
      %492 = arith.addf %485, %491 : vector<2x256xf32>
      %c51_76 = arith.constant 51 : index
      %493 = memref.load %arg2[%c51_76] : memref<98xf32, #tpu.memory_space<smem>>
      %494 = vector.broadcast %493 : f32 to vector<1x256xf32>
      %495 = arith.mulf %494, %74 : vector<1x256xf32>
      %496 = vector.extract_strided_slice %478 {offsets = [0, 2], sizes = [2, 256], strides = [1, 1]} : vector<2x262xf32> to vector<2x256xf32>
      %497 = vector.broadcast %495 : vector<1x256xf32> to vector<2x256xf32>
      %498 = arith.mulf %496, %497 : vector<2x256xf32>
      %499 = arith.addf %492, %498 : vector<2x256xf32>
      %c52 = arith.constant 52 : index
      %500 = memref.load %arg2[%c52] : memref<98xf32, #tpu.memory_space<smem>>
      %501 = vector.broadcast %500 : f32 to vector<1x256xf32>
      %502 = arith.mulf %501, %85 : vector<1x256xf32>
      %503 = vector.extract_strided_slice %478 {offsets = [0, 3], sizes = [2, 256], strides = [1, 1]} : vector<2x262xf32> to vector<2x256xf32>
      %504 = vector.broadcast %502 : vector<1x256xf32> to vector<2x256xf32>
      %505 = arith.mulf %503, %504 : vector<2x256xf32>
      %506 = arith.addf %499, %505 : vector<2x256xf32>
      %c53 = arith.constant 53 : index
      %507 = memref.load %arg2[%c53] : memref<98xf32, #tpu.memory_space<smem>>
      %508 = vector.broadcast %507 : f32 to vector<1x256xf32>
      %509 = arith.mulf %508, %96 : vector<1x256xf32>
      %510 = vector.extract_strided_slice %478 {offsets = [0, 4], sizes = [2, 256], strides = [1, 1]} : vector<2x262xf32> to vector<2x256xf32>
      %511 = vector.broadcast %509 : vector<1x256xf32> to vector<2x256xf32>
      %512 = arith.mulf %510, %511 : vector<2x256xf32>
      %513 = arith.addf %506, %512 : vector<2x256xf32>
      %c54 = arith.constant 54 : index
      %514 = memref.load %arg2[%c54] : memref<98xf32, #tpu.memory_space<smem>>
      %515 = vector.broadcast %514 : f32 to vector<1x256xf32>
      %516 = arith.mulf %515, %107 : vector<1x256xf32>
      %517 = vector.extract_strided_slice %478 {offsets = [0, 5], sizes = [2, 256], strides = [1, 1]} : vector<2x262xf32> to vector<2x256xf32>
      %518 = vector.broadcast %516 : vector<1x256xf32> to vector<2x256xf32>
      %519 = arith.mulf %517, %518 : vector<2x256xf32>
      %520 = arith.addf %513, %519 : vector<2x256xf32>
      %c55 = arith.constant 55 : index
      %521 = memref.load %arg2[%c55] : memref<98xf32, #tpu.memory_space<smem>>
      %522 = vector.broadcast %521 : f32 to vector<1x256xf32>
      %523 = arith.mulf %522, %118 : vector<1x256xf32>
      %524 = vector.extract_strided_slice %478 {offsets = [0, 6], sizes = [2, 256], strides = [1, 1]} : vector<2x262xf32> to vector<2x256xf32>
      %525 = vector.broadcast %523 : vector<1x256xf32> to vector<2x256xf32>
      %526 = arith.mulf %524, %525 : vector<2x256xf32>
      %527 = arith.addf %520, %526 : vector<2x256xf32>
      %c1_77 = arith.constant 1 : index
      %c0_78 = arith.constant 0 : index
      %c16_79 = arith.constant 16 : index
      %528 = vector.load %arg7[%c1_77, %c0_78, %c16_79] : memref<2x2x358xf32, #tpu.memory_space<vmem>>, vector<1x2x262xf32>
      %529 = vector.shape_cast %528 : vector<1x2x262xf32> to vector<2x262xf32>
      %c56 = arith.constant 56 : index
      %530 = memref.load %arg2[%c56] : memref<98xf32, #tpu.memory_space<smem>>
      %531 = vector.broadcast %530 : f32 to vector<1x256xf32>
      %532 = arith.mulf %531, %52 : vector<1x256xf32>
      %533 = vector.extract_strided_slice %529 {offsets = [0, 0], sizes = [2, 256], strides = [1, 1]} : vector<2x262xf32> to vector<2x256xf32>
      %534 = vector.broadcast %532 : vector<1x256xf32> to vector<2x256xf32>
      %535 = arith.mulf %533, %534 : vector<2x256xf32>
      %536 = arith.addf %527, %535 : vector<2x256xf32>
      %c57 = arith.constant 57 : index
      %537 = memref.load %arg2[%c57] : memref<98xf32, #tpu.memory_space<smem>>
      %538 = vector.broadcast %537 : f32 to vector<1x256xf32>
      %539 = arith.mulf %538, %63 : vector<1x256xf32>
      %540 = vector.extract_strided_slice %529 {offsets = [0, 1], sizes = [2, 256], strides = [1, 1]} : vector<2x262xf32> to vector<2x256xf32>
      %541 = vector.broadcast %539 : vector<1x256xf32> to vector<2x256xf32>
      %542 = arith.mulf %540, %541 : vector<2x256xf32>
      %543 = arith.addf %536, %542 : vector<2x256xf32>
      %c58 = arith.constant 58 : index
      %544 = memref.load %arg2[%c58] : memref<98xf32, #tpu.memory_space<smem>>
      %545 = vector.broadcast %544 : f32 to vector<1x256xf32>
      %546 = arith.mulf %545, %74 : vector<1x256xf32>
      %547 = vector.extract_strided_slice %529 {offsets = [0, 2], sizes = [2, 256], strides = [1, 1]} : vector<2x262xf32> to vector<2x256xf32>
      %548 = vector.broadcast %546 : vector<1x256xf32> to vector<2x256xf32>
      %549 = arith.mulf %547, %548 : vector<2x256xf32>
      %550 = arith.addf %543, %549 : vector<2x256xf32>
      %c59 = arith.constant 59 : index
      %551 = memref.load %arg2[%c59] : memref<98xf32, #tpu.memory_space<smem>>
      %552 = vector.broadcast %551 : f32 to vector<1x256xf32>
      %553 = arith.mulf %552, %85 : vector<1x256xf32>
      %554 = vector.extract_strided_slice %529 {offsets = [0, 3], sizes = [2, 256], strides = [1, 1]} : vector<2x262xf32> to vector<2x256xf32>
      %555 = vector.broadcast %553 : vector<1x256xf32> to vector<2x256xf32>
      %556 = arith.mulf %554, %555 : vector<2x256xf32>
      %557 = arith.addf %550, %556 : vector<2x256xf32>
      %c60 = arith.constant 60 : index
      %558 = memref.load %arg2[%c60] : memref<98xf32, #tpu.memory_space<smem>>
      %559 = vector.broadcast %558 : f32 to vector<1x256xf32>
      %560 = arith.mulf %559, %96 : vector<1x256xf32>
      %561 = vector.extract_strided_slice %529 {offsets = [0, 4], sizes = [2, 256], strides = [1, 1]} : vector<2x262xf32> to vector<2x256xf32>
      %562 = vector.broadcast %560 : vector<1x256xf32> to vector<2x256xf32>
      %563 = arith.mulf %561, %562 : vector<2x256xf32>
      %564 = arith.addf %557, %563 : vector<2x256xf32>
      %c61 = arith.constant 61 : index
      %565 = memref.load %arg2[%c61] : memref<98xf32, #tpu.memory_space<smem>>
      %566 = vector.broadcast %565 : f32 to vector<1x256xf32>
      %567 = arith.mulf %566, %107 : vector<1x256xf32>
      %568 = vector.extract_strided_slice %529 {offsets = [0, 5], sizes = [2, 256], strides = [1, 1]} : vector<2x262xf32> to vector<2x256xf32>
      %569 = vector.broadcast %567 : vector<1x256xf32> to vector<2x256xf32>
      %570 = arith.mulf %568, %569 : vector<2x256xf32>
      %571 = arith.addf %564, %570 : vector<2x256xf32>
      %c62 = arith.constant 62 : index
      %572 = memref.load %arg2[%c62] : memref<98xf32, #tpu.memory_space<smem>>
      %573 = vector.broadcast %572 : f32 to vector<1x256xf32>
      %574 = arith.mulf %573, %118 : vector<1x256xf32>
      %575 = vector.extract_strided_slice %529 {offsets = [0, 6], sizes = [2, 256], strides = [1, 1]} : vector<2x262xf32> to vector<2x256xf32>
      %576 = vector.broadcast %574 : vector<1x256xf32> to vector<2x256xf32>
      %577 = arith.mulf %575, %576 : vector<2x256xf32>
      %578 = arith.addf %571, %577 : vector<2x256xf32>
      %c1_80 = arith.constant 1 : index
      %c0_81 = arith.constant 0 : index
      %c32_82 = arith.constant 32 : index
      %579 = vector.load %arg7[%c1_80, %c0_81, %c32_82] : memref<2x2x358xf32, #tpu.memory_space<vmem>>, vector<1x2x262xf32>
      %580 = vector.shape_cast %579 : vector<1x2x262xf32> to vector<2x262xf32>
      %c63 = arith.constant 63 : index
      %581 = memref.load %arg2[%c63] : memref<98xf32, #tpu.memory_space<smem>>
      %582 = vector.broadcast %581 : f32 to vector<1x256xf32>
      %583 = arith.mulf %582, %52 : vector<1x256xf32>
      %584 = vector.extract_strided_slice %580 {offsets = [0, 0], sizes = [2, 256], strides = [1, 1]} : vector<2x262xf32> to vector<2x256xf32>
      %585 = vector.broadcast %583 : vector<1x256xf32> to vector<2x256xf32>
      %586 = arith.mulf %584, %585 : vector<2x256xf32>
      %587 = arith.addf %578, %586 : vector<2x256xf32>
      %c64_83 = arith.constant 64 : index
      %588 = memref.load %arg2[%c64_83] : memref<98xf32, #tpu.memory_space<smem>>
      %589 = vector.broadcast %588 : f32 to vector<1x256xf32>
      %590 = arith.mulf %589, %63 : vector<1x256xf32>
      %591 = vector.extract_strided_slice %580 {offsets = [0, 1], sizes = [2, 256], strides = [1, 1]} : vector<2x262xf32> to vector<2x256xf32>
      %592 = vector.broadcast %590 : vector<1x256xf32> to vector<2x256xf32>
      %593 = arith.mulf %591, %592 : vector<2x256xf32>
      %594 = arith.addf %587, %593 : vector<2x256xf32>
      %c65 = arith.constant 65 : index
      %595 = memref.load %arg2[%c65] : memref<98xf32, #tpu.memory_space<smem>>
      %596 = vector.broadcast %595 : f32 to vector<1x256xf32>
      %597 = arith.mulf %596, %74 : vector<1x256xf32>
      %598 = vector.extract_strided_slice %580 {offsets = [0, 2], sizes = [2, 256], strides = [1, 1]} : vector<2x262xf32> to vector<2x256xf32>
      %599 = vector.broadcast %597 : vector<1x256xf32> to vector<2x256xf32>
      %600 = arith.mulf %598, %599 : vector<2x256xf32>
      %601 = arith.addf %594, %600 : vector<2x256xf32>
      %c66 = arith.constant 66 : index
      %602 = memref.load %arg2[%c66] : memref<98xf32, #tpu.memory_space<smem>>
      %603 = vector.broadcast %602 : f32 to vector<1x256xf32>
      %604 = arith.mulf %603, %85 : vector<1x256xf32>
      %605 = vector.extract_strided_slice %580 {offsets = [0, 3], sizes = [2, 256], strides = [1, 1]} : vector<2x262xf32> to vector<2x256xf32>
      %606 = vector.broadcast %604 : vector<1x256xf32> to vector<2x256xf32>
      %607 = arith.mulf %605, %606 : vector<2x256xf32>
      %608 = arith.addf %601, %607 : vector<2x256xf32>
      %c67 = arith.constant 67 : index
      %609 = memref.load %arg2[%c67] : memref<98xf32, #tpu.memory_space<smem>>
      %610 = vector.broadcast %609 : f32 to vector<1x256xf32>
      %611 = arith.mulf %610, %96 : vector<1x256xf32>
      %612 = vector.extract_strided_slice %580 {offsets = [0, 4], sizes = [2, 256], strides = [1, 1]} : vector<2x262xf32> to vector<2x256xf32>
      %613 = vector.broadcast %611 : vector<1x256xf32> to vector<2x256xf32>
      %614 = arith.mulf %612, %613 : vector<2x256xf32>
      %615 = arith.addf %608, %614 : vector<2x256xf32>
      %c68 = arith.constant 68 : index
      %616 = memref.load %arg2[%c68] : memref<98xf32, #tpu.memory_space<smem>>
      %617 = vector.broadcast %616 : f32 to vector<1x256xf32>
      %618 = arith.mulf %617, %107 : vector<1x256xf32>
      %619 = vector.extract_strided_slice %580 {offsets = [0, 5], sizes = [2, 256], strides = [1, 1]} : vector<2x262xf32> to vector<2x256xf32>
      %620 = vector.broadcast %618 : vector<1x256xf32> to vector<2x256xf32>
      %621 = arith.mulf %619, %620 : vector<2x256xf32>
      %622 = arith.addf %615, %621 : vector<2x256xf32>
      %c69 = arith.constant 69 : index
      %623 = memref.load %arg2[%c69] : memref<98xf32, #tpu.memory_space<smem>>
      %624 = vector.broadcast %623 : f32 to vector<1x256xf32>
      %625 = arith.mulf %624, %118 : vector<1x256xf32>
      %626 = vector.extract_strided_slice %580 {offsets = [0, 6], sizes = [2, 256], strides = [1, 1]} : vector<2x262xf32> to vector<2x256xf32>
      %627 = vector.broadcast %625 : vector<1x256xf32> to vector<2x256xf32>
      %628 = arith.mulf %626, %627 : vector<2x256xf32>
      %629 = arith.addf %622, %628 : vector<2x256xf32>
      %c1_84 = arith.constant 1 : index
      %c0_85 = arith.constant 0 : index
      %c48_86 = arith.constant 48 : index
      %630 = vector.load %arg7[%c1_84, %c0_85, %c48_86] : memref<2x2x358xf32, #tpu.memory_space<vmem>>, vector<1x2x262xf32>
      %631 = vector.shape_cast %630 : vector<1x2x262xf32> to vector<2x262xf32>
      %c70 = arith.constant 70 : index
      %632 = memref.load %arg2[%c70] : memref<98xf32, #tpu.memory_space<smem>>
      %633 = vector.broadcast %632 : f32 to vector<1x256xf32>
      %634 = arith.mulf %633, %52 : vector<1x256xf32>
      %635 = vector.extract_strided_slice %631 {offsets = [0, 0], sizes = [2, 256], strides = [1, 1]} : vector<2x262xf32> to vector<2x256xf32>
      %636 = vector.broadcast %634 : vector<1x256xf32> to vector<2x256xf32>
      %637 = arith.mulf %635, %636 : vector<2x256xf32>
      %638 = arith.addf %629, %637 : vector<2x256xf32>
      %c71 = arith.constant 71 : index
      %639 = memref.load %arg2[%c71] : memref<98xf32, #tpu.memory_space<smem>>
      %640 = vector.broadcast %639 : f32 to vector<1x256xf32>
      %641 = arith.mulf %640, %63 : vector<1x256xf32>
      %642 = vector.extract_strided_slice %631 {offsets = [0, 1], sizes = [2, 256], strides = [1, 1]} : vector<2x262xf32> to vector<2x256xf32>
      %643 = vector.broadcast %641 : vector<1x256xf32> to vector<2x256xf32>
      %644 = arith.mulf %642, %643 : vector<2x256xf32>
      %645 = arith.addf %638, %644 : vector<2x256xf32>
      %c72 = arith.constant 72 : index
      %646 = memref.load %arg2[%c72] : memref<98xf32, #tpu.memory_space<smem>>
      %647 = vector.broadcast %646 : f32 to vector<1x256xf32>
      %648 = arith.mulf %647, %74 : vector<1x256xf32>
      %649 = vector.extract_strided_slice %631 {offsets = [0, 2], sizes = [2, 256], strides = [1, 1]} : vector<2x262xf32> to vector<2x256xf32>
      %650 = vector.broadcast %648 : vector<1x256xf32> to vector<2x256xf32>
      %651 = arith.mulf %649, %650 : vector<2x256xf32>
      %652 = arith.addf %645, %651 : vector<2x256xf32>
      %c73 = arith.constant 73 : index
      %653 = memref.load %arg2[%c73] : memref<98xf32, #tpu.memory_space<smem>>
      %654 = vector.broadcast %653 : f32 to vector<1x256xf32>
      %655 = arith.mulf %654, %85 : vector<1x256xf32>
      %656 = vector.extract_strided_slice %631 {offsets = [0, 3], sizes = [2, 256], strides = [1, 1]} : vector<2x262xf32> to vector<2x256xf32>
      %657 = vector.broadcast %655 : vector<1x256xf32> to vector<2x256xf32>
      %658 = arith.mulf %656, %657 : vector<2x256xf32>
      %659 = arith.addf %652, %658 : vector<2x256xf32>
      %c74 = arith.constant 74 : index
      %660 = memref.load %arg2[%c74] : memref<98xf32, #tpu.memory_space<smem>>
      %661 = vector.broadcast %660 : f32 to vector<1x256xf32>
      %662 = arith.mulf %661, %96 : vector<1x256xf32>
      %663 = vector.extract_strided_slice %631 {offsets = [0, 4], sizes = [2, 256], strides = [1, 1]} : vector<2x262xf32> to vector<2x256xf32>
      %664 = vector.broadcast %662 : vector<1x256xf32> to vector<2x256xf32>
      %665 = arith.mulf %663, %664 : vector<2x256xf32>
      %666 = arith.addf %659, %665 : vector<2x256xf32>
      %c75 = arith.constant 75 : index
      %667 = memref.load %arg2[%c75] : memref<98xf32, #tpu.memory_space<smem>>
      %668 = vector.broadcast %667 : f32 to vector<1x256xf32>
      %669 = arith.mulf %668, %107 : vector<1x256xf32>
      %670 = vector.extract_strided_slice %631 {offsets = [0, 5], sizes = [2, 256], strides = [1, 1]} : vector<2x262xf32> to vector<2x256xf32>
      %671 = vector.broadcast %669 : vector<1x256xf32> to vector<2x256xf32>
      %672 = arith.mulf %670, %671 : vector<2x256xf32>
      %673 = arith.addf %666, %672 : vector<2x256xf32>
      %c76 = arith.constant 76 : index
      %674 = memref.load %arg2[%c76] : memref<98xf32, #tpu.memory_space<smem>>
      %675 = vector.broadcast %674 : f32 to vector<1x256xf32>
      %676 = arith.mulf %675, %118 : vector<1x256xf32>
      %677 = vector.extract_strided_slice %631 {offsets = [0, 6], sizes = [2, 256], strides = [1, 1]} : vector<2x262xf32> to vector<2x256xf32>
      %678 = vector.broadcast %676 : vector<1x256xf32> to vector<2x256xf32>
      %679 = arith.mulf %677, %678 : vector<2x256xf32>
      %680 = arith.addf %673, %679 : vector<2x256xf32>
      %c1_87 = arith.constant 1 : index
      %c0_88 = arith.constant 0 : index
      %c64_89 = arith.constant 64 : index
      %681 = vector.load %arg7[%c1_87, %c0_88, %c64_89] : memref<2x2x358xf32, #tpu.memory_space<vmem>>, vector<1x2x262xf32>
      %682 = vector.shape_cast %681 : vector<1x2x262xf32> to vector<2x262xf32>
      %c77 = arith.constant 77 : index
      %683 = memref.load %arg2[%c77] : memref<98xf32, #tpu.memory_space<smem>>
      %684 = vector.broadcast %683 : f32 to vector<1x256xf32>
      %685 = arith.mulf %684, %52 : vector<1x256xf32>
      %686 = vector.extract_strided_slice %682 {offsets = [0, 0], sizes = [2, 256], strides = [1, 1]} : vector<2x262xf32> to vector<2x256xf32>
      %687 = vector.broadcast %685 : vector<1x256xf32> to vector<2x256xf32>
      %688 = arith.mulf %686, %687 : vector<2x256xf32>
      %689 = arith.addf %680, %688 : vector<2x256xf32>
      %c78 = arith.constant 78 : index
      %690 = memref.load %arg2[%c78] : memref<98xf32, #tpu.memory_space<smem>>
      %691 = vector.broadcast %690 : f32 to vector<1x256xf32>
      %692 = arith.mulf %691, %63 : vector<1x256xf32>
      %693 = vector.extract_strided_slice %682 {offsets = [0, 1], sizes = [2, 256], strides = [1, 1]} : vector<2x262xf32> to vector<2x256xf32>
      %694 = vector.broadcast %692 : vector<1x256xf32> to vector<2x256xf32>
      %695 = arith.mulf %693, %694 : vector<2x256xf32>
      %696 = arith.addf %689, %695 : vector<2x256xf32>
      %c79 = arith.constant 79 : index
      %697 = memref.load %arg2[%c79] : memref<98xf32, #tpu.memory_space<smem>>
      %698 = vector.broadcast %697 : f32 to vector<1x256xf32>
      %699 = arith.mulf %698, %74 : vector<1x256xf32>
      %700 = vector.extract_strided_slice %682 {offsets = [0, 2], sizes = [2, 256], strides = [1, 1]} : vector<2x262xf32> to vector<2x256xf32>
      %701 = vector.broadcast %699 : vector<1x256xf32> to vector<2x256xf32>
      %702 = arith.mulf %700, %701 : vector<2x256xf32>
      %703 = arith.addf %696, %702 : vector<2x256xf32>
      %c80_90 = arith.constant 80 : index
      %704 = memref.load %arg2[%c80_90] : memref<98xf32, #tpu.memory_space<smem>>
      %705 = vector.broadcast %704 : f32 to vector<1x256xf32>
      %706 = arith.mulf %705, %85 : vector<1x256xf32>
      %707 = vector.extract_strided_slice %682 {offsets = [0, 3], sizes = [2, 256], strides = [1, 1]} : vector<2x262xf32> to vector<2x256xf32>
      %708 = vector.broadcast %706 : vector<1x256xf32> to vector<2x256xf32>
      %709 = arith.mulf %707, %708 : vector<2x256xf32>
      %710 = arith.addf %703, %709 : vector<2x256xf32>
      %c81 = arith.constant 81 : index
      %711 = memref.load %arg2[%c81] : memref<98xf32, #tpu.memory_space<smem>>
      %712 = vector.broadcast %711 : f32 to vector<1x256xf32>
      %713 = arith.mulf %712, %96 : vector<1x256xf32>
      %714 = vector.extract_strided_slice %682 {offsets = [0, 4], sizes = [2, 256], strides = [1, 1]} : vector<2x262xf32> to vector<2x256xf32>
      %715 = vector.broadcast %713 : vector<1x256xf32> to vector<2x256xf32>
      %716 = arith.mulf %714, %715 : vector<2x256xf32>
      %717 = arith.addf %710, %716 : vector<2x256xf32>
      %c82 = arith.constant 82 : index
      %718 = memref.load %arg2[%c82] : memref<98xf32, #tpu.memory_space<smem>>
      %719 = vector.broadcast %718 : f32 to vector<1x256xf32>
      %720 = arith.mulf %719, %107 : vector<1x256xf32>
      %721 = vector.extract_strided_slice %682 {offsets = [0, 5], sizes = [2, 256], strides = [1, 1]} : vector<2x262xf32> to vector<2x256xf32>
      %722 = vector.broadcast %720 : vector<1x256xf32> to vector<2x256xf32>
      %723 = arith.mulf %721, %722 : vector<2x256xf32>
      %724 = arith.addf %717, %723 : vector<2x256xf32>
      %c83 = arith.constant 83 : index
      %725 = memref.load %arg2[%c83] : memref<98xf32, #tpu.memory_space<smem>>
      %726 = vector.broadcast %725 : f32 to vector<1x256xf32>
      %727 = arith.mulf %726, %118 : vector<1x256xf32>
      %728 = vector.extract_strided_slice %682 {offsets = [0, 6], sizes = [2, 256], strides = [1, 1]} : vector<2x262xf32> to vector<2x256xf32>
      %729 = vector.broadcast %727 : vector<1x256xf32> to vector<2x256xf32>
      %730 = arith.mulf %728, %729 : vector<2x256xf32>
      %731 = arith.addf %724, %730 : vector<2x256xf32>
      %c1_91 = arith.constant 1 : index
      %c0_92 = arith.constant 0 : index
      %c80_93 = arith.constant 80 : index
      %732 = vector.load %arg7[%c1_91, %c0_92, %c80_93] : memref<2x2x358xf32, #tpu.memory_space<vmem>>, vector<1x2x262xf32>
      %733 = vector.shape_cast %732 : vector<1x2x262xf32> to vector<2x262xf32>
      %c84 = arith.constant 84 : index
      %734 = memref.load %arg2[%c84] : memref<98xf32, #tpu.memory_space<smem>>
      %735 = vector.broadcast %734 : f32 to vector<1x256xf32>
      %736 = arith.mulf %735, %52 : vector<1x256xf32>
      %737 = vector.extract_strided_slice %733 {offsets = [0, 0], sizes = [2, 256], strides = [1, 1]} : vector<2x262xf32> to vector<2x256xf32>
      %738 = vector.broadcast %736 : vector<1x256xf32> to vector<2x256xf32>
      %739 = arith.mulf %737, %738 : vector<2x256xf32>
      %740 = arith.addf %731, %739 : vector<2x256xf32>
      %c85 = arith.constant 85 : index
      %741 = memref.load %arg2[%c85] : memref<98xf32, #tpu.memory_space<smem>>
      %742 = vector.broadcast %741 : f32 to vector<1x256xf32>
      %743 = arith.mulf %742, %63 : vector<1x256xf32>
      %744 = vector.extract_strided_slice %733 {offsets = [0, 1], sizes = [2, 256], strides = [1, 1]} : vector<2x262xf32> to vector<2x256xf32>
      %745 = vector.broadcast %743 : vector<1x256xf32> to vector<2x256xf32>
      %746 = arith.mulf %744, %745 : vector<2x256xf32>
      %747 = arith.addf %740, %746 : vector<2x256xf32>
      %c86 = arith.constant 86 : index
      %748 = memref.load %arg2[%c86] : memref<98xf32, #tpu.memory_space<smem>>
      %749 = vector.broadcast %748 : f32 to vector<1x256xf32>
      %750 = arith.mulf %749, %74 : vector<1x256xf32>
      %751 = vector.extract_strided_slice %733 {offsets = [0, 2], sizes = [2, 256], strides = [1, 1]} : vector<2x262xf32> to vector<2x256xf32>
      %752 = vector.broadcast %750 : vector<1x256xf32> to vector<2x256xf32>
      %753 = arith.mulf %751, %752 : vector<2x256xf32>
      %754 = arith.addf %747, %753 : vector<2x256xf32>
      %c87 = arith.constant 87 : index
      %755 = memref.load %arg2[%c87] : memref<98xf32, #tpu.memory_space<smem>>
      %756 = vector.broadcast %755 : f32 to vector<1x256xf32>
      %757 = arith.mulf %756, %85 : vector<1x256xf32>
      %758 = vector.extract_strided_slice %733 {offsets = [0, 3], sizes = [2, 256], strides = [1, 1]} : vector<2x262xf32> to vector<2x256xf32>
      %759 = vector.broadcast %757 : vector<1x256xf32> to vector<2x256xf32>
      %760 = arith.mulf %758, %759 : vector<2x256xf32>
      %761 = arith.addf %754, %760 : vector<2x256xf32>
      %c88 = arith.constant 88 : index
      %762 = memref.load %arg2[%c88] : memref<98xf32, #tpu.memory_space<smem>>
      %763 = vector.broadcast %762 : f32 to vector<1x256xf32>
      %764 = arith.mulf %763, %96 : vector<1x256xf32>
      %765 = vector.extract_strided_slice %733 {offsets = [0, 4], sizes = [2, 256], strides = [1, 1]} : vector<2x262xf32> to vector<2x256xf32>
      %766 = vector.broadcast %764 : vector<1x256xf32> to vector<2x256xf32>
      %767 = arith.mulf %765, %766 : vector<2x256xf32>
      %768 = arith.addf %761, %767 : vector<2x256xf32>
      %c89 = arith.constant 89 : index
      %769 = memref.load %arg2[%c89] : memref<98xf32, #tpu.memory_space<smem>>
      %770 = vector.broadcast %769 : f32 to vector<1x256xf32>
      %771 = arith.mulf %770, %107 : vector<1x256xf32>
      %772 = vector.extract_strided_slice %733 {offsets = [0, 5], sizes = [2, 256], strides = [1, 1]} : vector<2x262xf32> to vector<2x256xf32>
      %773 = vector.broadcast %771 : vector<1x256xf32> to vector<2x256xf32>
      %774 = arith.mulf %772, %773 : vector<2x256xf32>
      %775 = arith.addf %768, %774 : vector<2x256xf32>
      %c90 = arith.constant 90 : index
      %776 = memref.load %arg2[%c90] : memref<98xf32, #tpu.memory_space<smem>>
      %777 = vector.broadcast %776 : f32 to vector<1x256xf32>
      %778 = arith.mulf %777, %118 : vector<1x256xf32>
      %779 = vector.extract_strided_slice %733 {offsets = [0, 6], sizes = [2, 256], strides = [1, 1]} : vector<2x262xf32> to vector<2x256xf32>
      %780 = vector.broadcast %778 : vector<1x256xf32> to vector<2x256xf32>
      %781 = arith.mulf %779, %780 : vector<2x256xf32>
      %782 = arith.addf %775, %781 : vector<2x256xf32>
      %c1_94 = arith.constant 1 : index
      %c0_95 = arith.constant 0 : index
      %c96_96 = arith.constant 96 : index
      %783 = vector.load %arg7[%c1_94, %c0_95, %c96_96] : memref<2x2x358xf32, #tpu.memory_space<vmem>>, vector<1x2x262xf32>
      %784 = vector.shape_cast %783 : vector<1x2x262xf32> to vector<2x262xf32>
      %c91 = arith.constant 91 : index
      %785 = memref.load %arg2[%c91] : memref<98xf32, #tpu.memory_space<smem>>
      %786 = vector.broadcast %785 : f32 to vector<1x256xf32>
      %787 = arith.mulf %786, %52 : vector<1x256xf32>
      %788 = vector.extract_strided_slice %784 {offsets = [0, 0], sizes = [2, 256], strides = [1, 1]} : vector<2x262xf32> to vector<2x256xf32>
      %789 = vector.broadcast %787 : vector<1x256xf32> to vector<2x256xf32>
      %790 = arith.mulf %788, %789 : vector<2x256xf32>
      %791 = arith.addf %782, %790 : vector<2x256xf32>
      %c92 = arith.constant 92 : index
      %792 = memref.load %arg2[%c92] : memref<98xf32, #tpu.memory_space<smem>>
      %793 = vector.broadcast %792 : f32 to vector<1x256xf32>
      %794 = arith.mulf %793, %63 : vector<1x256xf32>
      %795 = vector.extract_strided_slice %784 {offsets = [0, 1], sizes = [2, 256], strides = [1, 1]} : vector<2x262xf32> to vector<2x256xf32>
      %796 = vector.broadcast %794 : vector<1x256xf32> to vector<2x256xf32>
      %797 = arith.mulf %795, %796 : vector<2x256xf32>
      %798 = arith.addf %791, %797 : vector<2x256xf32>
      %c93 = arith.constant 93 : index
      %799 = memref.load %arg2[%c93] : memref<98xf32, #tpu.memory_space<smem>>
      %800 = vector.broadcast %799 : f32 to vector<1x256xf32>
      %801 = arith.mulf %800, %74 : vector<1x256xf32>
      %802 = vector.extract_strided_slice %784 {offsets = [0, 2], sizes = [2, 256], strides = [1, 1]} : vector<2x262xf32> to vector<2x256xf32>
      %803 = vector.broadcast %801 : vector<1x256xf32> to vector<2x256xf32>
      %804 = arith.mulf %802, %803 : vector<2x256xf32>
      %805 = arith.addf %798, %804 : vector<2x256xf32>
      %c94 = arith.constant 94 : index
      %806 = memref.load %arg2[%c94] : memref<98xf32, #tpu.memory_space<smem>>
      %807 = vector.broadcast %806 : f32 to vector<1x256xf32>
      %808 = arith.mulf %807, %85 : vector<1x256xf32>
      %809 = vector.extract_strided_slice %784 {offsets = [0, 3], sizes = [2, 256], strides = [1, 1]} : vector<2x262xf32> to vector<2x256xf32>
      %810 = vector.broadcast %808 : vector<1x256xf32> to vector<2x256xf32>
      %811 = arith.mulf %809, %810 : vector<2x256xf32>
      %812 = arith.addf %805, %811 : vector<2x256xf32>
      %c95 = arith.constant 95 : index
      %813 = memref.load %arg2[%c95] : memref<98xf32, #tpu.memory_space<smem>>
      %814 = vector.broadcast %813 : f32 to vector<1x256xf32>
      %815 = arith.mulf %814, %96 : vector<1x256xf32>
      %816 = vector.extract_strided_slice %784 {offsets = [0, 4], sizes = [2, 256], strides = [1, 1]} : vector<2x262xf32> to vector<2x256xf32>
      %817 = vector.broadcast %815 : vector<1x256xf32> to vector<2x256xf32>
      %818 = arith.mulf %816, %817 : vector<2x256xf32>
      %819 = arith.addf %812, %818 : vector<2x256xf32>
      %c96_97 = arith.constant 96 : index
      %820 = memref.load %arg2[%c96_97] : memref<98xf32, #tpu.memory_space<smem>>
      %821 = vector.broadcast %820 : f32 to vector<1x256xf32>
      %822 = arith.mulf %821, %107 : vector<1x256xf32>
      %823 = vector.extract_strided_slice %784 {offsets = [0, 5], sizes = [2, 256], strides = [1, 1]} : vector<2x262xf32> to vector<2x256xf32>
      %824 = vector.broadcast %822 : vector<1x256xf32> to vector<2x256xf32>
      %825 = arith.mulf %823, %824 : vector<2x256xf32>
      %826 = arith.addf %819, %825 : vector<2x256xf32>
      %c97 = arith.constant 97 : index
      %827 = memref.load %arg2[%c97] : memref<98xf32, #tpu.memory_space<smem>>
      %828 = vector.broadcast %827 : f32 to vector<1x256xf32>
      %829 = arith.mulf %828, %118 : vector<1x256xf32>
      %830 = vector.extract_strided_slice %784 {offsets = [0, 6], sizes = [2, 256], strides = [1, 1]} : vector<2x262xf32> to vector<2x256xf32>
      %831 = vector.broadcast %829 : vector<1x256xf32> to vector<2x256xf32>
      %832 = arith.mulf %830, %831 : vector<2x256xf32>
      %833 = arith.addf %826, %832 : vector<2x256xf32>
      %834 = arith.negf %833 : vector<2x256xf32>
      %835 = math.exp %834 : vector<2x256xf32>
      %cst_98 = arith.constant 1.000000e+00 : f32
      %836 = vector.broadcast %cst_98 : f32 to vector<2x256xf32>
      %837 = arith.addf %836, %835 : vector<2x256xf32>
      %838 = arith.divf %836, %837 : vector<2x256xf32>
      %c0_99 = arith.constant 0 : index
      %c0_100 = arith.constant 0 : index
      %839 = vector.load %arg4[%c0_99, %c0_100] : memref<2x256xf32, #tpu.memory_space<vmem>>, vector<2x256xf32>
      tpu.vector_store %arg4[%c0_99, %c0_100], %838 {strides = array<i32>} : memref<2x256xf32, #tpu.memory_space<vmem>>, vector<2x256xf32>,
    } else {
    }
    return
  }
  func.func @transform_0(%arg0: i32, %arg1: i32, %arg2: memref<98xf32, #tpu.memory_space<smem>>) -> (i32, i32, i32) {
    %c0_i32 = arith.constant 0 : i32
    %c0_i32_0 = arith.constant 0 : i32
    return %arg0, %arg1, %c0_i32 : i32, i32, i32
  }
  func.func @transform_1(%arg0: i32, %arg1: i32, %arg2: memref<98xf32, #tpu.memory_space<smem>>) -> (i32, i32) {
    %c0_i32 = arith.constant 0 : i32
    %c0_i32_0 = arith.constant 0 : i32
    return %arg0, %c0_i32 : i32, i32
  }
}

</mosaic_0001>

<bundles_post_ra>
// kernel: tpu_custom_call.1
= control target key start
LH: loop header
LB: loop body
LE: loop exit
PB: predicated region body
PF: predicated region fallthrough
CT: control target
= control target key end

     0   :  { %s4881_s0 = inlined_call_operand.hbm [shape: f32[98], index: 0, kind: input, shape index: {}]   ;;  %s4882_s1 = inlined_call_operand.hbm [shape: f32[2,4,256], index: 1, kind: input, shape index: {}]   ;;  %s4883_s2 = inlined_call_operand.hbm [shape: f32[2,256], index: 2, kind: output, shape index: {}]  }
   0x1   :  { %s3277_s11 = scalar_lea.hbm %s4881_s0, 16 }
   0x2   :  { %p3278_p0 = scmp.ne.s32.totalorder %s4881_s0, %s3277_s11  ;;  %p3281_p1 = scmp.lt.u32.totalorder %s3277_s11, %s4881_s0 }
   0x4   :  { %p3283_p2 = pnand %p3281_p1, %p3278_p0 }
   0x6   :  { %3286 = shalt.err (!%p3283_p2)  }
   0x7   :  { %s3337_s16 = smov [#allocation6]  }
   0x8   :  { %8 = dma.hbm_to_smem %s4881_s0, 16, %s3337_s16, [#allocation5] }
   0x9   :  { %3331 = dma.done.wait [#allocation5], 16 }
   0xa   :  { %3332 = vsyncadd [#allocation5], 4294967280 }
   0xb   :  { %10 = sfence }
   0xc   :  { %11 = vsyncpa [#allocation8], 0 }
   0xd   :  { %12 = vsyncpa [#allocation9], 0  ;;  %s3338_s19 = smov [#allocation7]   ;;  %s3287_s23 = scalar_lea.hbm %s4882_s1, 256 }
   0xe   :  { %s18_s20 = sshll.u32 %s3338_s19, 4  ;;  %p3288_p3 = scmp.ne.s32.totalorder %s4882_s1, %s3287_s23  ;;  %s19_s20 = int_to_ptr.vmem [resolvable:$true] %s18_s20 }
   0xf   :  { %p3291_p4 = scmp.lt.u32.totalorder %s3287_s23, %s4882_s1 }
  0x11   :  { %p3293_p5 = pnand %p3291_p4, %p3288_p3 }
  0x13   :  { %3296 = shalt.err (!%p3293_p5)
}
  0x14   :  { %s3297_s0 = scalar_lea.vmem %s19_s20, 256  ;;  %p3302_p7 = scmp.lt.s32.totalorder %s19_s20, %s19_s20 }
  0x15   :  { %p3298_p6 = scmp.ne.s32.totalorder %s19_s20, %s3297_s0  ;;  %p3303_p8 = scmp.lt.s32.totalorder %s3297_s0, %s3297_s0 }
  0x17   :  { %p3304_p9 = por %p3303_p8, %p3302_p7 }
  0x19   :  { %p3305_p10 = pnand %p3304_p9, %p3298_p6 }
  0x1b   :  { %3308 = shalt.err (!%p3305_p10)
}
  0x1c   :  { %s3339_s28 = smov 128   ;;  %s3340_s29 = smov 8  }
  0x1d   :  { %24 = dma.hbm_to_vmem [thread:$0]  %s4882_s1, 256, %s19_s20, [#allocation8], %s3339_s28, %s3339_s28, %s3340_s29  }
  0x1e   :  { %3333 = dma.done.wait [#allocation8], 256  }
  0x1f   :  { %3334 = vsyncadd [#allocation8], 4294967040  ;;  %v80_v0 = vlaneseq  ;;  %v3341_v1 = vmov 1983009808   ;;  %s3074_s4 = sld [smem:[#allocation6 + $0x3]]  ;;  %s3475_s5 = sld [smem:[#allocation6 + $0x2]] }
  0x20   :  { %v78_v2 = vunpack.c.l.s4 %v3341_v1  ;;  %v3342_v3 = vmov 0.0   ;;  %s3478_s6 = sld [smem:[#allocation6 + $0x1]]  ;;  %v3343_v9 = vmov -inf   ;;  %s3484_s1 = sld [smem:[#allocation6 + $0x4]]  ;;  %vm43_vm12 = vcmask 1043456  }
  0x21   :  { %32 = vst [vmem:[#allocation2] sm:$0xf] %v3342_v3  ;;  %v81_v4 = vshrl.u32 %v80_v0, 7  ;;  %v200_v5 = vand.u32 127, %v80_v0  ;;  %33 = vst [vmem:[#allocation3] sm:$0xf] %v3343_v9 }
  0x22   :  { %v79_v6 = vunpack.c.0.s8 %v78_v2  ;;  %s3486_s7 = sld [smem:[#allocation6 + $0x16]]  ;;  %s3500_s8 = sld [smem:[#allocation6 + $0x5]]  ;;  %vm97_vm13 = vcmask 1041409   ;;  %vm99_vm14 = vcmask 1043459   ;;  %vm101_vm15 = vcmask 1045509  }
  0x23   :  { %v201_v7 = vadd.s32 128, %v200_v5  ;;  %v3480_v8 = vand.u32 15, %v200_v5  ;;  %s3507_s9 = sld [smem:[#allocation6 + $0x18]]  ;;  %s3344_s10 = smov 3  }
  0x24   :  { %v3482_v10 = vsub.s32 %v79_v6, %v81_v4  ;;  %s3524_s11 = sld [smem:[#allocation6 + $0x6]]  ;;  %s3526_s12 = sld [smem:[#allocation6 + $0x1a]] }
  0x25   :  { %v3488_v11 = vand.u32 15, %v201_v7  ;;  %v248_v12 = vadd.s32 2, %v3480_v8  ;;  %v236_v13 = vadd.s32 1, %v3480_v8  ;;  %v272_v14 = vadd.s32 4, %v3480_v8  ;;  %s3541_s13 = sld [smem:[#allocation6 + $0x7]]  ;;  %s3548_s14 = sld [smem:[#allocation6 + $0x1c]] }
  0x26   :  { %v385_v15 = vstv %s3074_s4  ;;  %v356_v16 = vstv %s3475_s5  ;;  %v284_v17 = vadd.s32 5, %v3480_v8  ;;  %v3496_v18 = vadd.s32 6, %v3480_v8  ;;  %s3550_s15 = sld [smem:[#allocation6 + $0x8]]  ;;  %s3345_s16 = smov 2  }
  0x27   :  { %v390_v19 = vcombine.low %v385_v15, %v385_v15  ;;  %v249_v20 = vadd.s32 2, %v3488_v11  ;;  %vm250_vm0 = vcmp.ge.s32.totalorder %v248_v12, 3  ;;  %v237_v21 = vadd.s32 1, %v3488_v11  ;;  %s3346_s17 = smov 1   ;;  %s3561_s18 = sld [smem:[#allocation6 + $0x1e]] }
  0x28   :  { %v3503_v22 = vsel %vm250_vm0, 1.0, %v3342_v3  ;;  %vm238_vm1 = vcmp.ge.s32.totalorder %v236_v13, 3  ;;  %v327_v23 = vstv %s3478_s6  ;;  %v273_v24 = vadd.s32 4, %v3488_v11  ;;  %s3573_s19 = sld [smem:[#allocation6 + $0x9]]  ;;  %s3575_s20 = sld [smem:[#allocation6 + $0x20]] }
  0x29   :  { %v397_v25 = vrot.slane %v390_v19, %v3482_v10  ;;  %vm251_vm2 = vcmp.ge.s32.totalorder %v249_v20, 3  ;;  %v357_v26 = vmul.f32 %v3503_v22, %v356_v16  ;;  %vm239_vm3 = vcmp.ge.s32.totalorder %v237_v21, 3  ;;  %s3347_s21 = smov 4   ;;  %s3348_s22 = smov 49  }
  0x2a   :  { %v3512_v27 = vsel %vm251_vm2, 1.0, %v3342_v3  ;;  %v3515_v28 = vsel %vm238_vm1, 1.0, %v3342_v3  ;;  %v3518_v29 = vsel %vm239_vm3, 1.0, %v3342_v3  ;;  %vm276_vm4 = vcmp.lt.s32.totalorder %v272_v14, 19  ;;  %s3587_s23 = sld [smem:[#allocation6 + $0xa]]  ;;  %s3602_s25 = sld [smem:[#allocation6 + $0x24]] }
  0x2b   :  { %398 = vrot.lane.b32.xlu0 %v397_v25, %s3344_s10  ;;  %v358_v30 = vmul.f32 %v3512_v27, %v356_v16  ;;  %v328_v31 = vmul.f32 %v3515_v28, %v327_v23  ;;  %v329_v32 = vmul.f32 %v3518_v29, %v327_v23  ;;  %vm277_vm5 = vcmp.lt.s32.totalorder %v273_v24, 19  ;;  %s3600_s24 = sld [smem:[#allocation6 + $0x22]]  ;;  %s3349_s26 = smov 5  }
  0x2c   :  { %v3529_v33 = vsel %vm276_vm4, 1.0, %v3342_v3  ;;  %v3532_v34 = vsel %vm277_vm5, 1.0, %v3342_v3  ;;  %v414_v35 = vstv %s3484_s1  ;;  %v939_v36 = vstv %s3486_s7  ;;  %s4903_s27 = smov 51   ;;  %s3351_s0 = smov 6  }
  0x2d   :  { %v361_v37 = vcombine.low %v357_v26, %v358_v30  ;;  %v332_v38 = vcombine.low %v328_v31, %v329_v32  ;;  %v415_v39 = vmul.f32 %v3529_v33, %v414_v35  ;;  %v416_v40 = vmul.f32 %v3532_v34, %v414_v35  ;;  %s4893_s28 = smov 53   ;;  %s3627_s29 = sld [smem:[#allocation6 + $0x26]] }
  0x2e   :  { %v940_v41 = vmul.f32 %v3515_v28, %v939_v36  ;;  %v941_v42 = vmul.f32 %v3518_v29, %v939_v36  ;;  %v285_v43 = vadd.s32 5, %v3488_v11  ;;  %vm288_vm6 = vcmp.lt.s32.totalorder %v284_v17, 19  ;;  %s3353_s30 = smov 16   ;;  %s4895_s3 = smov 64  }
  0x2f   :  { %v368_v44 = vrot.slane %v361_v37, %v3482_v10  ;;  %v339_v45 = vrot.slane %v332_v38, %v3482_v10  ;;  %v419_v46 = vcombine.low %v415_v39, %v416_v40  ;;  %v3546_v47 = vsel %vm288_vm6, 1.0, %v3342_v3  ;;  %v34_v39 = vld [vmem:[#allocation7] sm:$0xff]  ;;  %s3355_s4 = smov 17   ;;  %s4892_s5 = smov 66  }
  0x30   :  { %v944_v48 = vcombine.low %v940_v41, %v941_v42  ;;  %vm289_vm7 = vcmp.lt.s32.totalorder %v285_v43, 19  ;;  %v443_v49 = vstv %s3500_s8  ;;  %v997_v50 = vstv %s3507_s9  ;;  %s3656_s6 = sld [smem:[#allocation6 + $0x28]]  ;;  %s3357_s1 = smov 18  }
  0x31   :  { %369 = vrot.lane.b32.xlu0 %v368_v44, %s3345_s16  ;;  %340 = vrot.lane.b32.xlu1 %v339_v45, %s3346_s17  ;;  %v426_v51 = vrot.slane %v419_v46, %v3482_v10  ;;  %v3558_v52 = vsel %vm289_vm7, 1.0, %v3342_v3  ;;  %v444_v53 = vmul.f32 %v3546_v47, %v443_v49  ;;  %v1002_v54 = vcombine.low %v997_v50, %v997_v50  ;;  %s4891_s7 = smov 68   ;;  %s3665_s8 = sld [smem:[#allocation6 + $0x2a]] }
  0x32   :  { %v951_v55 = vrot.slane %v944_v48, %v3482_v10  ;;  %v445_v56 = vmul.f32 %v3558_v52, %v443_v49  ;;  %v297_v57 = vadd.s32 6, %v3488_v11  ;;  %vm300_vm8 = vcmp.lt.s32.totalorder %v3496_v18, 19  ;;  %s3359_s9 = smov 19  }
  0x33   :  { %v1009_v58 = vrot.slane %v1002_v54, %v3482_v10  ;;  %v3569_v59 = vsel %vm300_vm8, 1.0, %v3342_v3  ;;  %v472_v60 = vstv %s3524_s11  ;;  %v1054_v61 = vstv %s3526_s12  ;;  %s4890_s11 = smov 70   ;;  %s3670_s12 = sld [smem:[#allocation6 + $0x2c]] }
  0x34   :  { %v448_v62 = vcombine.low %v444_v53, %v445_v56  ;;  %vm301_vm9 = vcmp.lt.s32.totalorder %v297_v57, 19  ;;  %v473_v63 = vmul.f32 %v3569_v59, %v472_v60  ;;  %v1055_v0 = vmul.f32 %v3546_v47, %v1054_v61 }
  0x35   :  { %427 = vrot.lane.b32.xlu0 %v426_v51, %s3347_s21  ;;  %952 = vrot.lane.b32.xlu1 %v951_v55, %s3348_s22  ;;  %v3582_v1 = vsel %vm301_vm9, 1.0, %v3342_v3  ;;  %v1056_v2 = vmul.f32 %v3558_v52, %v1054_v61  ;;  %vm226_vm10 = vcmp.ge.s32.totalorder %v3480_v8, 3  ;;  %vm227_vm11 = vcmp.ge.s32.totalorder %v3488_v11, 3  ;;  %v35_v51 = vld [vmem:[#allocation7 + $0x8] sm:$0xff] }
  0x36   :  { %v455_v4 = vrot.slane %v448_v62, %v3482_v10  ;;  %v474_v5 = vmul.f32 %v3582_v1, %v472_v60  ;;  %v3592_v6 = vsel %vm226_vm10, 1.0, %v3342_v3  ;;  %v3595_v7 = vsel %vm227_vm11, 1.0, %v3342_v3 }
  0x37   :  { %v1059_v9 = vcombine.low %v1055_v0, %v1056_v2  ;;  %v502_v12 = vstv %s3541_s13  ;;  %v1113_v13 = vstv %s3548_s14  ;;  %v531_v14 = vstv %s3550_s15  ;;  %s4889_s13 = smov 81   ;;  %s3680_s14 = sld [smem:[#allocation6 + $0x2e]] }
  0x38   :  { %v477_v8 = vcombine.low %v473_v63, %v474_v5  ;;  %v503_v11 = vmul.f32 %v3592_v6, %v502_v12  ;;  %v504_v15 = vmul.f32 %v3595_v7, %v502_v12  ;;  %v1114_v16 = vmul.f32 %v3592_v6, %v1113_v13  ;;  %s3682_s15 = sld [smem:[#allocation6 + $0x30]] }
  0x39   :  { %456 = vrot.lane.b32.xlu0 %v455_v4, %s3349_s26  ;;  %1010 = vrot.lane.b32.xlu1 %v1009_v58, %s4903_s27  ;;  %v1066_v17 = vrot.slane %v1059_v9, %v3482_v10  ;;  %v1115_v18 = vmul.f32 %v3595_v7, %v1113_v13  ;;  %v532_v19 = vmul.f32 %v3515_v28, %v531_v14  ;;  %v1170_v20 = vstv %s3561_s18  ;;  %s4888_s18 = smov 83  }
  0x3a   :  { %v484_v21 = vrot.slane %v477_v8, %v3482_v10  ;;  %v507_v23 = vcombine.low %v503_v11, %v504_v15  ;;  %v533_v24 = vmul.f32 %v3518_v29, %v531_v14  ;;  %v1171_v25 = vmul.f32 %v3503_v22, %v1170_v20 }
  0x3b   :  { %v1118_v26 = vcombine.low %v1114_v16, %v1115_v18  ;;  %v1172_v30 = vmul.f32 %v3512_v27, %v1170_v20  ;;  %v560_v31 = vstv %s3573_s19  ;;  %v1228_v32 = vstv %s3575_s20  ;;  %s4887_s19 = smov 85   ;;  %s3696_s20 = sld [smem:[#allocation6 + $0xb]] }
  0x3c   :  { %v514_v35 = vrot.slane %v507_v23, %v3482_v10  ;;  %v536_v36 = vcombine.low %v532_v19, %v533_v24  ;;  %v561_v37 = vmul.f32 %v3503_v22, %v560_v31  ;;  %v562_v38 = vmul.f32 %v3512_v27, %v560_v31 }
  0x3d   :  { %485 = vrot.lane.b32.xlu0 %v484_v21, %s3351_s0  ;;  %1067 = vrot.lane.b32.xlu1 %v1066_v17, %s4893_s28  ;;  %v1125_v40 = vrot.slane %v1118_v26, %v3482_v10  ;;  %v1175_v41 = vcombine.low %v1171_v25, %v1172_v30  ;;  %v1229_v42 = vmul.f32 %v3529_v33, %v1228_v32  ;;  %v589_v43 = vstv %s3587_s23  ;;  %s3364_s23 = smov 96   ;;  %s4900_s28 = smov 54  }
  0x3e   :  { %v565_v44 = vcombine.low %v561_v37, %v562_v38  ;;  %v1230_v45 = vmul.f32 %v3532_v34, %v1228_v32  ;;  %v3630_v46 = vcombine.low %v589_v43, %v589_v43  ;;  %v543_v48 = vrot.slane %v536_v36, %v3482_v10 }
  0x3f   :  { %v1286_v49 = vstv %s3600_s24  ;;  %v1343_v50 = vstv %s3602_s25  ;;  %v39_v53 = vcombine.high %v34_v39, %v34_v39  ;;  %v1182_v54 = vrot.slane %v1175_v41, %v3482_v10  ;;  %s3706_s24 = sld [smem:[#allocation6 + $0x32]]  ;;  %s3708_s25 = sld [smem:[#allocation6 + $0xc]] }
  0x40   :  { %v572_v55 = vrot.slane %v565_v44, %v3482_v10  ;;  %v1233_v56 = vcombine.low %v1229_v42, %v1230_v45  ;;  %v1287_v57 = vmul.f32 %v3569_v59, %v1286_v49  ;;  %v1288_v58 = vmul.f32 %v3582_v1, %v1286_v49 }
  0x41   :  { %515 = vrot.lane.b32.xlu0 %v514_v35, %s3353_s30  ;;  %1126 = vrot.lane.b32.xlu1 %v1125_v40, %s4895_s3  ;;  %v1344_v60 = vmul.f32 %v3515_v28, %v1343_v50  ;;  %v1345_v61 = vmul.f32 %v3518_v29, %v1343_v50  ;;  %v44_v62 = vsel %vm43_vm12, %v34_v39, 0.0  ;;  %v601_v63 = vrot.slane %v3630_v46, %v3482_v10  ;;  %s4897_s3 = smov 65  }
  0x42   :  { %v40_v0 = vcombine.high %v35_v51, %v35_v51  ;;  %v45_v2 = vrot.slane %v44_v62, 4  ;;  %v51_v4 = vsel %vm43_vm12, %v39_v53, 0.0  ;;  %v1291_v5 = vcombine.low %v1287_v57, %v1288_v58 }
  0x43   :  { %v1348_v9 = vcombine.low %v1344_v60, %v1345_v61  ;;  %v52_v12 = vrot.slane %v51_v4, 4  ;;  %v58_v13 = vsel %vm43_vm12, %v35_v51, 0.0  ;;  %v1240_v14 = vrot.slane %v1233_v56, %v3482_v10 }
  0x44   :  { %v46_v8 = vadd.f32 %v45_v2, %v44_v62  ;;  %v59_v11 = vrot.slane %v58_v13, 4  ;;  %v65_v15 = vsel %vm43_vm12, %v40_v0, 0.0  ;;  %v1298_v16 = vrot.slane %v1291_v5, %v3482_v10 }
  0x45   :  { %544 = vrot.lane.b32.xlu0 %v543_v48, %s3355_s4  ;;  %1183 = vrot.lane.b32.xlu1 %v1182_v54, %s4892_s5  ;;  %v53_v17 = vadd.f32 %v52_v12, %v51_v4  ;;  %v66_v18 = vrot.slane %v65_v15, 4  ;;  %v1401_v19 = vstv %s3627_s29  ;;  %v1355_v20 = vrot.slane %v1348_v9, %v3482_v10  ;;  %s4886_s29 = smov 98   ;;  %s4894_s5 = smov 52  }
  0x46   :  { %v47_v21 = vrot.slane %v46_v8, 2  ;;  %v60_v23 = vadd.f32 %v59_v11, %v58_v13  ;;  %v109_v24 = vsel %vm43_vm12, %v34_v39, -inf  ;;  %v116_v31 = vsel %vm43_vm12, %v39_v53, -inf }
  0x47   :  { %v54_v25 = vrot.slane %v53_v17, 2  ;;  %v67_v26 = vadd.f32 %v66_v18, %v65_v15  ;;  %v110_v30 = vrot.slane %v109_v24, 4  ;;  %v3659_v36 = vcombine.low %v1401_v19, %v1401_v19 }
  0x48   :  { %v48_v32 = vadd.f32 %v47_v21, %v46_v8  ;;  %v61_v35 = vrot.slane %v60_v23, 2  ;;  %v117_v37 = vrot.slane %v116_v31, 4  ;;  %v123_v41 = vsel %vm43_vm12, %v35_v51, -inf }
  0x49   :  { %573 = vrot.lane.b32.xlu0 %v572_v55, %s3357_s1  ;;  %1241 = vrot.lane.b32.xlu1 %v1240_v14, %s4891_s7  ;;  %v55_v38 = vadd.f32 %v54_v25, %v53_v17  ;;  %v68_v39 = vrot.slane %v67_v26, 2  ;;  %v111_v40 = vmax.f32 %v109_v24, %v110_v30  ;;  %v124_v45 = vrot.slane %v123_v41, 4  ;;  %s3379_s7 = smov 50  }
  0x4a   :  { %v49_v42 = vrot.slane %v48_v32, 1  ;;  %v62_v43 = vadd.f32 %v61_v35, %v60_v23  ;;  %v118_v44 = vmax.f32 %v116_v31, %v117_v37  ;;  %v130_v50 = vsel %vm43_vm12, %v40_v0, -inf }
  0x4b   :  { %v56_v46 = vrot.slane %v55_v38, 1  ;;  %v69_v48 = vadd.f32 %v68_v39, %v67_v26  ;;  %v112_v49 = vrot.slane %v111_v40, 2  ;;  %v125_v56 = vmax.f32 %v123_v41, %v124_v45  ;;  %v36_v41 = vld [vmem:[#allocation2] sm:$0xf] }
  0x4c   :  { %v50_v53 = vadd.f32 %v49_v42, %v48_v32  ;;  %v63_v54 = vrot.slane %v62_v43, 1  ;;  %v119_v55 = vrot.slane %v118_v44, 2  ;;  %v131_v60 = vrot.slane %v130_v50, 4 }
  0x4d   :  { %602 = vrot.lane.b32.xlu0 %v601_v63, %s3359_s9  ;;  %1299 = vrot.lane.b32.xlu1 %v1298_v16, %s4890_s11  ;;  %v57_v51 = vadd.f32 %v56_v46, %v55_v38  ;;  %v70_v57 = vrot.slane %v69_v48, 1  ;;  %v113_v58 = vmax.f32 %v111_v40, %v112_v49  ;;  %v126_v0 = vrot.slane %v125_v56, 2  ;;  %s3104_s11 = sld [smem:[#allocation6 + $0x21]] }
  0x4e   :  { %v64_v61 = vadd.f32 %v63_v54, %v62_v43  ;;  %v120_v62 = vmax.f32 %v118_v44, %v119_v55  ;;  %v1459_v2 = vstv %s3656_s6  ;;  %v132_v12 = vmax.f32 %v130_v50, %v131_v60  ;;  %s3123_s6 = sld [smem:[#allocation6 + $0x34]] }
  0x4f   :  { %v71_v4 = vadd.f32 %v70_v57, %v69_v48  ;;  %v76_v5 = vcombine.low %v50_v53, %v57_v51  ;;  %v114_v9 = vrot.slane %v113_v58, 1  ;;  %v127_v14 = vmax.f32 %v125_v56, %v126_v0 }
  0x50   :  { %v121_v13 = vrot.slane %v120_v62, 1  ;;  %v1460_v63 = vmul.f32 %v3546_v47, %v1459_v2  ;;  %v1461_v8 = vmul.f32 %v3558_v52, %v1459_v2  ;;  %v1413_v15 = vrot.slane %v3659_v36, %v3482_v10 }
  0x51   :  { %1356 = vrot.lane.b32.xlu1 %v1355_v20, %s4889_s13  ;;  %v84_v11 = vcombine.low %v64_v61, %v71_v4  ;;  %v133_v16 = vrot.slane %v132_v12, 2  ;;  %v83_v17 = vrot.slane %v76_v5, %v3482_v10  ;;  %v128_v18 = vrot.slane %v127_v14, 1  ;;  %v108_v5 = vld [vmem:[#allocation3] sm:$0xf]  ;;  %s3377_s13 = smov 38  }
  0x52   :  { %v1464_v19 = vcombine.low %v1460_v63, %v1461_v8  ;;  %v115_v23 = vmax.f32 %v113_v58, %v114_v9  ;;  %v122_v24 = vmax.f32 %v120_v62, %v121_v13  ;;  %v1518_v30 = vstv %s3665_s8  ;;  %s3719_s8 = sld [smem:[#allocation6 + $0xd]] }
  0x53   :  { %v91_v21 = vrot.slane %v84_v11, %v3482_v10  ;;  %v134_v25 = vmax.f32 %v132_v12, %v133_v16  ;;  %v129_v26 = vmax.f32 %v127_v14, %v128_v18  ;;  %v1519_v35 = vmul.f32 %v3592_v6, %v1518_v30 }
  0x54   :  { %v1471_v32 = vrot.slane %v1464_v19, %v3482_v10  ;;  %v1520_v36 = vmul.f32 %v3595_v7, %v1518_v30  ;;  %v1574_v37 = vstv %s3670_s12  ;;  %vm103_vm0 = vcmask 1047559   ;;  %s4885_s12 = smov 100  }
  0x55   :  { %v96_v20 = vrot.slane %v91_v21, 7  ;;  %1414 = vrot.lane.b32.xlu1 %v1413_v15, %s4888_s18  ;;  %v135_v31 = vrot.slane %v134_v25, 1  ;;  %v141_v40 = vcombine.low %v115_v23, %v122_v24  ;;  %v1575_v44 = vmul.f32 %v3503_v22, %v1574_v37  ;;  %s3376_s18 = smov 37  }
  0x56   :  { %v1523_v43 = vcombine.low %v1519_v35, %v1520_v36  ;;  %v1576_v48 = vmul.f32 %v3512_v27, %v1574_v37  ;;  %v1632_v51 = vstv %s3680_s14  ;;  %v1690_v57 = vstv %s3682_s15  ;;  %s3085_s14 = sld [smem:[#allocation6 + $0xe]]  ;;  %s4884_s15 = smov 102  }
  0x57   :  { %v98_v38 = vsel %vm97_vm13, %v96_v20, %v83_v17  ;;  %v136_v39 = vmax.f32 %v134_v25, %v135_v31  ;;  %v148_v54 = vrot.slane %v141_v40, %v3482_v10  ;;  %v1633_v61 = vmul.f32 %v3529_v33, %v1632_v51 }
  0x58   :  { %v100_v42 = vsel %vm99_vm14, %v96_v20, %v98_v38  ;;  %v1530_v50 = vrot.slane %v1523_v43, %v3482_v10  ;;  %v1579_v56 = vcombine.low %v1575_v44, %v1576_v48  ;;  %v1634_v62 = vmul.f32 %v3532_v34, %v1632_v51 }
  0x59   :  { %v102_v45 = vsel %vm101_vm15, %v96_v20, %v100_v42  ;;  %v149_v46 = vcombine.low %v129_v26, %v136_v39  ;;  %1472 = vrot.lane.b32.xlu1 %v1471_v32, %s4887_s19  ;;  %v1691_v0 = vmul.f32 %v3569_v59, %v1690_v57  ;;  %v1692_v4 = vmul.f32 %v3582_v1, %v1690_v57  ;;  %s3375_s19 = smov 36  }
  0x5a   :  { %v104_v49 = vsel %vm103_vm0, %v96_v20, %v102_v45  ;;  %v1586_v60 = vrot.slane %v1579_v56, %v3482_v10  ;;  %v1637_v12 = vcombine.low %v1633_v61, %v1634_v62  ;;  %v618_v8 = vstv %s3696_s20  ;;  %s3086_s20 = sld [smem:[#allocation6 + $0xf]] }
  0x5b   :  { %v106_v53 = vadd.f32 %v104_v49, %v36_v41  ;;  %v156_v55 = vrot.slane %v149_v46, %v3482_v10  ;;  %v1695_v14 = vcombine.low %v1691_v0, %v1692_v4  ;;  %v619_v17 = vmul.f32 %v3529_v33, %v618_v8 }
  0x5c   :  { %v1644_v11 = vrot.slane %v1637_v12, %v3482_v10  ;;  %v620_v18 = vmul.f32 %v3532_v34, %v618_v8  ;;  %v1737_v21 = vstv %s3706_s24  ;;  %v647_v23 = vstv %s3708_s25  ;;  %s3087_s24 = sld [smem:[#allocation6 + $0x10]]  ;;  %s3368_s25 = smov 20  }
  0x5d   :  { %107 = vst [vmem:[#allocation2] sm:$0xf] %v106_v53  ;;  %v159_v58 = vrot.slane %v156_v55, 7  ;;  %1531 = vrot.lane.b32.xlu1 %v1530_v50, %s3364_s23  ;;  %v1702_v19 = vrot.slane %v1695_v14, %v3482_v10  ;;  %v1738_v24 = vmul.f32 %v3515_v28, %v1737_v21  ;;  %v1739_v25 = vmul.f32 %v3518_v29, %v1737_v21 }
  0x5e   :  { %v623_v26 = vcombine.low %v619_v17, %v620_v18  ;;  %v648_v30 = vmul.f32 %v3546_v47, %v647_v23  ;;  %v649_v20 = vmul.f32 %v3558_v52, %v647_v23  ;;  %v1791_v31 = vstv %s3123_s6  ;;  %s3369_s6 = smov 21  }
  0x5f   :  { %v160_v2 = vsel %vm97_vm13, %v159_v58, %v148_v54  ;;  %v676_v32 = vstv %s3719_s8  ;;  %v1742_v35 = vcombine.low %v1738_v24, %v1739_v25  ;;  %v1796_v36 = vcombine.low %v1791_v31, %v1791_v31  ;;  %s3089_s8 = sld [smem:[#allocation6 + $0x12]] }
  0x60   :  { %v161_v9 = vsel %vm99_vm14, %v159_v58, %v160_v2  ;;  %v630_v39 = vrot.slane %v623_v26, %v3482_v10  ;;  %v652_v40 = vcombine.low %v648_v30, %v649_v20  ;;  %v677_v41 = vmul.f32 %v3569_v59, %v676_v32 }
  0x61   :  { %v162_v13 = vsel %vm101_vm15, %v159_v58, %v161_v9  ;;  %1587 = vrot.lane.b32.xlu1 %v1586_v60, %s4886_s29  ;;  %v1749_v38 = vrot.slane %v1742_v35, %v3482_v10  ;;  %v678_v42 = vmul.f32 %v3582_v1, %v676_v32  ;;  %v706_v43 = vstv %s3085_s14  ;;  %s3370_s14 = smov 22   ;;  %s3096_s29 = sld [smem:[#allocation6 + $0x19]] }
  0x62   :  { %v163_v63 = vsel %vm103_vm0, %v159_v58, %v162_v13  ;;  %v1803_v44 = vrot.slane %v1796_v36, %v3482_v10  ;;  %v659_v45 = vrot.slane %v652_v40, %v3482_v10  ;;  %v707_v48 = vmul.f32 %v3592_v6, %v706_v43 }
  0x63   :  { %v165_v15 = vmax.f32 %v108_v5, %v163_v63  ;;  %v681_v46 = vcombine.low %v677_v41, %v678_v42  ;;  %v708_v49 = vmul.f32 %v3595_v7, %v706_v43  ;;  %v735_v50 = vstv %s3086_s20  ;;  %s3371_s20 = smov 32  }
  0x64   :  { %v177_v16 = vld [vmem:[#allocation2] sm:$0xf]  ;;  %v736_v55 = vmul.f32 %v3515_v28, %v735_v50  ;;  %v737_v56 = vmul.f32 %v3518_v29, %v735_v50  ;;  %v764_v51 = vstv %s3087_s24  ;;  %s3091_s24 = sld [smem:[#allocation6 + $0x14]]  ;;  %vm170_vm1 = vcmask 1041408  }
  0x65   :  { %179 = vrot.lane.b32.xlu0 %v177_v16, %s4903_s27  ;;  %166 = vst [vmem:[#allocation3] sm:$0xf] %v165_v15  ;;  %1645 = vrot.lane.b32.xlu1 %v1644_v11, %s4885_s12  ;;  %v688_v53 = vrot.slane %v681_v46, %v3482_v10  ;;  %v711_v54 = vcombine.low %v707_v48, %v708_v49  ;;  %v822_v4 = vstv %s3089_s8  ;;  %s3092_s12 = sld [smem:[#allocation6 + $0x15]]  ;;  %vm171_vm2 = vcmask 1043458   ;;  %s3094_s8 = sld [smem:[#allocation6 + $0x17]] }
  0x66   :  { %v740_v58 = vcombine.low %v736_v55, %v737_v56  ;;  %v765_v60 = vmul.f32 %v3503_v22, %v764_v51  ;;  %v766_v61 = vmul.f32 %v3512_v27, %v764_v51  ;;  %v823_v12 = vmul.f32 %v3529_v33, %v822_v4  ;;  %vm172_vm4 = vmor %vm171_vm2, %vm170_vm1 }
  0x67   :  { %v718_v57 = vrot.slane %v711_v54, %v3482_v10  ;;  %v824_v13 = vmul.f32 %v3532_v34, %v822_v4  ;;  %vm173_vm3 = vcmask 832516   ;;  %v1025_v36 = vstv %s3096_s29  ;;  %s3102_s29 = sld [smem:[#allocation6 + $0x1f]] }
  0x68   :  { %v747_v62 = vrot.slane %v740_v58, %v3482_v10  ;;  %v769_v0 = vcombine.low %v765_v60, %v766_v61  ;;  %vm174_vm5 = vmor %vm173_vm3, %vm172_vm4  ;;  %v1027_v40 = vmul.f32 %v3532_v34, %v1025_v36  ;;  %v1257_v51 = vstv %s3104_s11  ;;  %s3112_s11 = sld [smem:[#allocation6 + $0x29]] }
  0x69   :  { %1703 = vrot.lane.b32.xlu1 %v1702_v19, %s4884_s15  ;;  %s3372_s15 = smov 33   ;;  %v827_v8 = vcombine.low %v823_v12, %v824_v13  ;;  %175 = vst.msk [vmem:[#allocation4] sm:$0x3f] %vm174_vm5, %v3342_v3  ;;  %176 = vst.msk [vmem:[#allocation4 + $0x6] sm:$0x3f] %vm174_vm5, %v3342_v3  ;;  %v1258_v61 = vmul.f32 %v3546_v47, %v1257_v51  ;;  %vm185_vm6 = vcmask 1041816  }
  0x6a   :  { %v776_v5 = vrot.slane %v769_v0, %v3482_v10  ;;  %v880_v16 = vstv %s3091_s24  ;;  %s3098_s24 = sld [smem:[#allocation6 + $0x1b]]  ;;  %vm187_vm7 = vcmask 414724   ;;  %vm186_vm8 = vmor %vm171_vm2, %vm185_vm6  ;;  %vm4920_vm9 = vcmask 416768  }
  0x6b   :  { %v834_v17 = vrot.slane %v827_v8, %v3482_v10  ;;  %v881_v19 = vmul.f32 %v3569_v59, %v880_v16  ;;  %v882_v21 = vmul.f32 %v3582_v1, %v880_v16  ;;  %v910_v23 = vstv %s3092_s12  ;;  %s3100_s12 = sld [smem:[#allocation6 + $0x1d]]  ;;  %vm3863_vm10 = vmor %vm187_vm7, %vm186_vm8 }
  0x6c   :  { %v190_v37 = vld [vmem:[#allocation3] sm:$0xf]  ;;  %v911_v3 = vmul.f32 %v3592_v6, %v910_v23  ;;  %v912_v26 = vmul.f32 %v3595_v7, %v910_v23  ;;  %v968_v30 = vstv %s3094_s8  ;;  %s3378_s8 = smov 48   ;;  %vm343_vm11 = vcmask 7168  }
  0x6d   :  { %192 = vrot.lane.b32.xlu0 %v190_v37, %s4903_s27  ;;  %1750 = vrot.lane.b32.xlu1 %v1749_v38, %s3346_s17  ;;  %s3088_s17 = sld [smem:[#allocation6 + $0x11]]  ;;  %v885_v25 = vcombine.low %v881_v19, %v882_v21  ;;  %v969_v32 = vmul.f32 %v3503_v22, %v968_v30  ;;  %v970_v35 = vmul.f32 %v3512_v27, %v968_v30  ;;  %v1199_v56 = vstv %s3102_s29  ;;  %s4899_s29 = smov 67  }
  0x6e   :  { %v915_v31 = vcombine.low %v911_v3, %v912_v26  ;;  %v1204_v60 = vcombine.low %v1199_v56, %v1199_v56  ;;  %v1488_v23 = vstv %s3112_s11  ;;  %s3122_s11 = sld [smem:[#allocation6 + $0x33]]  ;;  %s4904_s27 = smov 97   ;;  %vm372_vm12 = vcmask 15360  }
  0x6f   :  { %v892_v20 = vrot.slane %v885_v25, %v3482_v10  ;;  %v973_v38 = vcombine.low %v969_v32, %v970_v35  ;;  %v1489_v26 = vmul.f32 %v3569_v59, %v1488_v23  ;;  %v1490_v30 = vmul.f32 %v3582_v1, %v1488_v23 }
  0x70   :  { %v922_v37 = vrot.slane %v915_v31, %v3482_v10  ;;  %v1083_v41 = vstv %s3098_s24  ;;  %s3106_s24 = sld [smem:[#allocation6 + $0x23]]  ;;  %v1211_v4 = vrot.slane %v1204_v60, %v3482_v10  ;;  %vm401_vm13 = vcmask 23552  }
  0x71   :  { %631 = vrot.lane.b32.xlu0 %v630_v39, %s3368_s25  ;;  %1804 = vrot.lane.b32.xlu1 %v1803_v44, %s3344_s10  ;;  %s3090_s10 = sld [smem:[#allocation6 + $0x13]]  ;;  %v1026_v39 = vmul.f32 %v3529_v33, %v1025_v36  ;;  %v980_v42 = vrot.slane %v973_v38, %v3482_v10  ;;  %v1084_v44 = vmul.f32 %v3569_v59, %v1083_v41  ;;  %v1141_v46 = vstv %s3100_s12  ;;  %s3108_s12 = sld [smem:[#allocation6 + $0x25]] }
  0x72   :  { %v1142_v50 = vmul.f32 %v3515_v28, %v1141_v46  ;;  %v1493_v32 = vcombine.low %v1489_v26, %v1490_v30  ;;  %vm430_vm14 = vcmask 31744   ;;  %vm459_vm15 = vcmask 39936  }
  0x73   :  { %v793_v2 = vstv %s3088_s17  ;;  %s3373_s17 = smov 34   ;;  %v1030_v43 = vcombine.low %v1026_v39, %v1027_v40  ;;  %vm488_vm0 = vcmask 48128   ;;  %vm518_vm1 = vcmask 130048  }
  0x74   :  { %v798_v9 = vcombine.low %v793_v2, %v793_v2  ;;  %v1500_v38 = vrot.slane %v1493_v32, %v3482_v10  ;;  %vm547_vm2 = vcmask 138240   ;;  %vm576_vm3 = vcmask 146432  }
  0x75   :  { %660 = vrot.lane.b32.xlu0 %v659_v45, %s3369_s6  ;;  %v1085_v45 = vmul.f32 %v3582_v1, %v1083_v41  ;;  %v1037_v48 = vrot.slane %v1030_v43, %v3482_v10  ;;  %vm605_vm4 = vcmask 154624   ;;  %vm634_vm5 = vcmask 162816  }
  0x76   :  { %v805_v63 = vrot.slane %v798_v9, %v3482_v10  ;;  %v1316_v0 = vstv %s3106_s24  ;;  %s3114_s24 = sld [smem:[#allocation6 + $0x2b]]  ;;  %vm663_vm6 = vcmask 171008   ;;  %vm4909_vm7 = vcmask 392192  }
  0x77   :  { %v851_v14 = vstv %s3090_s10  ;;  %s3374_s10 = smov 35   ;;  %v1088_v49 = vcombine.low %v1084_v44, %v1085_v45  ;;  %v1317_v9 = vmul.f32 %v3592_v6, %v1316_v0  ;;  %v1318_v12 = vmul.f32 %v3595_v7, %v1316_v0 }
  0x78   :  { %v852_v11 = vmul.f32 %v3546_v47, %v851_v14  ;;  %v853_v15 = vmul.f32 %v3558_v52, %v851_v14  ;;  %v1372_v13 = vstv %s3108_s12  ;;  %s4910_s12 = smov 80   ;;  %vm692_vm8 = vcmask 179200  }
  0x79   :  { %689 = vrot.lane.b32.xlu0 %v688_v53, %s3370_s14  ;;  %v1143_v53 = vmul.f32 %v3518_v29, %v1141_v46  ;;  %v1095_v54 = vrot.slane %v1088_v49, %v3482_v10  ;;  %v1373_v8 = vmul.f32 %v3503_v22, %v1372_v13 }
  0x7a   :  { %v856_v18 = vcombine.low %v852_v11, %v853_v15  ;;  %v1374_v11 = vmul.f32 %v3512_v27, %v1372_v13 }
  0x7b   :  { %v1146_v55 = vcombine.low %v1142_v50, %v1143_v53 }
  0x7c   :  { %v863_v24 = vrot.slane %v856_v18, %v3482_v10  ;;  %v1377_v18 = vcombine.low %v1373_v8, %v1374_v11 }
  0x7d   :  { %719 = vrot.lane.b32.xlu0 %v718_v57, %s3371_s20  ;;  %v1153_v58 = vrot.slane %v1146_v55, %v3482_v10 }
  0x7e   :  { %v1384_v25 = vrot.slane %v1377_v18, %v3482_v10 }
  0x81   :  { %748 = vrot.lane.b32.xlu0 %v747_v62, %s3372_s15  ;;  %v1259_v62 = vmul.f32 %v3558_v52, %v1257_v51 }
  0x85   :  { %777 = vrot.lane.b32.xlu0 %v776_v5, %s3373_s17  ;;  %v1262_v5 = vcombine.low %v1258_v61, %v1259_v62 }
  0x87   :  { %v1269_v14 = vrot.slane %v1262_v5, %v3482_v10 }
  0x89   :  { %806 = vrot.lane.b32.xlu0 %v805_v63, %s3374_s10  ;;  %v1321_v63 = vcombine.low %v1317_v9, %v1318_v12 }
  0x8d   :  { %835 = vrot.lane.b32.xlu0 %v834_v17, %s3375_s19  ;;  %v1328_v17 = vrot.slane %v1321_v63, %v3482_v10 }
  0x91   :  { %864 = vrot.lane.b32.xlu0 %v863_v24, %s3376_s18 }
  0x95   :  { %893 = vrot.lane.b32.xlu0 %v892_v20, %s3377_s13  ;;  %v1545_v20 = vstv %s3114_s24  ;;  %s3124_s24 = sld [smem:[#allocation6 + $0x35]] }
  0x96   :  { %v1546_v35 = vmul.f32 %v3515_v28, %v1545_v20  ;;  %v1547_v36 = vmul.f32 %v3518_v29, %v1545_v20 }
  0x98   :  { %v1550_v39 = vcombine.low %v1546_v35, %v1547_v36 }
  0x99   :  { %923 = vrot.lane.b32.xlu0 %v922_v37, %s3378_s8 }
  0x9a   :  { %v1557_v43 = vrot.slane %v1550_v39, %v3482_v10 }
  0x9b   :  { %v1818_v56 = vstv %s3124_s24  ;;  %s3128_s24 = sld [smem:[#allocation6 + $0x39]] }
  0x9c   :  { %v1819_v60 = vmul.f32 %v3529_v33, %v1818_v56  ;;  %v1820_v61 = vmul.f32 %v3532_v34, %v1818_v56 }
  0x9d   :  { %981 = vrot.lane.b32.xlu0 %v980_v42, %s3379_s7  ;;  %v3794_v57 = vpop.permute.xlu0 %398 }
  0x9e   :  { %v1823_v5 = vcombine.low %v1819_v60, %v1820_v61 }
  0xa1   :  { %1038 = vrot.lane.b32.xlu0 %v1037_v48, %s4894_s5  ;;  %s3110_s5 = sld [smem:[#allocation6 + $0x27]]  ;;  %v1764_v48 = vstv %s3122_s11  ;;  %s3127_s11 = sld [smem:[#allocation6 + $0x38]] }
  0xa2   :  { %v1766_v55 = vmul.f32 %v3512_v27, %v1764_v48 }
  0xa3   :  { %v3800_v2 = vpop.permute.xlu0 %369 }
  0xa4   :  { %v371_v56 = vrot.slane %v3800_v2, 6 }
  0xa5   :  { %1096 = vrot.lane.b32.xlu0 %v1095_v54, %s4900_s28  ;;  %s4902_s28 = smov 84   ;;  %v1765_v54 = vmul.f32 %v3503_v22, %v1764_v48 }
  0xa7   :  { %v3810_v15 = vpop.permute.xlu0 %427  ;;  %v1430_v16 = vstv %s3110_s5  ;;  %s3116_s5 = sld [smem:[#allocation6 + $0x2d]] }
  0xa8   :  { %v1431_v19 = vmul.f32 %v3529_v33, %v1430_v16  ;;  %v1432_v21 = vmul.f32 %v3532_v34, %v1430_v16 }
  0xa9   :  { %1154 = vrot.lane.b32.xlu0 %v1153_v58, %s4897_s3  ;;  %s4898_s3 = smov 69   ;;  %v1769_v58 = vcombine.low %v1765_v54, %v1766_v55 }
  0xaa   :  { %v1435_v3 = vcombine.low %v1431_v19, %v1432_v21 }
  0xab   :  { %v3816_v24 = vpop.permute.xlu0 %456 }
  0xac   :  { %v1442_v31 = vrot.slane %v1435_v3, %v3482_v10 }
  0xad   :  { %1212 = vrot.lane.b32.xlu0 %v1211_v4, %s4899_s29  ;;  %s4901_s29 = smov 82   ;;  %v1603_v40 = vstv %s3116_s5  ;;  %s4906_s5 = smov 99   ;;  %v1776_v4 = vrot.slane %v1769_v58, %v3482_v10 }
  0xae   :  { %v1608_v44 = vcombine.low %v1603_v40, %v1603_v40 }
  0xaf   :  { %v3826_v37 = vpop.permute.xlu0 %485 }
  0xb0   :  { %v1615_v49 = vrot.slane %v1608_v44, %v3482_v10  ;;  %v341_v44 = vpop.permute.xlu1 %340 }
  0xb1   :  { %1270 = vrot.lane.b32.xlu0 %v1269_v14, %s4898_s3  ;;  %s3118_s3 = sld [smem:[#allocation6 + $0x2f]]  ;;  %v1830_v14 = vrot.slane %v1823_v5, %v3482_v10 }
  0xb3   :  { %v3830_v42 = vpop.permute.xlu0 %515 }
  0xb5   :  { %1329 = vrot.lane.b32.xlu0 %v1328_v17, %s4910_s12  ;;  %v1900_v17 = vstv %s3127_s11  ;;  %s3938_s11 = sld [smem:[#allocation6 + $0x3c]] }
  0xb6   :  { %v1901_v21 = vmul.f32 %v3592_v6, %v1900_v17  ;;  %v1902_v23 = vmul.f32 %v3595_v7, %v1900_v17 }
  0xb7   :  { %v1661_v41 = vstv %s3118_s3  ;;  %v3838_v53 = vpop.permute.xlu0 %544  ;;  %s3126_s3 = sld [smem:[#allocation6 + $0x37]] }
  0xb8   :  { %v1662_v45 = vmul.f32 %v3546_v47, %v1661_v41  ;;  %v1663_v46 = vmul.f32 %v3558_v52, %v1661_v41 }
  0xb9   :  { %1385 = vrot.lane.b32.xlu0 %v1384_v25, %s4901_s29  ;;  %s4907_s29 = smov 86   ;;  %v1927_v25 = vstv %s3128_s24  ;;  %s3399_s24 = smov 111  }
  0xba   :  { %v1666_v50 = vcombine.low %v1662_v45, %v1663_v46  ;;  %v1928_v32 = vmul.f32 %v3515_v28, %v1927_v25  ;;  %v1929_v35 = vmul.f32 %v3518_v29, %v1927_v25  ;;  %v342_v45 = vrot.slane %v341_v44, 6 }
  0xbb   :  { %v3846_v0 = vpop.permute.xlu0 %573 }
  0xbc   :  { %v1673_v51 = vrot.slane %v1666_v50, %v3482_v10  ;;  %v1932_v40 = vcombine.low %v1928_v32, %v1929_v35  ;;  %v575_v35 = vrot.slane %v3846_v0, 6 }
  0xbd   :  { %1443 = vrot.lane.b32.xlu0 %v1442_v31, %s4902_s28  ;;  %s3125_s28 = sld [smem:[#allocation6 + $0x36]]  ;;  %v1872_v13 = vstv %s3126_s3  ;;  %v1905_v31 = vcombine.low %v1901_v21, %v1902_v23  ;;  %v517_v23 = vrot.slane %v3830_v42, 6  ;;  %s3130_s3 = sld [smem:[#allocation6 + $0x3b]] }
  0xbe   :  { %v1873_v11 = vmul.f32 %v3569_v59, %v1872_v13  ;;  %v1874_v16 = vmul.f32 %v3582_v1, %v1872_v13  ;;  %v429_v13 = vrot.slane %v3810_v15, 6 }
  0xbf   :  { %v3854_v63 = vpop.permute.xlu0 %602  ;;  %v1912_v39 = vrot.slane %v1905_v31, %v3482_v10  ;;  %v3928_v31 = vpop.permute.xlu1 %952 }
  0xc0   :  { %v1877_v19 = vcombine.low %v1873_v11, %v1874_v16  ;;  %v458_v11 = vrot.slane %v3816_v24, 6 }
  0xc1   :  { %1501 = vrot.lane.b32.xlu0 %v1500_v38, %s4907_s29  ;;  %s3401_s29 = smov 109  }
  0xc2   :  { %v1884_v20 = vrot.slane %v1877_v19, %v3482_v10 }
  0xc3   :  { %v1845_v62 = vstv %s3125_s28  ;;  %s3129_s28 = sld [smem:[#allocation6 + $0x3a]] }
  0xc4   :  { %v1846_v9 = vmul.f32 %v3546_v47, %v1845_v62  ;;  %v1847_v12 = vmul.f32 %v3558_v52, %v1845_v62  ;;  %v400_v62 = vrot.slane %v3794_v57, 6 }
  0xc5   :  { %1558 = vrot.lane.b32.xlu0 %v1557_v43, %s4904_s27  ;;  %s4905_s27 = smov 101  }
  0xc6   :  { %v1850_v8 = vcombine.low %v1846_v9, %v1847_v12  ;;  %v402_v12 = vsel %vm401_vm13, %v400_v62, %v3794_v57  ;;  %v460_v57 = vsel %vm459_vm15, %v458_v11, %v3816_v24  ;;  %v519_v24 = vsel %vm518_vm1, %v517_v23, %v3830_v42 }
  0xc8   :  { %v1857_v18 = vrot.slane %v1850_v8, %v3482_v10 }
  0xc9   :  { %1616 = vrot.lane.b32.xlu0 %v1615_v49, %s4906_s5  ;;  %v1954_v38 = vstv %s3129_s28  ;;  %v1939_v49 = vrot.slane %v1932_v40, %v3482_v10  ;;  %s3950_s28 = sld [smem:[#allocation6 + $0x3d]]  ;;  %s3964_s5 = sld [smem:[#allocation6 + $0x3e]] }
  0xca   :  { %v1955_v41 = vmul.f32 %v3503_v22, %v1954_v38  ;;  %v1956_v43 = vmul.f32 %v3512_v27, %v1954_v38  ;;  %v3940_v38 = vpop.permute.xlu1 %1010 }
  0xcc   :  { %v1959_v50 = vcombine.low %v1955_v41, %v1956_v43 }
  0xcd   :  { %1674 = vrot.lane.b32.xlu0 %v1673_v51, %s4905_s27  ;;  %v344_v51 = vsel %vm343_vm11, %v342_v45, %v341_v44  ;;  %s3400_s27 = smov 110  }
  0xce   :  { %v1966_v61 = vrot.slane %v1959_v50, %v3482_v10  ;;  %v3957_v45 = vpop.permute.xlu1 %1067 }
  0xcf   :  { %v2062_v23 = vstv %s3964_s5  ;;  %s4010_s5 = sld [smem:[#allocation6 + $0x41]] }
  0xd1   :  { %1777 = vrot.lane.b32.xlu0 %v1776_v4, %s3345_s16  ;;  %s3392_s16 = smov 127   ;;  %v373_v4 = vsel %vm372_vm12, %v371_v56, %v3800_v2  ;;  %v431_v2 = vsel %vm430_vm14, %v429_v13, %v3810_v15 }
  0xd5   :  { %1831 = vrot.lane.b32.xlu0 %v1830_v14, %s3347_s21  ;;  %s3393_s21 = smov 126  }
  0xd7   :  { %v180_v3 = vpop.permute.xlu0 %179 }
  0xd8   :  { %v181_v30 = vrot.slane %v180_v3, 6 }
  0xd9   :  { %1858 = vrot.lane.b32.xlu0 %v1857_v18, %s3349_s26  ;;  %s3394_s26 = smov 125   ;;  %v487_v18 = vrot.slane %v3826_v37, 6 }
  0xda   :  { %v183_v36 = vsel %vm4920_vm9, %v181_v30, %v180_v3  ;;  %v546_v30 = vrot.slane %v3838_v53, 6 }
  0xdb   :  { %189 = vst.msk [vmem:[#allocation4] sm:$0x3f] %vm3863_vm10, %v183_v36  ;;  %v489_v15 = vsel %vm488_vm0, %v487_v18, %v3826_v37 }
  0xdc   :  { %v548_v32 = vsel %vm547_vm2, %v546_v30, %v3838_v53  ;;  %v604_v53 = vrot.slane %v3854_v63, 6 }
  0xdd   :  { %1885 = vrot.lane.b32.xlu0 %v1884_v20, %s3351_s0  ;;  %s3395_s0 = smov 124  }
  0xde   :  { %v606_v44 = vsel %vm605_vm4, %v604_v53, %v3854_v63 }
  0xdf   :  { %v193_v46 = vpop.permute.xlu0 %192 }
  0xe0   :  { %v194_v48 = vrot.slane %v193_v46, 6 }
  0xe1   :  { %1913 = vrot.lane.b32.xlu0 %v1912_v39, %s3353_s30  ;;  %s3396_s30 = smov 123   ;;  %v577_v39 = vsel %vm576_vm3, %v575_v35, %v3846_v0 }
  0xe2   :  { %v308_v54 = vld [vmem:[#allocation4] sm:$0x3f]  ;;  %v195_v55 = vsel %vm4920_vm9, %v194_v48, %v193_v46  ;;  %v1981_v48 = vstv %s3130_s3  ;;  %s3974_s3 = sld [smem:[#allocation6 + $0x3f]] }
  0xe3   :  { %198 = vst.msk [vmem:[#allocation4 + $0x6] sm:$0x3f] %vm3863_vm10, %v195_v55  ;;  %v3885_v58 = vpop.permute.xlu0 %631  ;;  %v346_v60 = vmul.f32 %v344_v51, %v308_v54  ;;  %v375_v9 = vmul.f32 %v373_v4, %v308_v54  ;;  %v404_v8 = vmul.f32 %v402_v12, %v308_v54  ;;  %v433_v17 = vmul.f32 %v431_v2, %v308_v54  ;;  %v3920_v26 = vld [vmem:[#allocation4] sm:$0x3f] }
  0xe4   :  { %v462_v21 = vmul.f32 %v460_v57, %v308_v54  ;;  %v491_v3 = vmul.f32 %v489_v15, %v308_v54  ;;  %v521_v37 = vmul.f32 %v519_v24, %v3920_v26  ;;  %v550_v42 = vmul.f32 %v548_v32, %v3920_v26  ;;  %v3980_v13 = vld [vmem:[#allocation4] sm:$0x3f] }
  0xe5   :  { %1940 = vrot.lane.b32.xlu0 %v1939_v49, %s3355_s4  ;;  %348 = vrot.lane.b32.xlu1 %v346_v60, %s3392_s16  ;;  %s3397_s4 = smov 122   ;;  %v579_v41 = vmul.f32 %v577_v39, %v3920_v26  ;;  %v633_v43 = vrot.slane %v3885_v58, 6  ;;  %v608_v46 = vmul.f32 %v606_v44, %v3920_v26  ;;  %v2008_v54 = vstv %s3938_s11  ;;  %s4908_s11 = smov 108  }
  0xe6   :  { %v1986_v55 = vcombine.low %v1981_v48, %v1981_v48  ;;  %v2009_v60 = vmul.f32 %v3529_v33, %v2008_v54  ;;  %v2035_v4 = vstv %s3950_s28  ;;  %s3994_s28 = sld [smem:[#allocation6 + $0x40]]  ;;  %vm4912_vm10 = vcmask 261120  }
  0xe7   :  { %v3893_v5 = vpop.permute.xlu0 %660  ;;  %v635_v49 = vsel %vm634_vm5, %v633_v43, %v3885_v58  ;;  %v2010_v58 = vmul.f32 %v3532_v34, %v2008_v54  ;;  %v2036_v57 = vmul.f32 %v3546_v47, %v2035_v4  ;;  %v2037_v15 = vmul.f32 %v3558_v52, %v2035_v4 }
  0xe8   :  { %v662_v50 = vrot.slane %v3893_v5, 6  ;;  %v637_v51 = vmul.f32 %v635_v49, %v3920_v26  ;;  %v1993_v11 = vrot.slane %v1986_v55, %v3482_v10  ;;  %v2064_v32 = vmul.f32 %v3582_v1, %v2062_v23 }
  0xe9   :  { %1967 = vrot.lane.b32.xlu0 %v1966_v61, %s3357_s1  ;;  %377 = vrot.lane.b32.xlu1 %v375_v9, %s3393_s21  ;;  %s3398_s1 = smov 112   ;;  %v3976_v9 = vpop.permute.xlu1 %1126  ;;  %v2040_v39 = vcombine.low %v2036_v57, %v2037_v15  ;;  %v2090_v53 = vstv %s3974_s3  ;;  %s4041_s3 = sld [smem:[#allocation6 + $0x42]] }
  0xea   :  { %v664_v61 = vsel %vm663_vm6, %v662_v50, %v3893_v5  ;;  %v2092_v44 = vmul.f32 %v3595_v7, %v2090_v53 }
  0xeb   :  { %v3900_v14 = vpop.permute.xlu0 %689  ;;  %v666_v2 = vmul.f32 %v664_v61, %v3920_v26  ;;  %v2047_v50 = vrot.slane %v2040_v39, %v3482_v10 }
  0xec   :  { %v691_v62 = vrot.slane %v3900_v14, 6  ;;  %v2117_v54 = vstv %s3994_s28  ;;  %s3406_s28 = smov 94  }
  0xed   :  { %406 = vrot.lane.b32.xlu1 %v404_v8, %s3394_s26  ;;  %v3999_v24 = vpop.permute.xlu1 %1183  ;;  %v2119_v61 = vmul.f32 %v3518_v29, %v2117_v54 }
  0xee   :  { %v693_v18 = vsel %vm692_vm8, %v691_v62, %v3900_v14  ;;  %v2144_v62 = vstv %s4010_s5  ;;  %s4071_s5 = sld [smem:[#allocation6 + $0x45]] }
  0xef   :  { %v3906_v16 = vpop.permute.xlu0 %719  ;;  %v695_v14 = vmul.f32 %v693_v18, %v3920_v26  ;;  %v4013_v26 = vld [vmem:[#allocation4] sm:$0x3f] }
  0xf1   :  { %435 = vrot.lane.b32.xlu1 %v433_v17, %s3395_s0  ;;  %v2013_v17 = vcombine.low %v2009_v60, %v2010_v58 }
  0xf3   :  { %v3912_v19 = vpop.permute.xlu0 %748  ;;  %v2020_v30 = vrot.slane %v2013_v17, %v3482_v10 }
  0xf5   :  { %464 = vrot.lane.b32.xlu1 %v462_v21, %s3396_s30  ;;  %v721_v21 = vrot.slane %v3906_v16, 6 }
  0xf7   :  { %v3918_v25 = vpop.permute.xlu0 %777  ;;  %v723_v35 = vsel %vm4912_vm10, %v721_v21, %v3906_v16  ;;  %v2091_v16 = vmul.f32 %v3592_v6, %v2090_v53  ;;  %vm4914_vm10 = vcmask 277504  }
  0xf8   :  { %v779_v48 = vrot.slane %v3918_v25, 6 }
  0xf9   :  { %493 = vrot.lane.b32.xlu1 %v491_v3, %s3397_s4 }
  0xfa   :  { %v781_v60 = vsel %vm4914_vm10, %v779_v48, %v3918_v25  ;;  %vm4916_vm10 = vcmask 293888  }
  0xfb   :  { %v3926_v20 = vpop.permute.xlu0 %806  ;;  %v783_v25 = vmul.f32 %v781_v60, %v4013_v26  ;;  %v2252_v60 = vstv %s4071_s5  ;;  %s4115_s5 = sld [smem:[#allocation6 + $0x48]] }
  0xfc   :  { %v808_v58 = vrot.slane %v3926_v20, 6 }
  0xfd   :  { %523 = vrot.lane.b32.xlu1 %v521_v37, %s3398_s1  ;;  %v2063_v37 = vmul.f32 %v3569_v59, %v2062_v23 }
  0xff   :  { %v3935_v36 = vpop.permute.xlu0 %835  ;;  %v2067_v43 = vcombine.low %v2063_v37, %v2064_v32 }
 0x100   :  { %v837_v17 = vrot.slane %v3935_v36, 6 }
 0x101   :  { %552 = vrot.lane.b32.xlu1 %v550_v42, %s3399_s24  ;;  %v750_v42 = vrot.slane %v3912_v19, 6 }
 0x103   :  { %v3946_v40 = vpop.permute.xlu0 %864 }
 0x104   :  { %v866_v23 = vrot.slane %v3946_v40, 6 }
 0x105   :  { %581 = vrot.lane.b32.xlu1 %v579_v41, %s3400_s27  ;;  %v725_v41 = vmul.f32 %v723_v35, %v4013_v26  ;;  %v2171_v35 = vstv %s4041_s3  ;;  %s3408_s3 = smov 92  }
 0x107   :  { %v3955_v0 = vpop.permute.xlu0 %893 }
 0x109   :  { %610 = vrot.lane.b32.xlu1 %v608_v46, %s3401_s29 }
 0x10b   :  { %v924_v63 = vpop.permute.xlu0 %923 }
 0x10c   :  { %v925_v56 = vrot.slane %v924_v63, 6 }
 0x10d   :  { %639 = vrot.lane.b32.xlu1 %v637_v51, %s4908_s11  ;;  %s3403_s11 = smov 107   ;;  %v2118_v51 = vmul.f32 %v3515_v28, %v2117_v54 }
 0x10e   :  { %v927_v12 = vsel %vm4909_vm7, %v925_v56, %v924_v63  ;;  %vm4913_vm7 = vcmask 269312   ;;  %v4026_v63 = vpop.permute.xlu1 %1241  ;;  %v2074_v56 = vrot.slane %v2067_v43, %v3482_v10  ;;  %v895_v43 = vrot.slane %v3955_v0, 6 }
 0x10f   :  { %v3982_v8 = vpop.permute.xlu0 %981  ;;  %v929_v5 = vmul.f32 %v927_v12, %v3980_v13  ;;  %v752_v46 = vsel %vm4913_vm7, %v750_v42, %v3912_v19  ;;  %v2095_v19 = vcombine.low %v2091_v16, %v2092_v44  ;;  %vm4915_vm7 = vcmask 285696  }
 0x110   :  { %v754_v55 = vmul.f32 %v752_v46, %v4013_v26  ;;  %v2122_v18 = vcombine.low %v2118_v51, %v2119_v61  ;;  %v2176_v16 = vcombine.low %v2171_v35, %v2171_v35  ;;  %v954_v46 = vrot.slane %v3928_v31, 6 }
 0x111   :  { %931 = vrot.lane.b32.xlu0 %v929_v5, %s4910_s12  ;;  %668 = vrot.lane.b32.xlu1 %v666_v2, %s3403_s11  ;;  %s3404_s12 = smov 106   ;;  %v2145_v5 = vmul.f32 %v3503_v22, %v2144_v62  ;;  %v2146_v2 = vmul.f32 %v3512_v27, %v2144_v62  ;;  %v2102_v57 = vrot.slane %v2095_v19, %v3482_v10 }
 0x112   :  { %v4045_v12 = vpop.permute.xlu1 %1299  ;;  %v2183_v51 = vrot.slane %v2176_v16, %v3482_v10  ;;  %v1069_v16 = vrot.slane %v3957_v45, 6 }
 0x113   :  { %v3997_v3 = vpop.permute.xlu0 %1038  ;;  %v2149_v15 = vcombine.low %v2145_v5, %v2146_v2  ;;  %v2253_v2 = vmul.f32 %v3569_v59, %v2252_v60 }
 0x115   :  { %1994 = vrot.lane.b32.xlu0 %v1993_v11, %s3359_s9  ;;  %697 = vrot.lane.b32.xlu1 %v695_v14, %s3404_s12  ;;  %s4038_s9 = sld [smem:[#allocation6 + $0x43]]  ;;  %v810_v11 = vsel %vm4915_vm7, %v808_v58, %v3926_v20  ;;  %v839_v20 = vsel %vm4916_vm10, %v837_v17, %v3935_v36  ;;  %vm4917_vm7 = vcmask 302080   ;;  %v2156_v42 = vrot.slane %v2149_v15, %v3482_v10 }
 0x116   :  { %v812_v21 = vmul.f32 %v810_v11, %v4013_v26  ;;  %v4067_v32 = vpop.permute.xlu1 %1356  ;;  %v841_v36 = vmul.f32 %v839_v20, %v4013_v26  ;;  %vm4919_vm10 = vcmask 310272   ;;  %v2254_v11 = vmul.f32 %v3582_v1, %v2252_v60 }
 0x117   :  { %v4021_v49 = vpop.permute.xlu0 %1096  ;;  %v897_v19 = vsel %vm4919_vm10, %v895_v43, %v3955_v0  ;;  %v983_v0 = vrot.slane %v3982_v8, 6  ;;  %vm4921_vm10 = vcmask 424960  }
 0x118   :  { %v899_v61 = vmul.f32 %v897_v19, %v4013_v26 }
 0x119   :  { %2021 = vrot.lane.b32.xlu0 %v2020_v30, %s3368_s25  ;;  %727 = vrot.lane.b32.xlu1 %v725_v41, %s3364_s23  ;;  %s3405_s25 = smov 95   ;;  %v2129_v30 = vrot.slane %v2122_v18, %v3482_v10  ;;  %v868_v41 = vsel %vm4917_vm7, %v866_v23, %v3946_v40  ;;  %vm4918_vm7 = vcmask 400384   ;;  %v2257_v23 = vcombine.low %v2253_v2, %v2254_v11 }
 0x11a   :  { %v870_v40 = vmul.f32 %v868_v41, %v4013_v26  ;;  %v956_v58 = vsel %vm4918_vm7, %v954_v46, %v3928_v31  ;;  %vm4928_vm7 = vcmask 408576   ;;  %v1012_v31 = vrot.slane %v3940_v38, 6 }
 0x11b   :  { %v4043_v4 = vpop.permute.xlu0 %1154  ;;  %v2198_v37 = vstv %s4038_s9  ;;  %s4082_s9 = sld [smem:[#allocation6 + $0x46]]  ;;  %v958_v26 = vmul.f32 %v956_v58, %v3980_v13  ;;  %v985_v15 = vsel %vm4928_vm7, %v983_v0, %v3982_v8  ;;  %v1098_v58 = vrot.slane %v4021_v49, 6 }
 0x11c   :  { %v2199_v39 = vmul.f32 %v3529_v33, %v2198_v37  ;;  %v2200_v53 = vmul.f32 %v3532_v34, %v2198_v37  ;;  %v1013_v35 = vsel %vm4920_vm9, %v1012_v31, %v3940_v38  ;;  %v2334_v38 = vstv %s4115_s5  ;;  %s4922_s5 = smov 77  }
 0x11d   :  { %2048 = vrot.lane.b32.xlu0 %v2047_v50, %s3369_s6  ;;  %756 = vrot.lane.b32.xlu1 %v754_v55, %s3405_s25  ;;  %s4055_s6 = sld [smem:[#allocation6 + $0x44]]  ;;  %v4088_v50 = vpop.permute.xlu1 %1414  ;;  %vm4923_vm9 = vcmask 433152   ;;  %v1015_v46 = vmul.f32 %v1013_v35, %v3980_v13  ;;  %v2336_v19 = vmul.f32 %v3512_v27, %v2334_v38  ;;  %vm4931_vm7 = vcmask 556032  }
 0x11e   :  { %v2203_v54 = vcombine.low %v2199_v39, %v2200_v53  ;;  %v1040_v39 = vrot.slane %v3997_v3, 6  ;;  %v2264_v53 = vrot.slane %v2257_v23, %v3482_v10 }
 0x11f   :  { %v4062_v14 = vpop.permute.xlu0 %1212 }
 0x120   :  { %v2210_v62 = vrot.slane %v2203_v54, %v3482_v10 }
 0x121   :  { %2075 = vrot.lane.b32.xlu0 %v2074_v56, %s3370_s14  ;;  %785 = vrot.lane.b32.xlu1 %v783_v25, %s3406_s28  ;;  %s3407_s14 = smov 93   ;;  %v2280_v17 = vstv %s4082_s9  ;;  %s3412_s9 = smov 78  }
 0x122   :  { %v2281_v18 = vmul.f32 %v3592_v6, %v2280_v17 }
 0x123   :  { %v2225_v44 = vstv %s4055_s6  ;;  %v4086_v48 = vpop.permute.xlu0 %1270  ;;  %s4099_s6 = sld [smem:[#allocation6 + $0x47]] }
 0x124   :  { %v2226_v55 = vmul.f32 %v3546_v47, %v2225_v44  ;;  %v2227_v56 = vmul.f32 %v3558_v52, %v2225_v44 }
 0x125   :  { %2103 = vrot.lane.b32.xlu0 %v2102_v57, %s3371_s20  ;;  %814 = vrot.lane.b32.xlu1 %v812_v21, %s3407_s14  ;;  %v4112_v57 = vpop.permute.xlu1 %1472  ;;  %v2282_v21 = vmul.f32 %v3595_v7, %v2280_v17 }
 0x126   :  { %v2230_v25 = vcombine.low %v2226_v55, %v2227_v56  ;;  %v2335_v56 = vmul.f32 %v3503_v22, %v2334_v38 }
 0x127   :  { %v4106_v5 = vpop.permute.xlu0 %1329  ;;  %v2285_v8 = vcombine.low %v2281_v18, %v2282_v21 }
 0x128   :  { %v2237_v20 = vrot.slane %v2230_v25, %v3482_v10 }
 0x129   :  { %2130 = vrot.lane.b32.xlu0 %v2129_v30, %s3372_s15  ;;  %843 = vrot.lane.b32.xlu1 %v841_v36, %s3408_s3  ;;  %s3409_s15 = smov 91   ;;  %v2307_v30 = vstv %s4099_s6  ;;  %v4131_v36 = vpop.permute.xlu1 %1531  ;;  %s4143_s6 = sld [smem:[#allocation6 + $0x49]]  ;;  %v2292_v44 = vrot.slane %v2285_v8, %v3482_v10  ;;  %v1156_v8 = vrot.slane %v4043_v4, 6 }
 0x12a   :  { %v2308_v41 = vmul.f32 %v3515_v28, %v2307_v30  ;;  %v2309_v43 = vmul.f32 %v3518_v29, %v2307_v30 }
 0x12b   :  { %v4127_v37 = vpop.permute.xlu0 %1385 }
 0x12c   :  { %v2312_v55 = vcombine.low %v2308_v41, %v2309_v43  ;;  %v4197_v41 = vld [vmem:[#allocation4] sm:$0x3f] }
 0x12d   :  { %2157 = vrot.lane.b32.xlu0 %v2156_v42, %s3373_s17  ;;  %872 = vrot.lane.b32.xlu1 %v870_v40, %s3409_s15  ;;  %s4934_s17 = smov 90   ;;  %v987_v42 = vmul.f32 %v985_v15, %v3980_v13  ;;  %v1042_v40 = vsel %vm4921_vm10, %v1040_v39, %v3997_v3  ;;  %v1071_v3 = vsel %vm4923_vm9, %v1069_v16, %v3957_v45  ;;  %vm4924_vm10 = vcmask 441344  }
 0x12e   :  { %v1044_v60 = vmul.f32 %v1042_v40, %v3980_v13  ;;  %v1128_v45 = vrot.slane %v3976_v9, 6  ;;  %v1073_v17 = vmul.f32 %v1071_v3, %v3980_v13  ;;  %v1100_v18 = vsel %vm4924_vm10, %v1098_v58, %v4021_v49 }
 0x12f   :  { %v4150_v54 = vpop.permute.xlu0 %1443  ;;  %v2361_v0 = vstv %s4143_s6  ;;  %vm4925_vm9 = vcmask 523264   ;;  %s4926_s6 = smov 75   ;;  %v1102_v23 = vmul.f32 %v1100_v18, %v3980_v13  ;;  %vm4927_vm10 = vcmask 531456  }
 0x130   :  { %v2366_v15 = vcombine.low %v2361_v0, %v2361_v0 }
 0x131   :  { %2184 = vrot.lane.b32.xlu0 %v2183_v51, %s3374_s10  ;;  %901 = vrot.lane.b32.xlu1 %v899_v61, %s4934_s17  ;;  %s4929_s10 = smov 79   ;;  %v4157_v51 = vpop.permute.xlu1 %1587  ;;  %v2319_v61 = vrot.slane %v2312_v55, %v3482_v10  ;;  %s3421_s17 = smov 59  }
 0x133   :  { %v4171_v2 = vpop.permute.xlu0 %1501 }
 0x135   :  { %2211 = vrot.lane.b32.xlu0 %v2210_v62, %s3375_s19  ;;  %960 = vrot.lane.b32.xlu1 %v958_v26, %s4929_s10  ;;  %s4139_s19 = sld [smem:[#allocation6 + $0x4a]]  ;;  %v2339_v62 = vcombine.low %v2335_v56, %v2336_v19  ;;  %v4174_v11 = vpop.permute.xlu1 %1645  ;;  %s4245_s10 = sld [smem:[#allocation6 + $0x50]] }
 0x137   :  { %v2346_v21 = vrot.slane %v2339_v62, %v3482_v10  ;;  %v4193_v39 = vpop.permute.xlu0 %1558  ;;  %v1214_v62 = vrot.slane %v4062_v14, 6 }
 0x139   :  { %2238 = vrot.lane.b32.xlu0 %v2237_v20, %s3376_s18  ;;  %989 = vrot.lane.b32.xlu1 %v987_v42, %s3412_s9  ;;  %s4155_s18 = sld [smem:[#allocation6 + $0x4b]]  ;;  %v1130_v42 = vsel %vm4925_vm9, %v1128_v45, %v3976_v9  ;;  %v4199_v13 = vpop.permute.xlu1 %1703  ;;  %v1185_v9 = vrot.slane %v3999_v24, 6  ;;  %vm4930_vm9 = vcmask 539648  }
 0x13a   :  { %v1132_v16 = vmul.f32 %v1130_v42, %v4197_v41 }
 0x13b   :  { %v2388_v25 = vstv %s4139_s19  ;;  %s4184_s19 = sld [smem:[#allocation6 + $0x4d]]  ;;  %v4219_v3 = vpop.permute.xlu0 %1616 }
 0x13c   :  { %v2389_v31 = vmul.f32 %v3529_v33, %v2388_v25  ;;  %v2390_v26 = vmul.f32 %v3532_v34, %v2388_v25 }
 0x13d   :  { %2265 = vrot.lane.b32.xlu0 %v2264_v53, %s3377_s13  ;;  %1017 = vrot.lane.b32.xlu1 %v1015_v46, %s4922_s5  ;;  %s3414_s13 = smov 76   ;;  %s4169_s5 = sld [smem:[#allocation6 + $0x4c]]  ;;  %v2373_v53 = vrot.slane %v2366_v15, %v3482_v10  ;;  %v1158_v46 = vsel %vm4927_vm10, %v1156_v8, %v4043_v4  ;;  %v4214_v19 = vpop.permute.xlu1 %1750  ;;  %vm4936_vm10 = vcmask 547840   ;;  %v1272_v8 = vrot.slane %v4086_v48, 6 }
 0x13e   :  { %v2393_v30 = vcombine.low %v2389_v31, %v2390_v26  ;;  %v1216_v18 = vsel %vm4936_vm10, %v1214_v62, %v4062_v14  ;;  %vm1388_vm10 = vcmask 670720  }
 0x13f   :  { %v2415_v20 = vstv %s4155_s18  ;;  %s4203_s18 = sld [smem:[#allocation6 + $0x4e]]  ;;  %v1218_v42 = vmul.f32 %v1216_v18, %v4197_v41  ;;  %v4287_v18 = vld [vmem:[#allocation4] sm:$0x3f] }
 0x140   :  { %v2416_v35 = vmul.f32 %v3546_v47, %v2415_v20  ;;  %v2417_v49 = vmul.f32 %v3558_v52, %v2415_v20  ;;  %v2400_v38 = vrot.slane %v2393_v30, %v3482_v10 }
 0x141   :  { %2293 = vrot.lane.b32.xlu0 %v2292_v44, %s3378_s8  ;;  %1046 = vrot.lane.b32.xlu1 %v1044_v60, %s3414_s13  ;;  %v2470_v56 = vstv %s4184_s19  ;;  %v1160_v60 = vmul.f32 %v1158_v46, %v4197_v41  ;;  %s4988_s19 = smov 52   ;;  %v4232_v31 = vpop.permute.xlu1 %1804 }
 0x142   :  { %v2420_v44 = vcombine.low %v2416_v35, %v2417_v49  ;;  %v2471_v4 = vmul.f32 %v3592_v6, %v2470_v56  ;;  %v2472_v58 = vmul.f32 %v3595_v7, %v2470_v56  ;;  %v2551_v56 = vstv %s4245_s10  ;;  %s4992_s10 = smov 66  }
 0x143   :  { %v2442_v43 = vstv %s4169_s5  ;;  %s4987_s5 = smov 64  }
 0x144   :  { %v2443_v40 = vmul.f32 %v3569_v59, %v2442_v43  ;;  %v2444_v55 = vmul.f32 %v3582_v1, %v2442_v43  ;;  %v2427_v25 = vrot.slane %v2420_v44, %v3482_v10  ;;  %v2475_v26 = vcombine.low %v2471_v4, %v2472_v58 }
 0x145   :  { %2320 = vrot.lane.b32.xlu0 %v2319_v61, %s3348_s22  ;;  %1075 = vrot.lane.b32.xlu1 %v1073_v17, %s4926_s6  ;;  %s3416_s22 = smov 74   ;;  %s4217_s6 = sld [smem:[#allocation6 + $0x4f]]  ;;  %v1187_v61 = vsel %vm4930_vm9, %v1185_v9, %v3999_v24  ;;  %v2497_v45 = vstv %s4203_s18  ;;  %v1243_v17 = vrot.slane %v4026_v63, 6  ;;  %vm4933_vm9 = vcmask 564224  }
 0x146   :  { %v2447_v0 = vcombine.low %v2443_v40, %v2444_v55  ;;  %v1189_v24 = vmul.f32 %v1187_v61, %v4197_v41  ;;  %v2498_v20 = vmul.f32 %v3515_v28, %v2497_v45  ;;  %s4932_s18 = smov 62   ;;  %v2482_v49 = vrot.slane %v2475_v26, %v3482_v10 }
 0x147   :  { %v1245_v35 = vsel %vm4931_vm7, %v1243_v17, %v4026_v63  ;;  %v1301_v44 = vrot.slane %v4045_v12, 6  ;;  %v1274_v46 = vsel %vm4933_vm9, %v1272_v8, %v4086_v48  ;;  %vm4935_vm7 = vcmask 572416  }
 0x148   :  { %v2454_v15 = vrot.slane %v2447_v0, %v3482_v10  ;;  %v1276_v4 = vmul.f32 %v1274_v46, %v4197_v41  ;;  %v1331_v61 = vrot.slane %v4106_v5, 6  ;;  %vm934_vm9 = vcmask 654336  }
 0x149   :  { %2347 = vrot.lane.b32.xlu0 %v2346_v21, %s3379_s7  ;;  %1104 = vrot.lane.b32.xlu1 %v1102_v23, %s3416_s22  ;;  %s4986_s7 = smov 51   ;;  %v4237_v21 = vpop.permute.xlu0 %1674  ;;  %v2499_v23 = vmul.f32 %v3518_v29, %v2497_v45  ;;  %v1303_v58 = vsel %vm4935_vm7, %v1301_v44, %v4045_v12  ;;  %v1752_v0 = vrot.slane %v4214_v19, 6  ;;  %v1358_v12 = vrot.slane %v4067_v32, 6 }
 0x14a   :  { %v1305_v17 = vmul.f32 %v1303_v58, %v4197_v41  ;;  %vm1359_vm7 = vcmask 662528   ;;  %v1806_v8 = vrot.slane %v4232_v31, 6 }
 0x14b   :  { %v2524_v30 = vstv %s4217_s6  ;;  %s3419_s6 = smov 61  }
 0x14c   :  { %v2525_v43 = vmul.f32 %v3503_v22, %v2524_v30  ;;  %v2526_v9 = vmul.f32 %v3512_v27, %v2524_v30 }
 0x14d   :  { %2374 = vrot.lane.b32.xlu0 %v2373_v53, %s4986_s7  ;;  %1134 = vrot.lane.b32.xlu1 %v1132_v16, %s4987_s5  ;;  %s3417_s7 = smov 63   ;;  %v2502_v53 = vcombine.low %v2498_v20, %v2499_v23  ;;  %v1778_v63 = vpop.permute.xlu0 %1777  ;;  %v1247_v16 = vmul.f32 %v1245_v35, %v4197_v41  ;;  %v4289_v20 = vld [vmem:[#allocation4 + $0x6] sm:$0x3f]  ;;  %v1753_v41 = vsel %vm343_vm11, %v1752_v0, %v4214_v19  ;;  %vm1417_vm11 = vcmask 678912  }
 0x14e   :  { %v2529_v55 = vcombine.low %v2525_v43, %v2526_v9  ;;  %v1779_v30 = vrot.slane %v1778_v63, 6  ;;  %v1360_v35 = vsel %vm1359_vm7, %v1358_v12, %v4067_v32  ;;  %v1416_v9 = vrot.slane %v4088_v50, 6 }
 0x14f   :  { %v2509_v40 = vrot.slane %v2502_v53, %v3482_v10  ;;  %v1362_v43 = vmul.f32 %v1360_v35, %v4287_v18 }
 0x150   :  { %v2536_v62 = vrot.slane %v2529_v55, %v3482_v10  ;;  %v1780_v19 = vsel %vm372_vm12, %v1779_v30, %v1778_v63  ;;  %v1807_v63 = vsel %vm401_vm13, %v1806_v8, %v4232_v31  ;;  %vm1446_vm12 = vcmask 687104  }
 0x151   :  { %2401 = vrot.lane.b32.xlu0 %v2400_v38, %s4988_s19  ;;  %1162 = vrot.lane.b32.xlu1 %v1160_v60, %s3417_s7  ;;  %s4989_s19 = smov 53   ;;  %v1832_v48 = vpop.permute.xlu0 %1831  ;;  %v1782_v44 = vmul.f32 %v1780_v19, %v4289_v20  ;;  %vm1475_vm13 = vcmask 695296  }
 0x155   :  { %2428 = vrot.lane.b32.xlu0 %v2427_v25, %s4989_s19  ;;  %1191 = vrot.lane.b32.xlu1 %v1189_v24, %s4932_s18  ;;  %s4990_s19 = smov 54   ;;  %s4991_s18 = smov 65   ;;  %v2556_v25 = vcombine.low %v2551_v56, %v2551_v56  ;;  %v1332_v24 = vsel %vm934_vm9, %v1331_v61, %v4106_v5  ;;  %v1445_v56 = vrot.slane %v4150_v54, 6 }
 0x156   :  { %v1334_v23 = vmul.f32 %v1332_v24, %v4287_v18 }
 0x157   :  { %v4249_v14 = vpop.permute.xlu1 %348  ;;  %v2563_v26 = vrot.slane %v2556_v25, %v3482_v10  ;;  %v1447_v0 = vsel %vm1446_vm12, %v1445_v56, %v4150_v54  ;;  %v1503_v54 = vrot.slane %v4171_v2, 6 }
 0x158   :  { %v1449_v12 = vmul.f32 %v1447_v0, %v4287_v18 }
 0x159   :  { %2455 = vrot.lane.b32.xlu0 %v2454_v15, %s4990_s19  ;;  %1220 = vrot.lane.b32.xlu1 %v1218_v42, %s3419_s6  ;;  %s3420_s19 = smov 60   ;;  %v1859_v15 = vpop.permute.xlu0 %1858  ;;  %v1755_v42 = vmul.f32 %v1753_v41, %v4289_v20 }
 0x15b   :  { %v4258_v38 = vpop.permute.xlu1 %377 }
 0x15d   :  { %2483 = vrot.lane.b32.xlu0 %v2482_v49, %s4987_s5  ;;  %1249 = vrot.lane.b32.xlu1 %v1247_v16, %s3420_s19  ;;  %v1387_v49 = vrot.slane %v4127_v37, 6  ;;  %v1886_v16 = vpop.permute.xlu0 %1885 }
 0x15e   :  { %v1887_v24 = vrot.slane %v1886_v16, 6 }
 0x15f   :  { %v4268_v60 = vpop.permute.xlu1 %406  ;;  %v1389_v32 = vsel %vm1388_vm10, %v1387_v49, %v4127_v37  ;;  %v1418_v37 = vsel %vm1417_vm11, %v1416_v9, %v4088_v50  ;;  %v1474_v50 = vrot.slane %v4112_v57, 6 }
 0x160   :  { %v1391_v46 = vmul.f32 %v1389_v32, %v4287_v18  ;;  %v1420_v31 = vmul.f32 %v1418_v37, %v4287_v18  ;;  %v1888_v35 = vsel %vm488_vm0, %v1887_v24, %v1886_v16  ;;  %vm4938_vm0 = vcmask 793600  }
 0x161   :  { %2510 = vrot.lane.b32.xlu0 %v2509_v40, %s4991_s18  ;;  %1278 = vrot.lane.b32.xlu1 %v1276_v4, %s3421_s17  ;;  %s3422_s18 = smov 58   ;;  %v1833_v40 = vrot.slane %v1832_v48, 6  ;;  %v1809_v4 = vmul.f32 %v1807_v63, %v4289_v20  ;;  %v1914_v58 = vpop.permute.xlu0 %1913  ;;  %v1476_v41 = vsel %vm1475_vm13, %v1474_v50, %v4112_v57  ;;  %v1533_v57 = vrot.slane %v4131_v36, 6 }
 0x162   :  { %v1915_v49 = vrot.slane %v1914_v58, 6  ;;  %v1890_v19 = vmul.f32 %v1888_v35, %v4289_v20  ;;  %v1560_v63 = vrot.slane %v4193_v39, 6 }
 0x163   :  { %v4278_v45 = vpop.permute.xlu1 %435  ;;  %v1834_v61 = vsel %vm430_vm14, %v1833_v40, %v1832_v48  ;;  %vm4940_vm14 = vcmask 703488  }
 0x164   :  { %v1505_v8 = vsel %vm4940_vm14, %v1503_v54, %v4171_v2  ;;  %v1916_v32 = vsel %vm518_vm1, %v1915_v49, %v1914_v58  ;;  %vm4939_vm1 = vcmask 801792   ;;  %v1618_v54 = vrot.slane %v4219_v3, 6 }
 0x165   :  { %2537 = vrot.lane.b32.xlu0 %v2536_v62, %s4992_s10  ;;  %1307 = vrot.lane.b32.xlu1 %v1305_v17, %s3422_s18  ;;  %s4993_s10 = smov 67   ;;  %v1860_v62 = vrot.slane %v1859_v15, 6  ;;  %v1836_v17 = vmul.f32 %v1834_v61, %v4289_v20  ;;  %v1507_v9 = vmul.f32 %v1505_v8, %v4287_v18  ;;  %v1562_v61 = vsel %vm4938_vm0, %v1560_v63, %v4193_v39 }
 0x166   :  { %vm4942_vm0 = vcmask 818176   ;;  %vm351_vm14 = vcmask 1039360   ;;  %v379_v63 = vrot.slane %v4258_v38, 2 }
 0x167   :  { %v4294_v5 = vpop.permute.xlu1 %464  ;;  %v1861_v48 = vsel %vm459_vm15, %v1860_v62, %v1859_v15  ;;  %v1478_v15 = vmul.f32 %v1476_v41, %v4287_v18  ;;  %vm730_vm15 = vcmask 785408   ;;  %v4368_v18 = vld [vmem:[#allocation4] sm:$0x3f] }
 0x168   :  { %v1863_v30 = vmul.f32 %v1861_v48, %v4289_v20  ;;  %v1534_v2 = vsel %vm730_vm15, %v1533_v57, %v4131_v36 }
 0x169   :  { %2564 = vrot.lane.b32.xlu0 %v2563_v26, %s4993_s10  ;;  %1336 = vrot.lane.b32.xlu1 %v1334_v23, %s3378_s8  ;;  %s3423_s10 = smov 47   ;;  %v1941_v23 = vpop.permute.xlu0 %1940  ;;  %v1536_v56 = vmul.f32 %v1534_v2, %v4368_v18 }
 0x16a   :  { %v1942_v16 = vrot.slane %v1941_v23, 6 }
 0x16b   :  { %v4304_v53 = vpop.permute.xlu1 %493 }
 0x16c   :  { %v1943_v36 = vsel %vm547_vm2, %v1942_v16, %v1941_v23  ;;  %vm4944_vm2 = vcmask 809984  }
 0x16d   :  { %1757 = vrot.lane.b32.xlu0 %v1755_v42, %s3392_s16  ;;  %1364 = vrot.lane.b32.xlu1 %v1362_v43, %s3423_s10  ;;  %s3424_s16 = smov 46   ;;  %v1968_v43 = vpop.permute.xlu0 %1967 }
 0x16f   :  { %v4316_v55 = vpop.permute.xlu1 %523 }
 0x171   :  { %1784 = vrot.lane.b32.xlu0 %v1782_v44, %s3393_s21  ;;  %1393 = vrot.lane.b32.xlu1 %v1391_v46, %s3424_s16  ;;  %s4937_s21 = smov 45   ;;  %v4364_v46 = vld [vmem:[#allocation4 + $0x6] sm:$0x3f] }
 0x172   :  { %v1918_v40 = vmul.f32 %v1916_v32, %v4364_v46  ;;  %v1945_v0 = vmul.f32 %v1943_v36, %v4364_v46 }
 0x173   :  { %v4326_v25 = vpop.permute.xlu1 %552 }
 0x175   :  { %1811 = vrot.lane.b32.xlu0 %v1809_v4, %s3394_s26  ;;  %1422 = vrot.lane.b32.xlu1 %v1420_v31, %s4937_s21  ;;  %s3426_s26 = smov 44   ;;  %s4343_s21 = sld [smem:[#allocation6]]  ;;  %v1969_v4 = vrot.slane %v1968_v43, 6  ;;  %v1589_v31 = vrot.slane %v4157_v51, 6 }
 0x177   :  { %v4336_v26 = vpop.permute.xlu1 %581  ;;  %v1970_v48 = vsel %vm576_vm3, %v1969_v4, %v1968_v43  ;;  %v1591_v39 = vsel %vm4939_vm1, %v1589_v31, %v4157_v51  ;;  %vm4941_vm3 = vcmask 834560   ;;  %v1620_v43 = vsel %vm4944_vm2, %v1618_v54, %v4219_v3 }
 0x178   :  { %v1972_v35 = vmul.f32 %v1970_v48, %v4364_v46  ;;  %v1593_v51 = vmul.f32 %v1591_v39, %v4368_v18  ;;  %vm4946_vm1 = vcmask 826368   ;;  %v1676_v31 = vrot.slane %v4237_v21, 6 }
 0x179   :  { %1838 = vrot.lane.b32.xlu0 %v1836_v17, %s3395_s0  ;;  %1451 = vrot.lane.b32.xlu1 %v1449_v12, %s3426_s26  ;;  %s3427_s0 = smov 43   ;;  %v1564_v12 = vmul.f32 %v1562_v61, %v4368_v18  ;;  %v3275_v61 = vld [vmem:[#allocation4] sm:$0x3f]  ;;  %vm4947_vm2 = vcmask 998400  }
 0x17b   :  { %v4348_v42 = vpop.permute.xlu1 %610  ;;  %v310_v20 = vstv %s4343_s21  ;;  %s4399_s21 = sld [smem:[#allocation6 + $0x52]] }
 0x17c   :  { %v311_v62 = vmul.f32 %v3592_v6, %v310_v20  ;;  %v312_v50 = vmul.f32 %v3595_v7, %v310_v20 }
 0x17d   :  { %1865 = vrot.lane.b32.xlu0 %v1863_v30, %s3396_s30  ;;  %1480 = vrot.lane.b32.xlu1 %v1478_v15, %s3427_s0  ;;  %s3428_s30 = smov 42   ;;  %v1647_v30 = vrot.slane %v4174_v11, 6  ;;  %v1705_v15 = vrot.slane %v4199_v13, 6 }
 0x17e   :  { %v315_v23 = vcombine.low %v311_v62, %v312_v50 }
 0x17f   :  { %v4358_v44 = vpop.permute.xlu1 %639  ;;  %v1649_v16 = vsel %vm4942_vm0, %v1647_v30, %v4174_v11  ;;  %v1707_v2 = vsel %vm4941_vm3, %v1705_v15, %v4199_v13  ;;  %vm409_vm3 = vcmask 1022976   ;;  %v408_v13 = vrot.slane %v4268_v60, 2 }
 0x180   :  { %v322_v32 = vrot.slane %v315_v23, %v3482_v10  ;;  %v1651_v50 = vmul.f32 %v1649_v16, %v4368_v18  ;;  %vm438_vm0 = vcmask 1014784   ;;  %v1678_v15 = vsel %vm4946_vm1, %v1676_v31, %v4237_v21 }
 0x181   :  { %1892 = vrot.lane.b32.xlu0 %v1890_v19, %s3397_s4  ;;  %1509 = vrot.lane.b32.xlu1 %v1507_v9, %s3428_s30  ;;  %s3429_s4 = smov 31   ;;  %v350_v9 = vrot.slane %v4249_v14, 2  ;;  %v1680_v16 = vmul.f32 %v1678_v15, %v4368_v18  ;;  %vm4995_vm1 = vcmask 261120  }
 0x182   :  { %v324_v62 = vmul.f32 %v3275_v61, %v322_v32 }
 0x183   :  { %v4371_v37 = vpop.permute.xlu0 %931  ;;  %v4375_v58 = vpop.permute.xlu1 %668  ;;  %v352_v11 = vsel %vm351_vm14, %v4249_v14, %v350_v9 }
 0x184   :  { %v354_v39 = vadd.f32 %v352_v11, %v324_v62 }
 0x185   :  { %1920 = vrot.lane.b32.xlu0 %v1918_v40, %s3398_s1  ;;  %1538 = vrot.lane.b32.xlu1 %v1536_v56, %s3371_s20  ;;  %s4394_s1 = sld [smem:[#allocation6 + $0x51]]  ;;  %v1622_v40 = vmul.f32 %v1620_v43, %v4368_v18 }
 0x187   :  { %v1995_v17 = vpop.permute.xlu0 %1994  ;;  %v4387_v41 = vpop.permute.xlu1 %697 }
 0x188   :  { %v1996_v24 = vrot.slane %v1995_v17, 6 }
 0x189   :  { %1947 = vrot.lane.b32.xlu0 %v1945_v0, %s3399_s24  ;;  %1566 = vrot.lane.b32.xlu1 %v1564_v12, %s3429_s4  ;;  %s4943_s24 = smov 30  }
 0x18a   :  { %v1997_v57 = vsel %vm605_vm4, %v1996_v24, %v1995_v17  ;;  %vm380_vm4 = vcmask 1031168   ;;  %v437_v17 = vrot.slane %v4278_v45, 2  ;;  %v2605_v24 = vstv %s4399_s21  ;;  %s4454_s21 = sld [smem:[#allocation6 + $0x54]] }
 0x18b   :  { %v2022_v49 = vpop.permute.xlu0 %2021  ;;  %v4403_v19 = vpop.permute.xlu1 %727  ;;  %v1999_v3 = vmul.f32 %v1997_v57, %v4364_v46  ;;  %v2578_v0 = vstv %s4394_s1  ;;  %v381_v14 = vsel %vm380_vm4, %v4258_v38, %v379_v63  ;;  %v466_v38 = vrot.slane %v4294_v5, 2  ;;  %s4945_s1 = smov 28  }
 0x18c   :  { %v2023_v8 = vrot.slane %v2022_v49, 6  ;;  %v2580_v57 = vmul.f32 %v3532_v34, %v2578_v0  ;;  %v439_v21 = vsel %vm438_vm0, %v4278_v45, %v437_v17  ;;  %v2607_v32 = vmul.f32 %v3558_v52, %v2605_v24 }
 0x18d   :  { %1974 = vrot.lane.b32.xlu0 %v1972_v35, %s3400_s27  ;;  %1595 = vrot.lane.b32.xlu1 %v1593_v51, %s4943_s24  ;;  %s3431_s27 = smov 29   ;;  %s4429_s24 = sld [smem:[#allocation6 + $0x53]]  ;;  %v410_v35 = vsel %vm409_vm3, %v4268_v60, %v408_v13  ;;  %v2579_v51 = vmul.f32 %v3529_v33, %v2578_v0  ;;  %v495_v60 = vrot.slane %v4304_v53, 2  ;;  %v1709_v45 = vmul.f32 %v1707_v2, %v4368_v18 }
 0x18e   :  { %v2024_v56 = vsel %vm634_vm5, %v2023_v8, %v2022_v49  ;;  %vm4948_vm5 = vcmask 1006592   ;;  %v383_v49 = vadd.f32 %v381_v14, %v354_v39  ;;  %v2606_v8 = vmul.f32 %v3546_v47, %v2605_v24  ;;  %v4482_v39 = vld [vmem:[#allocation4 + $0x6] sm:$0x3f] }
 0x18f   :  { %v2049_v20 = vpop.permute.xlu0 %2048  ;;  %v4419_v4 = vpop.permute.xlu1 %756  ;;  %v2026_v12 = vmul.f32 %v2024_v56, %v4364_v46  ;;  %v468_v56 = vsel %vm4948_vm5, %v4294_v5, %v466_v38  ;;  %v2583_v11 = vcombine.low %v2579_v51, %v2580_v57  ;;  %v497_v61 = vsel %vm4947_vm2, %v4304_v53, %v495_v60 }
 0x190   :  { %v2050_v36 = vrot.slane %v2049_v20, 6  ;;  %v412_v63 = vadd.f32 %v410_v35, %v383_v49  ;;  %v554_v18 = vrot.slane %v4326_v25, 2  ;;  %v2610_v17 = vcombine.low %v2606_v8, %v2607_v32 }
 0x191   :  { %2001 = vrot.lane.b32.xlu0 %v1999_v3, %s3401_s29  ;;  %1624 = vrot.lane.b32.xlu1 %v1622_v40, %s3431_s27  ;;  %s4994_s29 = smov 108   ;;  %vm4950_vm2 = vcmask 900096   ;;  %vm4951_vm5 = vcmask 891904   ;;  %v2660_v38 = vstv %s4454_s21  ;;  %s4999_s21 = smov 69  }
 0x192   :  { %v2051_v54 = vsel %vm663_vm6, %v2050_v36, %v2049_v20  ;;  %v525_v36 = vrot.slane %v4316_v55, 2  ;;  %v441_v31 = vadd.f32 %v439_v21, %v412_v63  ;;  %vm4949_vm6 = vcmask 916480  }
 0x193   :  { %v2076_v48 = vpop.permute.xlu0 %2075  ;;  %v4437_v30 = vpop.permute.xlu1 %785  ;;  %v2053_v43 = vmul.f32 %v2051_v54, %v4364_v46  ;;  %v2632_v13 = vstv %s4429_s24  ;;  %v2590_v54 = vrot.slane %v2583_v11, %v3482_v10  ;;  %v2617_v60 = vrot.slane %v2610_v17, %v3482_v10  ;;  %s4997_s24 = smov 68  }
 0x194   :  { %v2077_v23 = vrot.slane %v2076_v48, 6  ;;  %v470_v62 = vadd.f32 %v468_v56, %v441_v31  ;;  %v2633_v53 = vmul.f32 %v3569_v59, %v2632_v13  ;;  %v2661_v32 = vmul.f32 %v3592_v6, %v2660_v38 }
 0x195   :  { %2028 = vrot.lane.b32.xlu0 %v2026_v12, %s4994_s29  ;;  %1653 = vrot.lane.b32.xlu1 %v1651_v50, %s4945_s1  ;;  %s3433_s29 = smov 27   ;;  %s4467_s1 = sld [smem:[#allocation6 + $0x55]]  ;;  %v527_v12 = vsel %vm4949_vm6, %v4316_v55, %v525_v36  ;;  %vm4996_vm6 = vcmask 269312  }
 0x196   :  { %v2078_v3 = vsel %vm692_vm8, %v2077_v23, %v2076_v48  ;;  %vm4961_vm8 = vcmask 908288   ;;  %v583_v48 = vrot.slane %v4336_v26, 2  ;;  %v499_v24 = vadd.f32 %v497_v61, %v470_v62 }
 0x197   :  { %v2104_v9 = vpop.permute.xlu0 %2103  ;;  %v4458_v40 = vpop.permute.xlu1 %814  ;;  %v2080_v5 = vmul.f32 %v2078_v3, %v4364_v46  ;;  %v2634_v46 = vmul.f32 %v3582_v1, %v2632_v13  ;;  %v556_v55 = vsel %vm4961_vm8, %v4326_v25, %v554_v18  ;;  %v612_v23 = vrot.slane %v4348_v42, 2 }
 0x198   :  { %v2105_v20 = vrot.slane %v2104_v9, 6  ;;  %v529_v49 = vadd.f32 %v527_v12, %v499_v24  ;;  %v585_v21 = vsel %vm4950_vm2, %v4336_v26, %v583_v48  ;;  %v641_v25 = vrot.slane %v4358_v44, 2 }
 0x199   :  { %2055 = vrot.lane.b32.xlu0 %v2053_v43, %s3403_s11  ;;  %1682 = vrot.lane.b32.xlu1 %v1680_v16, %s3433_s29  ;;  %s3434_s11 = smov 26   ;;  %v2637_v43 = vcombine.low %v2633_v53, %v2634_v46  ;;  %v2662_v16 = vmul.f32 %v3595_v7, %v2660_v38  ;;  %v614_v3 = vsel %vm4951_vm5, %v4348_v42, %v612_v23  ;;  %v670_v26 = vrot.slane %v4375_v58, 2 }
 0x19a   :  { %v2106_v50 = vsel %vm4995_vm1, %v2105_v20, %v2104_v9  ;;  %vm4952_vm1 = vcmask 883712   ;;  %v558_v9 = vadd.f32 %v556_v55, %v529_v49  ;;  %vm4998_vm2 = vcmask 277504  }
 0x19b   :  { %v2131_v2 = vpop.permute.xlu0 %2130  ;;  %v4474_v14 = vpop.permute.xlu1 %843  ;;  %v2108_v15 = vmul.f32 %v2106_v50, %v4482_v39  ;;  %v2687_v63 = vstv %s4467_s1  ;;  %v643_v13 = vsel %vm4952_vm1, %v4358_v44, %v641_v25  ;;  %v699_v61 = vrot.slane %v4387_v41, 2  ;;  %s4518_s1 = sld [smem:[#allocation6 + $0x57]] }
 0x19c   :  { %v2132_v0 = vrot.slane %v2131_v2, 6  ;;  %v587_v56 = vadd.f32 %v585_v21, %v558_v9  ;;  %v2688_v42 = vmul.f32 %v3515_v28, %v2687_v63  ;;  %v2689_v18 = vmul.f32 %v3518_v29, %v2687_v63 }
 0x19d   :  { %2082 = vrot.lane.b32.xlu0 %v2080_v5, %s3404_s12  ;;  %1711 = vrot.lane.b32.xlu1 %v1709_v45, %s3434_s11  ;;  %s4491_s12 = sld [smem:[#allocation6 + $0x56]]  ;;  %vm4953_vm5 = vcmask 867328   ;;  %v2665_v62 = vcombine.low %v2661_v32, %v2662_v16  ;;  %v729_v50 = vrot.slane %v4403_v19, 2  ;;  %vm4955_vm1 = vcmask 777216  }
 0x19e   :  { %v2133_v51 = vsel %vm4996_vm6, %v2132_v0, %v2131_v2  ;;  %vm4954_vm6 = vcmask 875520   ;;  %v616_v5 = vadd.f32 %v614_v3, %v587_v56  ;;  %v2644_v2 = vrot.slane %v2637_v43, %v3482_v10 }
 0x19f   :  { %v2158_v35 = vpop.permute.xlu0 %2157  ;;  %v4494_v8 = vpop.permute.xlu1 %872  ;;  %v2135_v20 = vmul.f32 %v2133_v51, %v4482_v39  ;;  %v672_v44 = vsel %vm4954_vm6, %v4375_v58, %v670_v26  ;;  %v701_v24 = vsel %vm4953_vm5, %v4387_v41, %v699_v61  ;;  %v2692_v58 = vcombine.low %v2688_v42, %v2689_v18 }
 0x1a0   :  { %v2159_v57 = vrot.slane %v2158_v35, 6  ;;  %v645_v48 = vadd.f32 %v643_v13, %v616_v5  ;;  %v2672_v23 = vrot.slane %v2665_v62, %v3482_v10  ;;  %v731_v38 = vsel %vm730_vm15, %v4403_v19, %v729_v50 }
 0x1a1   :  { %2110 = vrot.lane.b32.xlu0 %v2108_v15, %s3364_s23  ;;  %2591 = vrot.lane.b32.xlu1 %v2590_v54, %s4997_s24  ;;  %s4522_s24 = sld [smem:[#allocation6 + $0x58]]  ;;  %v758_v54 = vrot.slane %v4419_v4, 2  ;;  %v787_v41 = vrot.slane %v4437_v30, 2  ;;  %vm4956_vm5 = vcmask 760832   ;;  %v816_v43 = vrot.slane %v4458_v40, 2 }
 0x1a2   :  { %v2160_v36 = vsel %vm4998_vm2, %v2159_v57, %v2158_v35  ;;  %vm5000_vm2 = vcmask 285696   ;;  %v674_v55 = vadd.f32 %v672_v44, %v645_v48  ;;  %v2699_v19 = vrot.slane %v2692_v58, %v3482_v10 }
 0x1a3   :  { %v2185_v45 = vpop.permute.xlu0 %2184  ;;  %v4510_v11 = vpop.permute.xlu1 %901  ;;  %v2162_v0 = vmul.f32 %v2160_v36, %v4482_v39  ;;  %v2714_v12 = vstv %s4491_s12  ;;  %v2741_v9 = vstv %s4518_s1  ;;  %s4556_s12 = sld [smem:[#allocation6 + $0x5a]]  ;;  %vm5002_vm6 = vcmask 302080   ;;  %s4577_s1 = sld [smem:[#allocation6 + $0x5b]] }
 0x1a4   :  { %v2186_v31 = vrot.slane %v2185_v45, 6  ;;  %v2715_v15 = vmul.f32 %v3503_v22, %v2714_v12  ;;  %v2716_v35 = vmul.f32 %v3512_v27, %v2714_v12  ;;  %v703_v57 = vadd.f32 %v701_v24, %v674_v55  ;;  %v4589_v55 = vld [vmem:[#allocation4 + $0x6] sm:$0x3f] }
 0x1a5   :  { %2137 = vrot.lane.b32.xlu0 %v2135_v20, %s3405_s25  ;;  %2618 = vrot.lane.b32.xlu1 %v2617_v60, %s4999_s21  ;;  %s5001_s25 = smov 70   ;;  %v760_v60 = vsel %vm4955_vm1, %v4419_v4, %v758_v54  ;;  %s5003_s21 = smov 80   ;;  %v845_v4 = vrot.slane %v4474_v14, 2  ;;  %vm4957_vm1 = vcmask 752640   ;;  %v818_v13 = vsel %vm4956_vm5, %v4458_v40, %v816_v43 }
 0x1a6   :  { %v2187_v53 = vsel %vm5000_vm2, %v2186_v31, %v2185_v45  ;;  %vm4960_vm2 = vcmask 769024   ;;  %v733_v32 = vadd.f32 %v731_v38, %v703_v57  ;;  %v2719_v63 = vcombine.low %v2715_v15, %v2716_v35 }
 0x1a7   :  { %v4528_v17 = vpop.permute.xlu0 %2211  ;;  %v4532_v46 = vpop.permute.xlu1 %960  ;;  %v2189_v49 = vmul.f32 %v2187_v53, %v4482_v39  ;;  %v2768_v3 = vstv %s4522_s24  ;;  %v789_v26 = vsel %vm4960_vm2, %v4437_v30, %v787_v41  ;;  %v2746_v31 = vcombine.low %v2741_v9, %v2741_v9  ;;  %s4600_s24 = sld [smem:[#allocation6 + $0x5c]] }
 0x1a8   :  { %v762_v56 = vadd.f32 %v760_v60, %v733_v32  ;;  %v874_v61 = vrot.slane %v4494_v8, 2  ;;  %v2769_v30 = vmul.f32 %v3529_v33, %v2768_v3  ;;  %v2770_v42 = vmul.f32 %v3532_v34, %v2768_v3 }
 0x1a9   :  { %2164 = vrot.lane.b32.xlu0 %v2162_v0, %s3406_s28  ;;  %2645 = vrot.lane.b32.xlu1 %v2644_v2, %s5001_s25  ;;  %s4546_s28 = sld [smem:[#allocation6 + $0x59]]  ;;  %v2726_v5 = vrot.slane %v2719_v63, %v3482_v10  ;;  %v847_v40 = vsel %vm4957_vm1, %v4474_v14, %v845_v4  ;;  %v903_v2 = vrot.slane %v4510_v11, 2  ;;  %vm4958_vm5 = vcmask 736256   ;;  %s5007_s25 = smov 83  }
 0x1aa   :  { %v791_v18 = vadd.f32 %v789_v26, %v762_v56  ;;  %v2753_v53 = vrot.slane %v2746_v31, %v3482_v10  ;;  %v2773_v24 = vcombine.low %v2769_v30, %v2770_v42  ;;  %v2822_v54 = vstv %s4556_s12  ;;  %s5009_s12 = smov 84  }
 0x1ab   :  { %v2239_v51 = vpop.permute.xlu0 %2238  ;;  %v4548_v25 = vpop.permute.xlu1 %989  ;;  %vm5005_vm1 = vcmask 392192   ;;  %v905_v35 = vsel %vm4958_vm5, %v4510_v11, %v903_v2  ;;  %v2824_v57 = vmul.f32 %v3582_v1, %v2822_v54  ;;  %v962_v9 = vrot.slane %v4532_v46, 2 }
 0x1ac   :  { %v2240_v21 = vrot.slane %v2239_v51, 6  ;;  %v820_v50 = vadd.f32 %v818_v13, %v791_v18  ;;  %v2780_v11 = vrot.slane %v2773_v24, %v3482_v10  ;;  %v991_v4 = vrot.slane %v4548_v25, 2 }
 0x1ad   :  { %2191 = vrot.lane.b32.xlu0 %v2189_v49, %s3407_s14  ;;  %2673 = vrot.lane.b32.xlu1 %v2672_v23, %s5003_s21  ;;  %s5004_s14 = smov 81   ;;  %vm4962_vm5 = vcmask 637952   ;;  %vm4963_vm2 = vcmask 629760   ;;  %vm4965_vm8 = vcmask 621568  }
 0x1ae   :  { %v2241_v16 = vsel %vm5002_vm6, %v2240_v21, %v2239_v51  ;;  %vm4959_vm6 = vcmask 744448   ;;  %v849_v58 = vadd.f32 %v847_v40, %v820_v50  ;;  %v2823_v51 = vmul.f32 %v3569_v59, %v2822_v54 }
 0x1af   :  { %v2243_v20 = vmul.f32 %v2241_v16, %v4482_v39  ;;  %v4565_v45 = vpop.permute.xlu0 %2265  ;;  %v4567_v36 = vpop.permute.xlu1 %1017  ;;  %v2795_v44 = vstv %s4546_s28  ;;  %v876_v48 = vsel %vm4959_vm6, %v4494_v8, %v874_v61  ;;  %v933_v21 = vrot.slane %v4371_v37, 2  ;;  %s4611_s28 = sld [smem:[#allocation6 + $0x5d]] }
 0x1b0   :  { %v2796_v23 = vmul.f32 %v3546_v47, %v2795_v44  ;;  %v2797_v15 = vmul.f32 %v3558_v52, %v2795_v44  ;;  %v878_v41 = vadd.f32 %v876_v48, %v849_v58  ;;  %v2827_v3 = vcombine.low %v2823_v51, %v2824_v57 }
 0x1b1   :  { %2245 = vrot.lane.b32.xlu0 %v2243_v20, %s3409_s15  ;;  %2700 = vrot.lane.b32.xlu1 %v2699_v19, %s5004_s14  ;;  %s5006_s15 = smov 82   ;;  %v2850_v19 = vstv %s4577_s1  ;;  %v935_v26 = vsel %vm934_vm9, %v4371_v37, %v933_v21  ;;  %vm5008_vm6 = vcmask 408576   ;;  %v1019_v42 = vrot.slane %v4567_v36, 2  ;;  %s5010_s14 = smov 85  }
 0x1b2   :  { %v907_v60 = vadd.f32 %v905_v35, %v878_v41  ;;  %v2800_v43 = vcombine.low %v2796_v23, %v2797_v15  ;;  %v2851_v20 = vmul.f32 %v3592_v6, %v2850_v19  ;;  %v2852_v56 = vmul.f32 %v3595_v7, %v2850_v19  ;;  %s5012_s1 = smov 86  }
 0x1b3   :  { %v2294_v62 = vpop.permute.xlu0 %2293  ;;  %v4583_v12 = vpop.permute.xlu1 %1046  ;;  %v993_v2 = vsel %vm4962_vm5, %v4548_v25, %v991_v4  ;;  %v1021_v25 = vsel %vm4963_vm2, %v4567_v36, %v1019_v42  ;;  %vm4966_vm5 = vcmask 605184   ;;  %vm5011_vm2 = vcmask 424960  }
 0x1b4   :  { %v2295_v0 = vrot.slane %v2294_v62, 6  ;;  %v937_v31 = vadd.f32 %v935_v26, %v907_v60  ;;  %v2807_v61 = vrot.slane %v2800_v43, %v3482_v10  ;;  %v2855_v44 = vcombine.low %v2851_v20, %v2852_v56 }
 0x1b5   :  { %2727 = vrot.lane.b32.xlu1 %v2726_v5, %s5006_s15  ;;  %v2877_v5 = vstv %s4600_s24  ;;  %s4652_s15 = sld [smem:[#allocation6 + $0x60]]  ;;  %s4666_s24 = sld [smem:[#allocation6 + $0x61]] }
 0x1b6   :  { %v2296_v14 = vsel %vm5005_vm1, %v2295_v0, %v2294_v62  ;;  %vm963_vm1 = vcmask 646144   ;;  %v1048_v62 = vrot.slane %v4583_v12, 2  ;;  %v2878_v0 = vmul.f32 %v3515_v28, %v2877_v5 }
 0x1b7   :  { %v2298_v8 = vmul.f32 %v2296_v14, %v4589_v55  ;;  %v4598_v38 = vpop.permute.xlu0 %2320  ;;  %v4602_v49 = vpop.permute.xlu1 %1075  ;;  %v964_v30 = vsel %vm963_vm1, %v4532_v46, %v962_v9  ;;  %v2834_v46 = vrot.slane %v2827_v3, %v3482_v10  ;;  %v2879_v48 = vmul.f32 %v3518_v29, %v2877_v5 }
 0x1b8   :  { %v966_v50 = vadd.f32 %v964_v30, %v937_v31  ;;  %v1077_v24 = vrot.slane %v4602_v49, 2  ;;  %v1050_v15 = vsel %vm4965_vm8, %v4583_v12, %v1048_v62  ;;  %v2862_v41 = vrot.slane %v2855_v44, %v3482_v10 }
 0x1b9   :  { %2300 = vrot.lane.b32.xlu0 %v2298_v8, %s5003_s21  ;;  %2754 = vrot.lane.b32.xlu1 %v2753_v53, %s5007_s25  ;;  %s4634_s21 = sld [smem:[#allocation6 + $0x5f]]  ;;  %v2904_v53 = vstv %s4611_s28  ;;  %v2882_v51 = vcombine.low %v2878_v0, %v2879_v48  ;;  %vm4971_vm8 = vcmask 506880   ;;  %s5019_s25 = smov 100  }
 0x1ba   :  { %v995_v58 = vadd.f32 %v993_v2, %v966_v50  ;;  %v2905_v29 = vmul.f32 %v3503_v22, %v2904_v53  ;;  %v2906_v35 = vmul.f32 %v3512_v27, %v2904_v53  ;;  %s5021_s28 = smov 101  }
 0x1bb   :  { %v2348_v32 = vpop.permute.xlu0 %2347  ;;  %v1105_v63 = vpop.permute.xlu1 %1104  ;;  %v2985_v2 = vstv %s4652_s15 }
 0x1bc   :  { %v2349_v16 = vrot.slane %v2348_v32, 6  ;;  %v1106_v28 = vrot.slane %v1105_v63, 2  ;;  %v1023_v8 = vadd.f32 %v1021_v25, %v995_v58  ;;  %v2909_v19 = vcombine.low %v2905_v29, %v2906_v35 }
 0x1bd   :  { %2781 = vrot.lane.b32.xlu1 %v2780_v11, %s5009_s12  ;;  %v2986_v53 = vmul.f32 %v3546_v47, %v2985_v2  ;;  %v2987_v25 = vmul.f32 %v3558_v52, %v2985_v2  ;;  %v4688_v47 = vld [vmem:[#allocation4 + $0x6] sm:$0x3f]  ;;  %s5031_s12 = smov 77  }
 0x1be   :  { %v2350_v13 = vsel %vm5008_vm6, %v2349_v16, %v2348_v32  ;;  %vm4964_vm6 = vcmask 613376   ;;  %v1052_v27 = vadd.f32 %v1050_v15, %v1023_v8  ;;  %v1108_v11 = vsel %vm4966_vm5, %v1105_v63, %v1106_v28 }
 0x1bf   :  { %v2352_v37 = vmul.f32 %v2350_v13, %v4589_v55  ;;  %v4626_v18 = vpop.permute.xlu0 %2374  ;;  %v1135_v40 = vpop.permute.xlu1 %1134  ;;  %v1079_v57 = vsel %vm4964_vm6, %v4602_v49, %v1077_v24  ;;  %v2958_v9 = vstv %s4634_s21  ;;  %v2889_v49 = vrot.slane %v2882_v51, %v3482_v10  ;;  %s5033_s21 = smov 75  }
 0x1c0   :  { %v1136_v12 = vrot.slane %v1135_v40, 2  ;;  %v1081_v32 = vadd.f32 %v1079_v57, %v1052_v27  ;;  %vm5013_vm6 = vcmask 523264   ;;  %v2959_v31 = vmul.f32 %v3529_v33, %v2958_v9 }
 0x1c1   :  { %2354 = vrot.lane.b32.xlu0 %v2352_v37, %s3412_s9  ;;  %2808 = vrot.lane.b32.xlu1 %v2807_v61, %s5010_s14  ;;  %s4643_s9 = sld [smem:[#allocation6 + $0x5e]]  ;;  %v2960_v13 = vmul.f32 %v3532_v34, %v2958_v9  ;;  %vm4968_vm5 = vcmask 498688   ;;  %v2916_v42 = vrot.slane %v2909_v19, %v3482_v10  ;;  %s5036_s14 = smov 62  }
 0x1c2   :  { %v1137_v16 = vsel %vm5013_vm6, %v1135_v40, %v1136_v12  ;;  %v1110_v63 = vadd.f32 %v1108_v11, %v1081_v32  ;;  %vm5014_vm6 = vcmask 441344  }
 0x1c3   :  { %v2402_v54 = vpop.permute.xlu0 %2401  ;;  %v1163_v23 = vpop.permute.xlu1 %1162  ;;  %v2963_v50 = vcombine.low %v2959_v31, %v2960_v13 }
 0x1c4   :  { %v2403_v14 = vrot.slane %v2402_v54, 6  ;;  %v1164_v43 = vrot.slane %v1163_v23, 2  ;;  %v1139_v37 = vadd.f32 %v1137_v16, %v1110_v63 }
 0x1c5   :  { %2835 = vrot.lane.b32.xlu1 %v2834_v46, %s5012_s1  ;;  %v2970_v8 = vrot.slane %v2963_v50, %v3482_v10 }
 0x1c6   :  { %v2404_v36 = vsel %vm5011_vm2, %v2403_v14, %v2402_v54  ;;  %vm4967_vm2 = vcmask 515072  }
 0x1c7   :  { %v2406_v21 = vmul.f32 %v2404_v36, %v4589_v55  ;;  %v4657_v22 = vpop.permute.xlu0 %2428  ;;  %v1192_v60 = vpop.permute.xlu1 %1191  ;;  %v2931_v4 = vstv %s4643_s9  ;;  %v1166_v61 = vsel %vm4967_vm2, %v1163_v23, %v1164_v43  ;;  %vm4969_vm2 = vcmask 490496  }
 0x1c8   :  { %v1193_v3 = vrot.slane %v1192_v60, 2  ;;  %v2936_v40 = vcombine.low %v2931_v4, %v2931_v4  ;;  %v1168_v34 = vadd.f32 %v1166_v61, %v1139_v37  ;;  %v3012_v23 = vstv %s4666_s24 }
 0x1c9   :  { %2408 = vrot.lane.b32.xlu0 %v2406_v21, %s3414_s13  ;;  %2863 = vrot.lane.b32.xlu1 %v2862_v41, %s3364_s23  ;;  %s5015_s23 = smov 97   ;;  %s5016_s13 = smov 98   ;;  %v2990_v36 = vcombine.low %v2986_v53, %v2987_v25  ;;  %v3013_v51 = vmul.f32 %v3569_v59, %v3012_v23  ;;  %v3014_v57 = vmul.f32 %v3582_v1, %v3012_v23  ;;  %v2376_v53 = vrot.slane %v4626_v18, 6 }
 0x1ca   :  { %v1195_v62 = vsel %vm4971_vm8, %v1192_v60, %v1193_v3  ;;  %v2943_v54 = vrot.slane %v2936_v40, %v3482_v10  ;;  %v2213_v3 = vrot.slane %v4528_v17, 6  ;;  %vm4973_vm8 = vcmask 384000  }
 0x1cb   :  { %v2456_v26 = vpop.permute.xlu0 %2455  ;;  %v1221_v56 = vpop.permute.xlu1 %1220  ;;  %v1197_v24 = vadd.f32 %v1195_v62, %v1168_v34  ;;  %v2997_v19 = vrot.slane %v2990_v36, %v3482_v10  ;;  %v3017_v9 = vcombine.low %v3013_v51, %v3014_v57 }
 0x1cc   :  { %v2457_v20 = vrot.slane %v2456_v26, 6  ;;  %v1222_v30 = vrot.slane %v1221_v56, 2 }
 0x1cd   :  { %2890 = vrot.lane.b32.xlu1 %v2889_v49, %s5015_s23  ;;  %v3024_v63 = vrot.slane %v3017_v9, %v3482_v10 }
 0x1ce   :  { %v2458_v5 = vsel %vm5014_vm6, %v2457_v20, %v2456_v26  ;;  %v1224_v0 = vsel %vm4968_vm5, %v1221_v56, %v1222_v30  ;;  %vm4970_vm6 = vcmask 482304   ;;  %vm5017_vm5 = vcmask 531456  }
 0x1cf   :  { %v2460_v46 = vmul.f32 %v2458_v5, %v4589_v55  ;;  %v4677_v33 = vpop.permute.xlu0 %2483  ;;  %v1250_v44 = vpop.permute.xlu1 %1249  ;;  %v1226_v15 = vadd.f32 %v1224_v0, %v1197_v24  ;;  %v2267_v30 = vrot.slane %v4565_v45, 6 }
 0x1d0   :  { %v1251_v48 = vrot.slane %v1250_v44, 2 }
 0x1d1   :  { %2462 = vrot.lane.b32.xlu0 %v2460_v46, %s3416_s22  ;;  %2917 = vrot.lane.b32.xlu1 %v2916_v42, %s5016_s13  ;;  %s5018_s22 = smov 99   ;;  %v2322_v46 = vrot.slane %v4598_v38, 6 }
 0x1d2   :  { %v1253_v58 = vsel %vm4969_vm2, %v1250_v44, %v1251_v48  ;;  %vm4972_vm2 = vcmask 474112  }
 0x1d3   :  { %v2511_v14 = vpop.permute.xlu0 %2510  ;;  %v1279_v29 = vpop.permute.xlu1 %1278  ;;  %v1255_v52 = vadd.f32 %v1253_v58, %v1226_v15 }
 0x1d4   :  { %v2512_v28 = vrot.slane %v2511_v14, 6  ;;  %v1280_v35 = vrot.slane %v1279_v29, 2 }
 0x1d5   :  { %2944 = vrot.lane.b32.xlu1 %v2943_v54, %s5018_s22 }
 0x1d6   :  { %v2513_v41 = vsel %vm5017_vm5, %v2512_v28, %v2511_v14  ;;  %v1282_v21 = vsel %vm4970_vm6, %v1279_v29, %v1280_v35  ;;  %vm5020_vm5 = vcmask 547840   ;;  %vm5022_vm6 = vcmask 392192  }
 0x1d7   :  { %v2515_v12 = vmul.f32 %v2513_v41, %v4688_v47  ;;  %v4696_v27 = vpop.permute.xlu0 %2537  ;;  %v1284_v60 = vadd.f32 %v1282_v21, %v1255_v52  ;;  %v1308_v11 = vpop.permute.xlu1 %1307  ;;  %v2430_v14 = vrot.slane %v4657_v22, 6 }
 0x1d8   :  { %v1309_v43 = vrot.slane %v1308_v11, 2 }
 0x1d9   :  { %2517 = vrot.lane.b32.xlu0 %v2515_v12, %s3417_s7  ;;  %2971 = vrot.lane.b32.xlu1 %v2970_v8, %s5019_s25  ;;  %s5024_s7 = smov 102   ;;  %v2485_v8 = vrot.slane %v4677_v33, 6  ;;  %v2539_v12 = vrot.slane %v4696_v27, 6 }
 0x1da   :  { %v1311_v59 = vsel %vm4972_vm2, %v1308_v11, %v1309_v43  ;;  %vm5023_vm2 = vcmask 293888  }
 0x1db   :  { %v2565_v1 = vpop.permute.xlu0 %2564  ;;  %v1313_v32 = vadd.f32 %v1311_v59, %v1284_v60  ;;  %v1337_v16 = vpop.permute.xlu1 %1336  ;;  %v2214_v61 = vsel %vm5023_vm2, %v2213_v3, %v4528_v17  ;;  %vm4975_vm2 = vcmask 367616  }
 0x1dc   :  { %v2566_v49 = vrot.slane %v2565_v1, 6  ;;  %v1338_v26 = vrot.slane %v1337_v16, 2  ;;  %v2216_v5 = vmul.f32 %v2214_v61, %v4482_v39 }
 0x1dd   :  { %2998 = vrot.lane.b32.xlu1 %v2997_v19, %s5021_s28 }
 0x1de   :  { %v2567_v4 = vsel %vm5020_vm5, %v2566_v49, %v2565_v1  ;;  %v1339_v56 = vsel %vm5022_vm6, %v1337_v16, %v1338_v26  ;;  %vm4974_vm5 = vcmask 375808   ;;  %vm5025_vm6 = vcmask 310272  }
 0x1df   :  { %v2569_v20 = vmul.f32 %v2567_v4, %v4688_v47  ;;  %v1341_v31 = vadd.f32 %v1339_v56, %v1313_v32  ;;  %v1365_v13 = vpop.permute.xlu1 %1364  ;;  %v2268_v62 = vsel %vm5025_vm6, %v2267_v30, %v4565_v45  ;;  %vm4976_vm6 = vcmask 359424  }
 0x1e0   :  { %v1366_v42 = vrot.slane %v1365_v13, 2  ;;  %v2270_v44 = vmul.f32 %v2268_v62, %v4482_v39 }
 0x1e1   :  { %2571 = vrot.lane.b32.xlu0 %v2569_v20, %s3419_s6  ;;  %3025 = vrot.lane.b32.xlu1 %v3024_v63, %s5024_s7  ;;  %s5027_s6 = smov 90  }
 0x1e2   :  { %v1368_v37 = vsel %vm4973_vm8, %v1365_v13, %v1366_v42  ;;  %vm5026_vm8 = vcmask 400384  }
 0x1e3   :  { %v1370_v40 = vadd.f32 %v1368_v37, %v1341_v31  ;;  %v1394_v2 = vpop.permute.xlu1 %1393  ;;  %v2323_v48 = vsel %vm5026_vm8, %v2322_v46, %v4598_v38  ;;  %vm4977_vm8 = vcmask 351232  }
 0x1e4   :  { %v1395_v17 = vrot.slane %v1394_v2, 2  ;;  %v2325_v24 = vmul.f32 %v2323_v48, %v4589_v55 }
 0x1e5   :  { %2218 = vrot.lane.b32.xlu1 %v2216_v5, %s3408_s3  ;;  %s5029_s3 = smov 79  }
 0x1e6   :  { %v1397_v34 = vsel %vm4974_vm5, %v1394_v2, %v1395_v17  ;;  %vm5028_vm5 = vcmask 416768   ;;  %v4756_v2 = vpop.permute.xlu0 %1757 }
 0x1e7   :  { %v1399_v50 = vadd.f32 %v1397_v34, %v1370_v40  ;;  %v1423_v0 = vpop.permute.xlu1 %1422  ;;  %v2377_v39 = vsel %vm5028_vm5, %v2376_v53, %v4626_v18  ;;  %vm4978_vm5 = vcmask 343040  }
 0x1e8   :  { %v1424_v25 = vrot.slane %v1423_v0, 2  ;;  %v2379_v15 = vmul.f32 %v2377_v39, %v4589_v55 }
 0x1e9   :  { %2272 = vrot.lane.b32.xlu1 %v2270_v44, %s5027_s6 }
 0x1ea   :  { %v1426_v45 = vsel %vm4975_vm2, %v1423_v0, %v1424_v25  ;;  %vm5030_vm2 = vcmask 433152   ;;  %v4759_v48 = vpop.permute.xlu0 %1784 }
 0x1eb   :  { %v1428_v54 = vadd.f32 %v1426_v45, %v1399_v50  ;;  %v1452_v58 = vpop.permute.xlu1 %1451  ;;  %v2431_v35 = vsel %vm5030_vm2, %v2430_v14, %v4657_v22  ;;  %vm5034_vm2 = vcmask 539648  }
 0x1ec   :  { %v1453_v23 = vrot.slane %v1452_v58, 2  ;;  %v2433_v52 = vmul.f32 %v2431_v35, %v4589_v55  ;;  %v2540_v55 = vsel %vm5034_vm2, %v2539_v12, %v4696_v27  ;;  %vm1627_vm2 = vcmask 236544  }
 0x1ed   :  { %2327 = vrot.lane.b32.xlu1 %v2325_v24, %s5029_s3 }
 0x1ee   :  { %v1455_v38 = vsel %vm4976_vm6, %v1452_v58, %v1453_v23  ;;  %vm5032_vm6 = vcmask 523264   ;;  %v4765_v58 = vpop.permute.xlu0 %1811 }
 0x1ef   :  { %v1457_v28 = vadd.f32 %v1455_v38, %v1428_v54  ;;  %v1481_v29 = vpop.permute.xlu1 %1480  ;;  %v2486_v57 = vsel %vm5032_vm6, %v2485_v8, %v4677_v33  ;;  %v2542_v33 = vmul.f32 %v2540_v55, %v4688_v47  ;;  %vm4979_vm6 = vcmask 252928  }
 0x1f0   :  { %v1482_v36 = vrot.slane %v1481_v29, 2  ;;  %v2488_v60 = vmul.f32 %v2486_v57, %v4688_v47 }
 0x1f1   :  { %2381 = vrot.lane.b32.xlu1 %v2379_v15, %s5031_s12 }
 0x1f2   :  { %v1484_v18 = vsel %vm4977_vm8, %v1481_v29, %v1482_v36  ;;  %vm5035_vm8 = vcmask 261120   ;;  %v4771_v35 = vpop.permute.xlu0 %1838  ;;  %v2658_v36 = vld [vmem:[#allocation4 + $0x6] sm:$0x3f] }
 0x1f3   :  { %v1486_v41 = vadd.f32 %v1484_v18, %v1457_v28  ;;  %v1510_v51 = vpop.permute.xlu1 %1509 }
 0x1f4   :  { %v1511_v21 = vrot.slane %v1510_v51, 2 }
 0x1f5   :  { %2435 = vrot.lane.b32.xlu1 %v2433_v52, %s5033_s21 }
 0x1f6   :  { %v1513_v22 = vsel %vm4978_vm5, %v1510_v51, %v1511_v21  ;;  %vm4980_vm5 = vcmask 244736   ;;  %v4779_v21 = vpop.permute.xlu0 %1865 }
 0x1f7   :  { %v1515_v11 = vadd.f32 %v1513_v22, %v1486_v41  ;;  %v1539_v43 = vpop.permute.xlu1 %1538 }
 0x1f8   :  { %v1540_v19 = vrot.slane %v1539_v43, 2 }
 0x1f9   :  { %2490 = vrot.lane.b32.xlu1 %v2488_v60, %s4987_s5  ;;  %s3120_s5 = sld [smem:[#allocation6 + $0x31]] }
 0x1fa   :  { %v1541_v9 = vsel %vm5035_vm8, %v1539_v43, %v1540_v19  ;;  %vm4981_vm8 = vcmask 228352  }
 0x1fb   :  { %v1543_v59 = vadd.f32 %v1541_v9, %v1515_v11  ;;  %v1567_v1 = vpop.permute.xlu1 %1566 }
 0x1fc   :  { %v1568_v32 = vrot.slane %v1567_v1, 2 }
 0x1fd   :  { %2544 = vrot.lane.b32.xlu1 %v2542_v33, %s5036_s14 }
 0x1fe   :  { %v1570_v49 = vsel %vm4979_vm6, %v1567_v1, %v1568_v32  ;;  %vm4982_vm6 = vcmask 220160  }
 0x1ff   :  { %v1572_v16 = vadd.f32 %v1570_v49, %v1543_v59  ;;  %v1596_v3 = vpop.permute.xlu1 %1595  ;;  %v1720_v8 = vstv %s3120_s5 }
 0x200   :  { %v1597_v26 = vrot.slane %v1596_v3, 2  ;;  %v1721_v57 = vmul.f32 %v3592_v6, %v1720_v8  ;;  %v1722_v12 = vmul.f32 %v3595_v7, %v1720_v8  ;;  %v4783_v6 = vpop.permute.xlu0 %1892 }
 0x202   :  { %v1599_v27 = vsel %vm4980_vm5, %v1596_v3, %v1597_v26  ;;  %vm4983_vm5 = vcmask 211968   ;;  %v1725_v43 = vcombine.low %v1721_v57, %v1722_v12  ;;  %v1759_v26 = vrot.slane %v4756_v2, 2 }
 0x203   :  { %v1601_v4 = vadd.f32 %v1599_v27, %v1572_v16  ;;  %v1625_v63 = vpop.permute.xlu1 %1624  ;;  %v3276_v16 = vld [vmem:[#allocation4 + $0x6] sm:$0x3f] }
 0x204   :  { %v1626_v20 = vrot.slane %v1625_v63, 2  ;;  %v1732_v7 = vrot.slane %v1725_v43, %v3482_v10 }
 0x206   :  { %v1628_v56 = vsel %vm1627_vm2, %v1625_v63, %v1626_v20  ;;  %v1734_v3 = vmul.f32 %v3276_v16, %v1732_v7 }
 0x207   :  { %v1630_v31 = vadd.f32 %v1628_v56, %v1601_v4  ;;  %v1654_v13 = vpop.permute.xlu1 %1653  ;;  %v1921_v4 = vpop.permute.xlu0 %1920 }
 0x208   :  { %v1655_v61 = vrot.slane %v1654_v13, 2 }
 0x20a   :  { %v1657_v30 = vsel %vm4981_vm8, %v1654_v13, %v1655_v61  ;;  %vm5037_vm8 = vcmask 556032   ;;  %v1786_v13 = vrot.slane %v4759_v48, 2 }
 0x20b   :  { %v1659_v42 = vadd.f32 %v1657_v30, %v1630_v31  ;;  %v1683_v37 = vpop.permute.xlu1 %1682  ;;  %v1760_v31 = vsel %vm351_vm14, %v4756_v2, %v1759_v26  ;;  %vm5047_vm14 = vcmask 809984  }
 0x20c   :  { %v1684_v5 = vrot.slane %v1683_v37, 2 }
 0x20e   :  { %v1686_v40 = vsel %vm4982_vm6, %v1683_v37, %v1684_v5  ;;  %vm5038_vm6 = vcmask 564224  }
 0x20f   :  { %v1688_v62 = vadd.f32 %v1686_v40, %v1659_v42  ;;  %v1712_v46 = vpop.permute.xlu1 %1711  ;;  %v1948_v40 = vpop.permute.xlu0 %1947 }
 0x210   :  { %v1713_v17 = vrot.slane %v1712_v46, 2 }
 0x212   :  { %v1715_v34 = vsel %vm4983_vm5, %v1712_v46, %v1713_v17  ;;  %vm5039_vm5 = vcmask 572416   ;;  %v1813_v46 = vrot.slane %v4765_v58, 2 }
 0x213   :  { %v1717_v44 = vadd.f32 %v1715_v34, %v1688_v62  ;;  %v2592_v50 = vpop.permute.xlu1 %2591  ;;  %v1787_v62 = vsel %vm380_vm4, %v4759_v48, %v1786_v13  ;;  %vm5051_vm4 = vcmask 908288  }
 0x214   :  { %v2593_v0 = vrot.slane %v2592_v50, 6 }
 0x215   :  { %v1735_v63 = vadd.f32 %v1734_v3, %v1717_v44 }
 0x216   :  { %v2594_v53 = vsel %vm5037_vm8, %v2593_v0, %v2592_v50  ;;  %v1814_v0 = vsel %vm409_vm3, %v4765_v58, %v1813_v46  ;;  %vm5049_vm3 = vcmask 818176   ;;  %vm5054_vm8 = vcmask 834560  }
 0x217   :  { %v2596_v25 = vmul.f32 %v2594_v53, %v4688_v47  ;;  %v2619_v45 = vpop.permute.xlu1 %2618  ;;  %v1762_v30 = vadd.f32 %v1760_v31, %v1735_v63  ;;  %v1840_v53 = vrot.slane %v4771_v35, 2 }
 0x218   :  { %v2620_v24 = vrot.slane %v2619_v45, 6 }
 0x219   :  { %2598 = vrot.lane.b32.xlu1 %v2596_v25, %s3420_s19  ;;  %v1789_v34 = vadd.f32 %v1787_v62, %v1762_v30  ;;  %v2848_v25 = vld [vmem:[#allocation4 + $0x6] sm:$0x3f]  ;;  %s3435_s19 = smov [#allocation10]  }
 0x21a   :  { %v2621_v54 = vsel %vm5038_vm6, %v2620_v24, %v2619_v45  ;;  %v1975_v24 = vpop.permute.xlu0 %1974  ;;  %vm5053_vm6 = vcmask 900096  }
 0x21b   :  { %v2623_v39 = vmul.f32 %v2621_v54, %v4688_v47  ;;  %v2646_v14 = vpop.permute.xlu1 %2645  ;;  %v1816_v48 = vadd.f32 %v1814_v0, %v1789_v34  ;;  %v1976_v3 = vrot.slane %v1975_v24, 2 }
 0x21c   :  { %v2647_v23 = vrot.slane %v2646_v14, 6 }
 0x21d   :  { %2625 = vrot.lane.b32.xlu0 %v2623_v39, %s3421_s17  ;;  %s5050_s17 = smov 28  }
 0x21e   :  { %v2648_v38 = vsel %vm5039_vm5, %v2647_v23, %v2646_v14  ;;  %v1841_v23 = vsel %vm438_vm0, %v4771_v35, %v1840_v53  ;;  %vm5048_vm0 = vcmask 916480   ;;  %vm5052_vm5 = vcmask 826368  }
 0x21f   :  { %v2650_v15 = vmul.f32 %v2648_v38, %v4688_v47  ;;  %v2674_v28 = vpop.permute.xlu1 %2673  ;;  %v1867_v38 = vrot.slane %v4779_v21, 2  ;;  %v1843_v58 = vadd.f32 %v1841_v23, %v1816_v48 }
 0x220   :  { %v2675_v29 = vrot.slane %v2674_v28, 6 }
 0x221   :  { %2652 = vrot.lane.b32.xlu1 %v2650_v15, %s3422_s18  ;;  %s3051_s18 = sshll.u32 %s3435_s19, 4  ;;  %s3052_s18 = int_to_ptr.vmem [resolvable:$true] %s3051_s18 }
 0x222   :  { %v2676_v18 = vsel %vm934_vm9, %v2675_v29, %v2674_v28  ;;  %p3314_p12 = scmp.lt.s32.totalorder %s3052_s18, %s3052_s18 }
 0x223   :  { %v2678_v52 = vmul.f32 %v2676_v18, %v2658_v36  ;;  %v2701_v41 = vpop.permute.xlu1 %2700 }
 0x224   :  { %v2702_v51 = vrot.slane %v2701_v41, 6 }
 0x225   :  { %2680 = vrot.lane.b32.xlu0 %v2678_v52, %s3378_s8  ;;  %s5040_s8 = smov 45   ;;  %v1894_v52 = vrot.slane %v4783_v6, 2 }
 0x226   :  { %v2703_v47 = vsel %vm1359_vm7, %v2702_v51, %v2701_v41  ;;  %vm5041_vm7 = vcmask 703488  }
 0x227   :  { %v2705_v22 = vmul.f32 %v2703_v47, %v2658_v36  ;;  %v2728_v60 = vpop.permute.xlu1 %2727 }
 0x228   :  { %v2729_v11 = vrot.slane %v2728_v60, 6 }
 0x229   :  { %2707 = vrot.lane.b32.xlu1 %v2705_v22, %s3423_s10  ;;  %v1922_v22 = vrot.slane %v1921_v4, 2  ;;  %s3309_s10 = scalar_lea.vmem %s3052_s18, 64 }
 0x22a   :  { %v2730_v55 = vsel %vm1388_vm10, %v2729_v11, %v2728_v60  ;;  %vm5042_vm10 = vcmask 793600   ;;  %p3310_p11 = scmp.ne.s32.totalorder %s3052_s18, %s3309_s10  ;;  %p3315_p13 = scmp.lt.s32.totalorder %s3309_s10, %s3309_s10 }
 0x22b   :  { %v2732_v19 = vmul.f32 %v2730_v55, %v2658_v36  ;;  %v2755_v9 = vpop.permute.xlu1 %2754 }
 0x22c   :  { %v2756_v33 = vrot.slane %v2755_v9, 6  ;;  %p3316_p0 = por %p3315_p13, %p3314_p12 }
 0x22d   :  { %2734 = vrot.lane.b32.xlu0 %v2732_v19, %s3424_s16 }
 0x22e   :  { %v2757_v59 = vsel %vm1417_vm11, %v2756_v33, %v2755_v9  ;;  %vm5043_vm11 = vcmask 1006592   ;;  %v1923_v9 = vsel %vm5048_vm0, %v1921_v4, %v1922_v22  ;;  %v1949_v33 = vrot.slane %v1948_v40, 2  ;;  %p3317_p1 = pnand %p3316_p0, %p3310_p11 }
 0x22f   :  { %v2759_v1 = vmul.f32 %v2757_v59, %v2658_v36  ;;  %v2782_v32 = vpop.permute.xlu1 %2781  ;;  %v1868_v18 = vsel %vm5043_vm11, %v4779_v21, %v1867_v38  ;;  %v1977_v4 = vsel %vm5053_vm6, %v1975_v24, %v1976_v3  ;;  %vm5057_vm11 = vcmask 875520  }
 0x230   :  { %v2783_v49 = vrot.slane %v2782_v32, 6  ;;  %v1870_v51 = vadd.f32 %v1868_v18, %v1843_v58  ;;  %v1950_v16 = vsel %vm5051_vm4, %v1948_v40, %v1949_v33  ;;  %vm5061_vm0 = vcmask 760832  }
 0x231   :  { %2761 = vrot.lane.b32.xlu1 %v2759_v1, %s5040_s8  ;;  %vm5064_vm4 = vcmask 736256   ;;  %vm5066_vm6 = vcmask 629760  }
 0x232   :  { %v2784_v27 = vsel %vm1446_vm12, %v2783_v49, %v2782_v32  ;;  %vm5044_vm12 = vcmask 801792  }
 0x233   :  { %v2786_v20 = vmul.f32 %v2784_v27, %v2658_v36  ;;  %v2809_v56 = vpop.permute.xlu1 %2808 }
 0x234   :  { %v2810_v10 = vrot.slane %v2809_v56, 6 }
 0x235   :  { %2788 = vrot.lane.b32.xlu0 %v2786_v20, %s3426_s26 }
 0x236   :  { %v2811_v61 = vsel %vm1475_vm13, %v2810_v10, %v2809_v56  ;;  %vm5046_vm13 = vcmask 998400  }
 0x237   :  { %v2813_v42 = vmul.f32 %v2811_v61, %v2658_v36  ;;  %v2836_v37 = vpop.permute.xlu1 %2835  ;;  %v1895_v47 = vsel %vm5046_vm13, %v4783_v6, %v1894_v52  ;;  %vm5059_vm13 = vcmask 777216  }
 0x238   :  { %v2837_v5 = vrot.slane %v2836_v37, 6  ;;  %v1897_v43 = vadd.f32 %v1895_v47, %v1870_v51 }
 0x239   :  { %2815 = vrot.lane.b32.xlu1 %v2813_v42, %s3427_s0 }
 0x23a   :  { %v2838_v17 = vsel %vm5041_vm7, %v2837_v5, %v2836_v37  ;;  %v1925_v59 = vadd.f32 %v1923_v9, %v1897_v43  ;;  %vm5055_vm7 = vcmask 891904  }
 0x23b   :  { %v2840_v2 = vmul.f32 %v2838_v17, %v2658_v36  ;;  %v2864_v44 = vpop.permute.xlu1 %2863  ;;  %v2002_v36 = vpop.permute.xlu0 %2001 }
 0x23c   :  { %v2865_v50 = vrot.slane %v2864_v44, 6  ;;  %v1952_v27 = vadd.f32 %v1950_v16, %v1925_v59  ;;  %v2003_v10 = vrot.slane %v2002_v36, 2 }
 0x23d   :  { %2842 = vrot.lane.b32.xlu0 %v2840_v2, %s3428_s30 }
 0x23e   :  { %v2866_v45 = vsel %vm730_vm15, %v2865_v50, %v2864_v44  ;;  %v1979_v61 = vadd.f32 %v1977_v4, %v1952_v27  ;;  %v2004_v42 = vsel %vm5055_vm7, %v2002_v36, %v2003_v10  ;;  %vm5070_vm7 = vcmask 523264  }
 0x23f   :  { %v2868_v54 = vmul.f32 %v2866_v45, %v2848_v25  ;;  %v2891_v39 = vpop.permute.xlu1 %2890  ;;  %v2029_v11 = vpop.permute.xlu0 %2028 }
 0x240   :  { %v2892_v14 = vrot.slane %v2891_v39, 6  ;;  %v2030_v37 = vrot.slane %v2029_v11, 2  ;;  %v2006_v5 = vadd.f32 %v2004_v42, %v1979_v61 }
 0x241   :  { %2870 = vrot.lane.b32.xlu1 %v2868_v54, %s3371_s20  ;;  %s5045_s20 = smov 30  }
 0x242   :  { %v2893_v15 = vsel %vm5042_vm10, %v2892_v14, %v2891_v39  ;;  %vm5056_vm10 = vcmask 883712  }
 0x243   :  { %v2895_v28 = vmul.f32 %v2893_v15, %v2848_v25  ;;  %v2918_v29 = vpop.permute.xlu1 %2917  ;;  %v2056_v6 = vpop.permute.xlu0 %2055  ;;  %v2031_v62 = vsel %vm5056_vm10, %v2029_v11, %v2030_v37  ;;  %vm5071_vm10 = vcmask 515072  }
 0x244   :  { %v2919_v8 = vrot.slane %v2918_v29, 6  ;;  %v2057_v46 = vrot.slane %v2056_v6, 2  ;;  %v2033_v17 = vadd.f32 %v2031_v62, %v2006_v5 }
 0x245   :  { %2897 = vrot.lane.b32.xlu0 %v2895_v28, %s3429_s4 }
 0x246   :  { %v2920_v41 = vsel %vm5044_vm12, %v2919_v8, %v2918_v29  ;;  %v2058_v34 = vsel %vm5057_vm11, %v2056_v6, %v2057_v46  ;;  %vm5058_vm12 = vcmask 867328   ;;  %vm5072_vm11 = vcmask 506880  }
 0x247   :  { %v2922_v35 = vmul.f32 %v2920_v41, %v2848_v25  ;;  %v2945_v57 = vpop.permute.xlu1 %2944  ;;  %v2083_v13 = vpop.permute.xlu0 %2082  ;;  %v2060_v44 = vadd.f32 %v2058_v34, %v2033_v17 }
 0x248   :  { %v2946_v12 = vrot.slane %v2945_v57, 6  ;;  %v2084_v2 = vrot.slane %v2083_v13, 2 }
 0x249   :  { %2924 = vrot.lane.b32.xlu1 %v2922_v35, %s5045_s20 }
 0x24a   :  { %v2947_v60 = vsel %vm5047_vm14, %v2946_v12, %v2945_v57  ;;  %v2085_v0 = vsel %vm5058_vm12, %v2083_v13, %v2084_v2  ;;  %vm5060_vm14 = vcmask 769024   ;;  %vm5073_vm12 = vcmask 498688  }
 0x24b   :  { %v2949_v55 = vmul.f32 %v2947_v60, %v2848_v25  ;;  %v2972_v21 = vpop.permute.xlu1 %2971  ;;  %v2111_v40 = vpop.permute.xlu0 %2110 }
 0x24c   :  { %v2973_v19 = vrot.slane %v2972_v21, 6  ;;  %v2112_v53 = vrot.slane %v2111_v40, 2 }
 0x24d   :  { %2951 = vrot.lane.b32.xlu0 %v2949_v55, %s3431_s27 }
 0x24e   :  { %v2974_v7 = vsel %vm5049_vm3, %v2973_v19, %v2972_v21  ;;  %v2113_v24 = vsel %vm730_vm15, %v2111_v40, %v2112_v53  ;;  %vm5062_vm3 = vcmask 752640   ;;  %vm5063_vm15 = vcmask 744448  }
 0x24f   :  { %v2976_v1 = vmul.f32 %v2974_v7, %v2848_v25  ;;  %v2999_v32 = vpop.permute.xlu1 %2998  ;;  %v2138_v50 = vpop.permute.xlu0 %2137 }
 0x250   :  { %v3000_v49 = vrot.slane %v2999_v32, 6  ;;  %v2139_v48 = vrot.slane %v2138_v50, 2 }
 0x251   :  { %2978 = vrot.lane.b32.xlu1 %v2976_v1, %s5050_s17 }
 0x252   :  { %v3001_v26 = vsel %vm5052_vm5, %v3000_v49, %v2999_v32  ;;  %v2140_v39 = vsel %vm5059_vm13, %v2138_v50, %v2139_v48  ;;  %vm5065_vm5 = vcmask 637952   ;;  %vm5074_vm13 = vcmask 490496  }
 0x253   :  { %v3003_v63 = vmul.f32 %v3001_v26, %v2848_v25  ;;  %v3026_v20 = vpop.permute.xlu1 %3025  ;;  %v2165_v45 = vpop.permute.xlu0 %2164 }
 0x254   :  { %v3027_v56 = vrot.slane %v3026_v20, 6  ;;  %v2166_v14 = vrot.slane %v2165_v45, 2 }
 0x255   :  { %3005 = vrot.lane.b32.xlu0 %v3003_v63, %s3433_s29 }
 0x256   :  { %v3028_v31 = vsel %vm5054_vm8, %v3027_v56, %v3026_v20  ;;  %v2167_v58 = vsel %vm5060_vm14, %v2165_v45, %v2166_v14  ;;  %vm5067_vm8 = vcmask 621568   ;;  %vm5075_vm14 = vcmask 482304  }
 0x257   :  { %v3030_v30 = vmul.f32 %v3028_v31, %v2848_v25  ;;  %v2087_v25 = vadd.f32 %v2085_v0, %v2060_v44  ;;  %v2192_v38 = vpop.permute.xlu0 %2191  ;;  %v2219_v15 = vpop.permute.xlu1 %2218 }
 0x258   :  { %v2193_v28 = vrot.slane %v2192_v38, 2  ;;  %v2220_v29 = vrot.slane %v2219_v15, 2 }
 0x259   :  { %3032 = vrot.lane.b32.xlu1 %v3030_v30, %s3434_s11  ;;  %v2115_v54 = vadd.f32 %v2113_v24, %v2087_v25 }
 0x25a   :  { %v2194_v18 = vsel %vm5061_vm0, %v2192_v38, %v2193_v28  ;;  %v2221_v52 = vsel %vm5062_vm3, %v2219_v15, %v2220_v29  ;;  %vm5076_vm0 = vcmask 474112   ;;  %vm5077_vm3 = vcmask 392192  }
 0x25b   :  { %v2142_v23 = vadd.f32 %v2140_v39, %v2115_v54  ;;  %v2246_v36 = vpop.permute.xlu0 %2245  ;;  %v2273_v51 = vpop.permute.xlu1 %2272 }
 0x25c   :  { %v2247_v35 = vrot.slane %v2246_v36, 2  ;;  %v2274_v12 = vrot.slane %v2273_v51, 2 }
 0x25d   :  { %v2169_v8 = vadd.f32 %v2167_v58, %v2142_v23 }
 0x25e   :  { %v2248_v47 = vsel %vm5063_vm15, %v2246_v36, %v2247_v35  ;;  %v2275_v11 = vsel %vm5064_vm4, %v2273_v51, %v2274_v12  ;;  %vm5078_vm15 = vcmask 384000   ;;  %vm5079_vm4 = vcmask 375808  }
 0x25f   :  { %v2196_v41 = vadd.f32 %v2194_v18, %v2169_v8  ;;  %v2301_v22 = vpop.permute.xlu0 %2300  ;;  %v2328_v43 = vpop.permute.xlu1 %2327 }
 0x260   :  { %v2302_v55 = vrot.slane %v2301_v22, 2  ;;  %v2329_v19 = vrot.slane %v2328_v43, 2 }
 0x261   :  { %v2223_v57 = vadd.f32 %v2221_v52, %v2196_v41 }
 0x262   :  { %v2303_v9 = vsel %vm934_vm9, %v2301_v22, %v2302_v55  ;;  %v2330_v59 = vsel %vm963_vm1, %v2328_v43, %v2329_v19  ;;  %vm5068_vm9 = vcmask 613376   ;;  %vm5069_vm1 = vcmask 605184  }
 0x263   :  { %v2250_v60 = vadd.f32 %v2248_v47, %v2223_v57  ;;  %v2355_v33 = vpop.permute.xlu0 %2354  ;;  %v2382_v1 = vpop.permute.xlu1 %2381 }
 0x264   :  { %v2356_v32 = vrot.slane %v2355_v33, 2  ;;  %v2383_v6 = vrot.slane %v2382_v1, 2 }
 0x265   :  { %v2277_v21 = vadd.f32 %v2275_v11, %v2250_v60 }
 0x266   :  { %v2357_v16 = vsel %vm5065_vm5, %v2355_v33, %v2356_v32  ;;  %v2384_v27 = vsel %vm5066_vm6, %v2382_v1, %v2383_v6  ;;  %vm5080_vm5 = vcmask 367616   ;;  %vm5081_vm6 = vcmask 359424  }
 0x267   :  { %v2305_v7 = vadd.f32 %v2303_v9, %v2277_v21  ;;  %v2409_v3 = vpop.permute.xlu0 %2408  ;;  %v2436_v63 = vpop.permute.xlu1 %2435 }
 0x268   :  { %v2410_v20 = vrot.slane %v2409_v3, 2  ;;  %v2437_v4 = vrot.slane %v2436_v63, 2 }
 0x269   :  { %v2332_v49 = vadd.f32 %v2330_v59, %v2305_v7 }
 0x26a   :  { %v2411_v10 = vsel %vm5067_vm8, %v2409_v3, %v2410_v20  ;;  %v2438_v61 = vsel %vm5068_vm9, %v2436_v63, %v2437_v4  ;;  %vm5082_vm8 = vcmask 351232   ;;  %vm5083_vm9 = vcmask 343040  }
 0x26b   :  { %v2359_v26 = vadd.f32 %v2357_v16, %v2332_v49  ;;  %v2463_v31 = vpop.permute.xlu0 %2462  ;;  %v2491_v30 = vpop.permute.xlu1 %2490 }
 0x26c   :  { %v2464_v42 = vrot.slane %v2463_v31, 2  ;;  %v2492_v5 = vrot.slane %v2491_v30, 2 }
 0x26d   :  { %v2386_v56 = vadd.f32 %v2384_v27, %v2359_v26 }
 0x26e   :  { %v2465_v40 = vsel %vm5069_vm1, %v2463_v31, %v2464_v42  ;;  %v2493_v17 = vsel %vm5070_vm7, %v2491_v30, %v2492_v5  ;;  %vm5084_vm1 = vcmask 261120   ;;  %vm5085_vm7 = vcmask 252928  }
 0x26f   :  { %v2413_v13 = vadd.f32 %v2411_v10, %v2386_v56  ;;  %v2518_v62 = vpop.permute.xlu0 %2517  ;;  %v2545_v34 = vpop.permute.xlu1 %2544 }
 0x270   :  { %v2519_v2 = vrot.slane %v2518_v62, 2  ;;  %v2546_v50 = vrot.slane %v2545_v34, 2 }
 0x271   :  { %v2440_v37 = vadd.f32 %v2438_v61, %v2413_v13 }
 0x272   :  { %v2520_v53 = vsel %vm5071_vm10, %v2518_v62, %v2519_v2  ;;  %v2547_v24 = vsel %vm5072_vm11, %v2545_v34, %v2546_v50  ;;  %vm5086_vm10 = vcmask 244736   ;;  %vm5087_vm11 = vcmask 228352  }
 0x273   :  { %v2467_v46 = vadd.f32 %v2465_v40, %v2440_v37  ;;  %v2572_v0 = vpop.permute.xlu0 %2571 }
 0x274   :  { %v2573_v54 = vrot.slane %v2572_v0, 2 }
 0x275   :  { %v2495_v44 = vadd.f32 %v2493_v17, %v2467_v46 }
 0x276   :  { %v2574_v58 = vsel %vm5073_vm12, %v2572_v0, %v2573_v54  ;;  %vm5088_vm12 = vcmask 220160  }
 0x277   :  { %v2522_v25 = vadd.f32 %v2520_v53, %v2495_v44 }
 0x279   :  { %v2549_v14 = vadd.f32 %v2547_v24, %v2522_v25 }
 0x27b   :  { %v2576_v8 = vadd.f32 %v2574_v58, %v2549_v14 }
 0x28b   :  { %v2599_v45 = vpop.permute.xlu1 %2598 }
 0x28c   :  { %v2600_v39 = vrot.slane %v2599_v45, 2 }
 0x28e   :  { %v2601_v28 = vsel %vm5074_vm13, %v2599_v45, %v2600_v39  ;;  %vm5089_vm13 = vcmask 211968  }
 0x28f   :  { %v2626_v48 = vpop.permute.xlu0 %2625  ;;  %v2603_v41 = vadd.f32 %v2601_v28, %v2576_v8 }
 0x290   :  { %v2627_v38 = vrot.slane %v2626_v48, 2 }
 0x292   :  { %v2628_v18 = vsel %vm5075_vm14, %v2626_v48, %v2627_v38 }
 0x293   :  { %v2653_v23 = vpop.permute.xlu1 %2652  ;;  %v2630_v12 = vadd.f32 %v2628_v18, %v2603_v41 }
 0x294   :  { %v2654_v29 = vrot.slane %v2653_v23, 2 }
 0x296   :  { %v2655_v35 = vsel %vm5076_vm0, %v2653_v23, %v2654_v29 }
 0x297   :  { %v2681_v15 = vpop.permute.xlu0 %2680  ;;  %v2657_v11 = vadd.f32 %v2655_v35, %v2630_v12 }
 0x298   :  { %v2682_v52 = vrot.slane %v2681_v15, 2 }
 0x29a   :  { %v2683_v22 = vsel %vm5077_vm3, %v2681_v15, %v2682_v52 }
 0x29b   :  { %v2708_v36 = vpop.permute.xlu1 %2707  ;;  %v2685_v19 = vadd.f32 %v2683_v22, %v2657_v11 }
 0x29c   :  { %v2709_v57 = vrot.slane %v2708_v36, 2 }
 0x29e   :  { %v2710_v55 = vsel %vm5078_vm15, %v2708_v36, %v2709_v57 }
 0x29f   :  { %v2735_v51 = vpop.permute.xlu0 %2734  ;;  %v2712_v59 = vadd.f32 %v2710_v55, %v2685_v19 }
 0x2a0   :  { %v2736_v60 = vrot.slane %v2735_v51, 2 }
 0x2a2   :  { %v2737_v33 = vsel %vm5079_vm4, %v2735_v51, %v2736_v60 }
 0x2a3   :  { %v2762_v47 = vpop.permute.xlu1 %2761  ;;  %v2739_v6 = vadd.f32 %v2737_v33, %v2712_v59 }
 0x2a4   :  { %v2763_v21 = vrot.slane %v2762_v47, 2 }
 0x2a6   :  { %v2764_v32 = vsel %vm5080_vm5, %v2762_v47, %v2763_v21 }
 0x2a7   :  { %v2789_v43 = vpop.permute.xlu0 %2788  ;;  %v2766_v27 = vadd.f32 %v2764_v32, %v2739_v6 }
 0x2a8   :  { %v2790_v7 = vrot.slane %v2789_v43, 2 }
 0x2aa   :  { %v2791_v3 = vsel %vm5081_vm6, %v2789_v43, %v2790_v7 }
 0x2ab   :  { %v2816_v9 = vpop.permute.xlu1 %2815  ;;  %v2793_v4 = vadd.f32 %v2791_v3, %v2766_v27 }
 0x2ac   :  { %v2817_v49 = vrot.slane %v2816_v9, 2 }
 0x2ae   :  { %v2818_v20 = vsel %vm5082_vm8, %v2816_v9, %v2817_v49 }
 0x2af   :  { %v2843_v1 = vpop.permute.xlu0 %2842  ;;  %v2820_v61 = vadd.f32 %v2818_v20, %v2793_v4 }
 0x2b0   :  { %v2844_v26 = vrot.slane %v2843_v1, 2 }
 0x2b2   :  { %v2845_v31 = vsel %vm5083_vm9, %v2843_v1, %v2844_v26 }
 0x2b3   :  { %v2871_v16 = vpop.permute.xlu1 %2870  ;;  %v2847_v5 = vadd.f32 %v2845_v31, %v2820_v61 }
 0x2b4   :  { %v2872_v56 = vrot.slane %v2871_v16, 2 }
 0x2b6   :  { %v2873_v42 = vsel %vm5084_vm1, %v2871_v16, %v2872_v56 }
 0x2b7   :  { %v2898_v63 = vpop.permute.xlu0 %2897  ;;  %v2875_v46 = vadd.f32 %v2873_v42, %v2847_v5 }
 0x2b8   :  { %v2899_v13 = vrot.slane %v2898_v63, 2 }
 0x2ba   :  { %v2900_v40 = vsel %vm5085_vm7, %v2898_v63, %v2899_v13 }
 0x2bb   :  { %v2925_v10 = vpop.permute.xlu1 %2924  ;;  %v2902_v44 = vadd.f32 %v2900_v40, %v2875_v46 }
 0x2bc   :  { %v2926_v37 = vrot.slane %v2925_v10, 2 }
 0x2be   :  { %v2927_v34 = vsel %vm5086_vm10, %v2925_v10, %v2926_v37 }
 0x2bf   :  { %v2952_v30 = vpop.permute.xlu0 %2951  ;;  %v2929_v0 = vadd.f32 %v2927_v34, %v2902_v44 }
 0x2c0   :  { %v2953_v62 = vrot.slane %v2952_v30, 2 }
 0x2c2   :  { %v2954_v50 = vsel %vm1627_vm2, %v2952_v30, %v2953_v62 }
 0x2c3   :  { %v2979_v17 = vpop.permute.xlu1 %2978  ;;  %v2956_v24 = vadd.f32 %v2954_v50, %v2929_v0 }
 0x2c4   :  { %v2980_v2 = vrot.slane %v2979_v17, 2 }
 0x2c6   :  { %v2981_v25 = vsel %vm5087_vm11, %v2979_v17, %v2980_v2 }
 0x2c7   :  { %v3006_v53 = vpop.permute.xlu0 %3005  ;;  %v2983_v54 = vadd.f32 %v2981_v25, %v2956_v24 }
 0x2c8   :  { %v3007_v45 = vrot.slane %v3006_v53, 2 }
 0x2ca   :  { %v3008_v48 = vsel %vm5088_vm12, %v3006_v53, %v3007_v45 }
 0x2cb   :  { %v3033_v39 = vpop.permute.xlu1 %3032  ;;  %v3010_v23 = vadd.f32 %v3008_v48, %v2983_v54 }
 0x2cc   :  { %v3034_v14 = vrot.slane %v3033_v39, 2 }
 0x2ce   :  { %v3035_v38 = vsel %vm5089_vm13, %v3033_v39, %v3034_v14 }
 0x2cf   :  { %v3037_v15 = vadd.f32 %v3035_v38, %v3010_v23 }
 0x2d1   :  { %v3169_v58 = vmul.f32 -1.442695, %v3037_v15 }
 0x2d3   :  { %3271 = vpow2.f32 %v3169_v58 }
 0x2dd   :  { %v3272_v28 = vpop.eup %3271 }
 0x2de   :  { %v3041_v29 = vadd.f32 1.0, %v3272_v28 }
 0x2e0   :  { %3273 = vrcp.f32 %v3041_v29 }
 0x2ea   :  { %v3274_v8 = vpop.eup %3273 }
 0x2eb   :  { %3044 = vst [vmem:[#allocation10] sm:$0xf] %v3274_v8 }
 0x2ec   :  { %3320 = shalt.err (!%p3317_p1)
}
 0x2ed   :  { %s3321_s0 = scalar_lea.hbm %s4883_s2, 64 }
 0x2ee   :  { %p3322_p2 = scmp.ne.s32.totalorder %s4883_s2, %s3321_s0  ;;  %p3325_p3 = scmp.lt.u32.totalorder %s3321_s0, %s4883_s2 }
 0x2f0   :  { %p3327_p4 = pnand %p3325_p3, %p3322_p2 }
 0x2f2   :  { %3330 = shalt.err (!%p3327_p4)
}
 0x2f3   :  { %3054 = dma.vmem_to_hbm [thread:$0]  %s3052_s18, 64, %s4883_s2, [#allocation9]  }
 0x2f4   :  { %3335 = dma.done.wait [#allocation9], 64  }
 0x2f5   :  { %3336 = vsyncadd [#allocation9], 4294967232 }
 0x2f6   :  { %3058 = vsyncpa [#allocation8], 1 }
 0x2f7   :  { %3059 = vsyncpa [#allocation9], 1 }

</bundles_post_ra>
